<compile_context>
chip_gen: v7x
topology: tpu7x:2x2x1
jax: 0.10.0
libtpu: 0.0.40
codegen_flags: <defaults>
</compile_context>

<pallas_src>
import functools

import jax
import jax.numpy as jnp
from jax.experimental import pallas as pl
from jax.experimental.pallas import tpu as pltpu


def _round_up(x, m):
    return ((x + m - 1) // m) * m


def actor_kernel(x_ref, w1_ref, b1_ref, w2_ref, b2_ref, w3_ref, b3_ref,
                 o_ref, a1_ref):
    """Grid: (batch tiles ["parallel"], hidden-dim panels ["arbitrary"]).

    Axis 0 (i) walks batch tiles; axis 1 (j) walks panels of the hidden dim
    (columns of w2 / rows of w3).  With the default panel = Hp, axis 1 has a
    single step.
    """
    j = pl.program_id(1)

    @pl.when(j == 0)
    def _():
        # Layer 1 runs once per batch tile; result stays resident in VMEM
        # scratch (bf16) across the hidden-dim panels.
        a1 = jnp.dot(x_ref[...], w1_ref[...],
                     preferred_element_type=jnp.float32) + b1_ref[...]
        a1_ref[...] = jnp.maximum(a1, 0.0).astype(a1_ref.dtype)
        # Fold the layer-3 bias in as the accumulator init.
        o_ref[...] = jnp.broadcast_to(b3_ref[...], o_ref.shape)

    # Layer 2 for this w2 N-panel (ReLU fused on the VPU), then the panel's
    # layer-3 partial accumulated into the resident f32 output block.
    a2 = jnp.dot(a1_ref[...], w2_ref[...],
                 preferred_element_type=jnp.float32) + b2_ref[...]
    a2 = jnp.maximum(a2, 0.0).astype(w3_ref.dtype)
    o_ref[...] += jnp.dot(a2, w3_ref[...], preferred_element_type=jnp.float32)


def prepare_actor_params(params):
    """One-time padding + bf16 cast of the Actor weights.

    Call this once (e.g. right after init / load) and reuse the result for
    every forward call -- do NOT re-pad per step.
    """
    w1, b1 = params["w1"], params["b1"]
    w2, b2 = params["w2"], params["b2"]
    w3, b3 = params["w3"], params["b3"]
    S, H = w1.shape
    A = w3.shape[1]
    Sp = _round_up(S, 128)
    Hp = _round_up(H, 128)
    Ap = _round_up(A, 128)

    def pad2(a, rows, cols):
        return jnp.pad(a, ((0, rows - a.shape[0]), (0, cols - a.shape[1])))

    # Zero padding keeps the math exact: padded hidden units see zero incoming
    # weights (relu(0) = 0) and have zero outgoing weights; padded output
    # columns are sliced off in the wrapper.
    return dict(
        w1=pad2(w1, Sp, Hp).astype(jnp.bfloat16),
        w2=pad2(w2, Hp, Hp).astype(jnp.bfloat16),
        w3=pad2(w3, Hp, Ap).astype(jnp.bfloat16),
        # Biases stay f32 (tiny) and lane-dense as (1, N) rows.
        b1=jnp.pad(b1, (0, Hp - H)).reshape(1, Hp).astype(jnp.float32),
        b2=jnp.pad(b2, (0, Hp - H)).reshape(1, Hp).astype(jnp.float32),
        b3=jnp.pad(b3, (0, Ap - A)).reshape(1, Ap).astype(jnp.float32),
    )


@functools.partial(jax.jit, static_argnames=("out_dim", "panel", "batch_tile"))
def actor_forward(x, padded, *, out_dim, panel=None, batch_tile=256):
    """x: (B, state_dim) float32.  padded: output of prepare_actor_params.

    panel:      hidden-dim panel width.  Default (None) = single grid step
                (panel = Hp); the full weight set is only ~2.5 MiB bf16 so
                minimizing grid-step overhead beats finer pipelining.
    batch_tile: batch rows per grid step along the leading "parallel" axis;
                only relevant when B > batch_tile (engages megacore on v7x).
    """
    B, S = x.shape
    Sp, Hp = padded["w1"].shape
    Ap = padded["w3"].shape[1]
    # Pad batch to >=16 rows (bf16-friendly sublane count); cheap, exact.
    Bp = _round_up(max(B, 16), 16)

    xp = x
    if (Bp, Sp) != (B, S):
        xp = jnp.pad(x, ((0, Bp - B), (0, Sp - S)))
    xp = xp.astype(jnp.bfloat16)

    # Hidden-dim panel: default = whole hidden dim (1 step on axis 1).
    if panel is None or panel > Hp or Hp % panel != 0:
        panel = Hp
    # Batch tile: single tile for small batches; split (and let megacore shard
    # the "parallel" axis) only when the batch is large.
    bt = Bp if Bp <= batch_tile else batch_tile
    if Bp % bt != 0:
        bt = Bp  # fall back to one tile rather than over-padding the batch
    grid = (Bp // bt, Hp // panel)

    out = pl.pallas_call(
        actor_kernel,
        out_shape=jax.ShapeDtypeStruct((Bp, Ap), jnp.float32),
        grid=grid,
        in_specs=[
            pl.BlockSpec((bt, Sp), lambda i, j: (i, 0)),      # x tile
            pl.BlockSpec((Sp, Hp), lambda i, j: (0, 0)),      # w1 (resident)
            pl.BlockSpec((1, Hp), lambda i, j: (0, 0)),       # b1 (resident)
            pl.BlockSpec((Hp, panel), lambda i, j: (0, j)),   # w2 panel
            pl.BlockSpec((1, panel), lambda i, j: (0, j)),    # b2 panel
            pl.BlockSpec((panel, Ap), lambda i, j: (j, 0)),   # w3 panel
            pl.BlockSpec((1, Ap), lambda i, j: (0, 0)),       # b3 (resident)
        ],
        out_specs=pl.BlockSpec((bt, Ap), lambda i, j: (i, 0)),  # accumulator
        scratch_shapes=[pltpu.VMEM((bt, Hp), jnp.bfloat16)],    # a1 (persistent)
        compiler_params=pltpu.CompilerParams(
            dimension_semantics=("parallel", "arbitrary")),
    )(xp, padded["w1"], padded["b1"], padded["w2"], padded["b2"],
      padded["w3"], padded["b3"])
    return out[:B, :out_dim]


def init_actor_params(key, state_dim, action_dim):
    """Deterministic init mirroring nn.Linear's U(-1/sqrt(fan_in), 1/sqrt(fan_in))."""
    out_dim = int(sum(action_dim))
    dims = [(state_dim, 1000), (1000, 1000), (1000, out_dim)]
    params = {}
    for i, (fan_in, fan_out) in enumerate(dims, start=1):
        key, kw, kb = jax.random.split(key, 3)
        bound = 1.0 / jnp.sqrt(jnp.float32(fan_in))
        params[f"w{i}"] = jax.random.uniform(
            kw, (fan_in, fan_out), jnp.float32, -bound, bound)
        params[f"b{i}"] = jax.random.uniform(
            kb, (fan_out,), jnp.float32, -bound, bound)
    return params


def actor_reference_bf16(x, params):
    """Reference matching the kernel's numerics: bf16 operands, f32 accumulate."""
    hi = jax.lax.Precision.HIGHEST
    q = lambda a: a.astype(jnp.bfloat16).astype(jnp.float32)
    a1 = jnp.maximum(
        jnp.dot(q(x), q(params["w1"]), precision=hi) + params["b1"], 0.0)
    a2 = jnp.maximum(
        jnp.dot(q(a1), q(params["w2"]), precision=hi) + params["b2"], 0.0)
    return jnp.dot(q(a2), q(params["w3"]), precision=hi) + params["b3"]


def actor_reference_f32(x, params):
    """Pure-f32 module semantics (for a loose sanity check)."""
    hi = jax.lax.Precision.HIGHEST
    a1 = jnp.maximum(jnp.dot(x, params["w1"], precision=hi) + params["b1"], 0.0)
    a2 = jnp.maximum(jnp.dot(a1, params["w2"], precision=hi) + params["b2"], 0.0)
    return jnp.dot(a2, params["w3"], precision=hi) + params["b3"]


if __name__ == "__main__":
    key = jax.random.PRNGKey(0)
    state_dim = 32
    action_dim = [3, 4, 5]          # multi-discrete action space -> output dim 12
    batch = 2
    out_dim = int(sum(action_dim))

    kp, kx = jax.random.split(key)
    params = init_actor_params(kp, state_dim, action_dim)
    x = jax.random.normal(kx, (batch, state_dim), jnp.float32)

    # One-time prep (padding + bf16 cast) -- hoisted out of the forward path.
    padded = prepare_actor_params(params)

    out = actor_forward(x, padded, out_dim=out_dim)
    out = jax.block_until_ready(out)
    assert out.shape == (batch, out_dim), out.shape

    # Exact-numerics check (bf16 operands, f32 accumulation).
    ref_bf16 = actor_reference_bf16(x, params)
    assert jnp.allclose(out, ref_bf16, atol=1e-3, rtol=1e-3), (
        float(jnp.max(jnp.abs(out - ref_bf16))))

    # Loose check against the original f32 module semantics (bf16 streaming
    # introduces only ~1e-3-scale deviations at these magnitudes).
    ref_f32 = actor_reference_f32(x, params)
    assert jnp.allclose(out, ref_f32, atol=5e-2, rtol=5e-2), (
        float(jnp.max(jnp.abs(out - ref_f32))))

    # Sanity: a larger batch exercising the multi-tile "parallel" batch axis.
    xb = jax.random.normal(kx, (600, state_dim), jnp.float32)
    outb = jax.block_until_ready(actor_forward(xb, padded, out_dim=out_dim))
    refb = actor_reference_bf16(xb, params)
    assert outb.shape == (600, out_dim)
    assert jnp.allclose(outb, refb, atol=1e-3, rtol=1e-3), (
        float(jnp.max(jnp.abs(outb - refb))))

    print("KERNEL_OK")
</pallas_src>

<mosaic_0001>
module attributes {stable_mosaic.version = 11 : i64} {
  func.func @actor_kernel(%arg0: i32, %arg1: i32, %arg2: memref<16x128xbf16, #tpu.memory_space<vmem>>, %arg3: memref<128x1024xbf16, #tpu.memory_space<vmem>>, %arg4: memref<1x1024xf32, #tpu.memory_space<vmem>>, %arg5: memref<1024x1024xbf16, #tpu.memory_space<vmem>>, %arg6: memref<1x1024xf32, #tpu.memory_space<vmem>>, %arg7: memref<1024x128xbf16, #tpu.memory_space<vmem>>, %arg8: memref<1x128xf32, #tpu.memory_space<vmem>>, %arg9: memref<16x128xf32, #tpu.memory_space<vmem>>, %arg10: memref<16x1024xbf16, #tpu.memory_space<vmem>>) attributes {dimension_semantics = [#tpu.dimension_semantics<parallel>, #tpu.dimension_semantics<arbitrary>], iteration_bounds = array<i64: 1, 1>, scalar_prefetch = 0 : i64, scratch_operands = 1 : i64, tpu.core_type = #tpu.core_type<tc>, window_params = [{transform_indices = @transform_0, window_bounds = array<i64: 16, 128>}, {pipeline_mode = #tpu.pipeline_mode<synchronous>, transform_indices = @transform_1, window_bounds = array<i64: 128, 1024>}, {pipeline_mode = #tpu.pipeline_mode<synchronous>, transform_indices = @transform_2, window_bounds = array<i64: 1, 1024>}, {transform_indices = @transform_3, window_bounds = array<i64: 1024, 1024>}, {transform_indices = @transform_4, window_bounds = array<i64: 1, 1024>}, {transform_indices = @transform_5, window_bounds = array<i64: 1024, 128>}, {pipeline_mode = #tpu.pipeline_mode<synchronous>, transform_indices = @transform_6, window_bounds = array<i64: 1, 128>}, {transform_indices = @transform_7, window_bounds = array<i64: 16, 128>}]} {
    %c0_i32 = arith.constant 0 : i32
    %0 = arith.cmpi eq, %arg1, %c0_i32 : i32
    %1 = arith.extui %0 : i1 to i32
    %c0_i32_0 = arith.constant 0 : i32
    %2 = arith.cmpi ne, %1, %c0_i32_0 : i32
    scf.if %2 {
      %c0_14 = arith.constant 0 : index
      %c0_15 = arith.constant 0 : index
      %17 = vector.load %arg2[%c0_14, %c0_15] : memref<16x128xbf16, #tpu.memory_space<vmem>>, vector<16x128xbf16>
      %c0_16 = arith.constant 0 : index
      %c0_17 = arith.constant 0 : index
      %18 = vector.load %arg3[%c0_16, %c0_17] : memref<128x1024xbf16, #tpu.memory_space<vmem>>, vector<128x1024xbf16>
      %cst_18 = arith.constant dense<0.000000e+00> : vector<16x1024xf32>
      %19 = tpu.matmul %17, %18, %cst_18 {dimension_numbers = #tpu.dot_dimension_numbers<[1], [0], [0], [1], [0, 0, 1, 1], [], []>} : vector<16x128xbf16>, vector<128x1024xbf16>, vector<16x1024xf32> -> vector<16x1024xf32>
      %c0_19 = arith.constant 0 : index
      %c0_20 = arith.constant 0 : index
      %20 = vector.load %arg4[%c0_19, %c0_20] : memref<1x1024xf32, #tpu.memory_space<vmem>>, vector<1x1024xf32>
      %21 = vector.broadcast %20 : vector<1x1024xf32> to vector<16x1024xf32>
      %22 = arith.addf %19, %21 : vector<16x1024xf32>
      %cst_21 = arith.constant 0.000000e+00 : f32
      %23 = vector.broadcast %cst_21 : f32 to vector<16x1024xf32>
      %24 = arith.maximumf %22, %23 : vector<16x1024xf32>
      %25 = arith.truncf %24 : vector<16x1024xf32> to vector<16x1024xbf16>
      %c0_22 = arith.constant 0 : index
      %c0_23 = arith.constant 0 : index
      %26 = vector.load %arg10[%c0_22, %c0_23] : memref<16x1024xbf16, #tpu.memory_space<vmem>>, vector<16x1024xbf16>
      tpu.vector_store %arg10[%c0_22, %c0_23], %25 {strides = array<i32>} : memref<16x1024xbf16, #tpu.memory_space<vmem>>, vector<16x1024xbf16>,
      %c0_24 = arith.constant 0 : index
      %c0_25 = arith.constant 0 : index
      %27 = vector.load %arg8[%c0_24, %c0_25] : memref<1x128xf32, #tpu.memory_space<vmem>>, vector<1x128xf32>
      %28 = vector.shape_cast %27 : vector<1x128xf32> to vector<1x128xf32>
      %29 = vector.broadcast %28 : vector<1x128xf32> to vector<16x128xf32>
      %c0_26 = arith.constant 0 : index
      %c0_27 = arith.constant 0 : index
      %30 = vector.load %arg9[%c0_26, %c0_27] : memref<16x128xf32, #tpu.memory_space<vmem>>, vector<16x128xf32>
      tpu.vector_store %arg9[%c0_26, %c0_27], %29 {strides = array<i32>} : memref<16x128xf32, #tpu.memory_space<vmem>>, vector<16x128xf32>,
    } else {
    }
    %c0 = arith.constant 0 : index
    %c0_1 = arith.constant 0 : index
    %3 = vector.load %arg10[%c0, %c0_1] : memref<16x1024xbf16, #tpu.memory_space<vmem>>, vector<16x1024xbf16>
    %c0_2 = arith.constant 0 : index
    %c0_3 = arith.constant 0 : index
    %4 = vector.load %arg5[%c0_2, %c0_3] : memref<1024x1024xbf16, #tpu.memory_space<vmem>>, vector<1024x1024xbf16>
    %cst = arith.constant dense<0.000000e+00> : vector<16x1024xf32>
    %5 = tpu.matmul %3, %4, %cst {dimension_numbers = #tpu.dot_dimension_numbers<[1], [0], [0], [1], [0, 0, 1, 1], [], []>} : vector<16x1024xbf16>, vector<1024x1024xbf16>, vector<16x1024xf32> -> vector<16x1024xf32>
    %c0_4 = arith.constant 0 : index
    %c0_5 = arith.constant 0 : index
    %6 = vector.load %arg6[%c0_4, %c0_5] : memref<1x1024xf32, #tpu.memory_space<vmem>>, vector<1x1024xf32>
    %7 = vector.broadcast %6 : vector<1x1024xf32> to vector<16x1024xf32>
    %8 = arith.addf %5, %7 : vector<16x1024xf32>
    %cst_6 = arith.constant 0.000000e+00 : f32
    %9 = vector.broadcast %cst_6 : f32 to vector<16x1024xf32>
    %10 = arith.maximumf %8, %9 : vector<16x1024xf32>
    %11 = arith.truncf %10 : vector<16x1024xf32> to vector<16x1024xbf16>
    %c0_7 = arith.constant 0 : index
    %c0_8 = arith.constant 0 : index
    %12 = vector.load %arg9[%c0_7, %c0_8] : memref<16x128xf32, #tpu.memory_space<vmem>>, vector<16x128xf32>
    %c0_9 = arith.constant 0 : index
    %c0_10 = arith.constant 0 : index
    %13 = vector.load %arg7[%c0_9, %c0_10] : memref<1024x128xbf16, #tpu.memory_space<vmem>>, vector<1024x128xbf16>
    %cst_11 = arith.constant dense<0.000000e+00> : vector<16x128xf32>
    %14 = tpu.matmul %11, %13, %cst_11 {dimension_numbers = #tpu.dot_dimension_numbers<[1], [0], [0], [1], [0, 0, 1, 1], [], []>} : vector<16x1024xbf16>, vector<1024x128xbf16>, vector<16x128xf32> -> vector<16x128xf32>
    %15 = arith.addf %12, %14 : vector<16x128xf32>
    %c0_12 = arith.constant 0 : index
    %c0_13 = arith.constant 0 : index
    %16 = vector.load %arg9[%c0_12, %c0_13] : memref<16x128xf32, #tpu.memory_space<vmem>>, vector<16x128xf32>
    tpu.vector_store %arg9[%c0_12, %c0_13], %15 {strides = array<i32>} : memref<16x128xf32, #tpu.memory_space<vmem>>, vector<16x128xf32>,
    return
  }
  func.func @transform_0(%arg0: i32, %arg1: i32) -> (i32, i32) {
    %c0_i32 = arith.constant 0 : i32
    %c0_i32_0 = arith.constant 0 : i32
    return %arg0, %c0_i32 : i32, i32
  }
  func.func @transform_1(%arg0: i32, %arg1: i32) -> (i32, i32) {
    %c0_i32 = arith.constant 0 : i32
    %c0_i32_0 = arith.constant 0 : i32
    %c0_i32_1 = arith.constant 0 : i32
    return %c0_i32, %c0_i32_0 : i32, i32
  }
  func.func @transform_2(%arg0: i32, %arg1: i32) -> (i32, i32) {
    %c0_i32 = arith.constant 0 : i32
    %c0_i32_0 = arith.constant 0 : i32
    %c0_i32_1 = arith.constant 0 : i32
    return %c0_i32, %c0_i32_0 : i32, i32
  }
  func.func @transform_3(%arg0: i32, %arg1: i32) -> (i32, i32) {
    %c0_i32 = arith.constant 0 : i32
    %c0_i32_0 = arith.constant 0 : i32
    return %c0_i32, %arg1 : i32, i32
  }
  func.func @transform_4(%arg0: i32, %arg1: i32) -> (i32, i32) {
    %c0_i32 = arith.constant 0 : i32
    %c0_i32_0 = arith.constant 0 : i32
    return %c0_i32, %arg1 : i32, i32
  }
  func.func @transform_5(%arg0: i32, %arg1: i32) -> (i32, i32) {
    %c0_i32 = arith.constant 0 : i32
    %c0_i32_0 = arith.constant 0 : i32
    return %arg1, %c0_i32 : i32, i32
  }
  func.func @transform_6(%arg0: i32, %arg1: i32) -> (i32, i32) {
    %c0_i32 = arith.constant 0 : i32
    %c0_i32_0 = arith.constant 0 : i32
    %c0_i32_1 = arith.constant 0 : i32
    return %c0_i32, %c0_i32_0 : i32, i32
  }
  func.func @transform_7(%arg0: i32, %arg1: i32) -> (i32, i32) {
    %c0_i32 = arith.constant 0 : i32
    %c0_i32_0 = arith.constant 0 : i32
    return %arg0, %c0_i32 : i32, i32
  }
}

</mosaic_0001>

<bundles_post_ra>
// kernel: actor_forward.1
= control target key start
LH: loop header
LB: loop body
LE: loop exit
PB: predicated region body
PF: predicated region fallthrough
CT: control target
= control target key end

     0   :  { %12 = vsyncpa [#allocation4], 0  ;;  %s6568_s0 = inlined_call_operand.vmem [shape: bf16[16,128], index: 0, kind: input, shape index: {}]   ;;  %s6569_s1 = inlined_call_operand.hbm [shape: bf16[128,1024], index: 1, kind: input, shape index: {}]   ;;  %s6570_s2 = inlined_call_operand.hbm [shape: f32[1,1024], index: 2, kind: input, shape index: {}]   ;;  %s6571_s3 = inlined_call_operand.hbm [shape: bf16[1024,1024], index: 3, kind: input, shape index: {}]   ;;  %s6572_s4 = inlined_call_operand.hbm [shape: f32[1,1024], index: 4, kind: input, shape index: {}]   ;;  %s6573_s5 = inlined_call_operand.hbm [shape: bf16[1024,128], index: 5, kind: input, shape index: {}]   ;;  %s6574_s6 = inlined_call_operand.hbm [shape: f32[1,128], index: 6, kind: input, shape index: {}]   ;;  %s6575_s7 = inlined_call_operand.vmem [shape: f32[16,128], index: 7, kind: output, shape index: {}]  }
   0x1   :  { %13 = vsyncpa [#allocation6], 0 }
   0x2   :  { %14 = vsyncpa [#allocation9], 0 }
   0x3   :  { %15 = vsyncpa [#allocation12], 0  ;;  %s6288_s24 = smov [#allocation5]   ;;  %s6289_s26 = smov [#allocation8]  }
   0x4   :  { %s36_s25 = sshll.u32 %s6288_s24, 4  ;;  %s58_s27 = sshll.u32 %s6289_s26, 4  ;;  %s37_s25 = int_to_ptr.vmem [resolvable:$true] %s36_s25  ;;  %s59_s27 = int_to_ptr.vmem [resolvable:$true] %s58_s27 }
   0x5   :  { %s6148_s30 = scalar_lea.hbm %s6570_s2, 128 }
   0x6   :  { %p6149_p0 = scmp.ne.s32.totalorder %s6570_s2, %s6148_s30  ;;  %p6152_p1 = scmp.lt.u32.totalorder %s6148_s30, %s6570_s2 }
   0x8   :  { %p6154_p2 = pnand %p6152_p1, %p6149_p0 }
   0xa   :  { %6157 = shalt.err (!%p6154_p2)
}
   0xb   :  { %s6158_s12 = scalar_lea.vmem %s37_s25, 128  ;;  %p6163_p4 = scmp.lt.s32.totalorder %s37_s25, %s37_s25 }
   0xc   :  { %p6159_p3 = scmp.ne.s32.totalorder %s37_s25, %s6158_s12  ;;  %p6164_p5 = scmp.lt.s32.totalorder %s6158_s12, %s6158_s12 }
   0xe   :  { %p6165_p6 = por %p6164_p5, %p6163_p4 }
  0x10   :  { %p6166_p7 = pnand %p6165_p6, %p6159_p3 }
  0x12   :  { %6169 = shalt.err (!%p6166_p7)
}
  0x13   :  { %39 = dma.hbm_to_vmem [thread:$0]  %s6570_s2, 128, %s37_s25, [#allocation6]  }
  0x14   :  { %s6170_s17 = scalar_lea.hbm %s6572_s4, 128 }
  0x15   :  { %p6171_p8 = scmp.ne.s32.totalorder %s6572_s4, %s6170_s17  ;;  %p6174_p9 = scmp.lt.u32.totalorder %s6170_s17, %s6572_s4 }
  0x17   :  { %p6176_p10 = pnand %p6174_p9, %p6171_p8 }
  0x19   :  { %6179 = shalt.err (!%p6176_p10)
}
  0x1a   :  { %s6180_s22 = scalar_lea.vmem %s59_s27, 128  ;;  %p6185_p12 = scmp.lt.s32.totalorder %s59_s27, %s59_s27 }
  0x1b   :  { %p6181_p11 = scmp.ne.s32.totalorder %s59_s27, %s6180_s22  ;;  %p6186_p13 = scmp.lt.s32.totalorder %s6180_s22, %s6180_s22 }
  0x1d   :  { %p6187_p0 = por %p6186_p13, %p6185_p12 }
  0x1f   :  { %p6188_p1 = pnand %p6187_p0, %p6181_p11 }
  0x21   :  { %6191 = shalt.err (!%p6188_p1)
}
  0x22   :  { %61 = dma.hbm_to_vmem [thread:$0]  %s6572_s4, 128, %s59_s27, [#allocation9]  }
  0x23   :  { %s6290_s24 = smov [#allocation3]   ;;  %s6192_s29 = scalar_lea.hbm %s6569_s1, 8192 }
  0x24   :  { %s23_s25 = sshll.u32 %s6290_s24, 4  ;;  %p6193_p2 = scmp.ne.s32.totalorder %s6569_s1, %s6192_s29  ;;  %s24_s25 = int_to_ptr.vmem [resolvable:$true] %s23_s25 }
  0x25   :  { %p6196_p3 = scmp.lt.u32.totalorder %s6192_s29, %s6569_s1 }
  0x27   :  { %p6198_p4 = pnand %p6196_p3, %p6193_p2 }
  0x29   :  { %6201 = shalt.err (!%p6198_p4)
}
  0x2a   :  { %s6202_s11 = scalar_lea.vmem %s24_s25, 8192  ;;  %p6207_p6 = scmp.lt.s32.totalorder %s24_s25, %s24_s25 }
  0x2b   :  { %p6203_p5 = scmp.ne.s32.totalorder %s24_s25, %s6202_s11  ;;  %p6208_p7 = scmp.lt.s32.totalorder %s6202_s11, %s6202_s11 }
  0x2d   :  { %p6209_p8 = por %p6208_p7, %p6207_p6 }
  0x2f   :  { %p6210_p9 = pnand %p6209_p8, %p6203_p5 }
  0x31   :  { %6213 = shalt.err (!%p6210_p9)
}
  0x32   :  { %s6291_s4 = smov 512   ;;  %s6292_s27 = smov 32  }
  0x33   :  { %29 = dma.hbm_to_vmem [thread:$0]  %s6569_s1, 8192, %s24_s25, [#allocation4], %s6291_s4, %s6291_s4, %s6292_s27  }
  0x34   :  { %s6293_s14 = smov [#allocation7]   ;;  %s6294_s16 = smov [#allocation10]  }
  0x35   :  { %s45_s15 = sshll.u32 %s6293_s14, 4  ;;  %s67_s17 = sshll.u32 %s6294_s16, 4  ;;  %s46_s15 = int_to_ptr.vmem [resolvable:$true] %s45_s15  ;;  %s68_s17 = int_to_ptr.vmem [resolvable:$true] %s67_s17 }
  0x36   :  { %s6214_s20 = scalar_lea.hbm %s6571_s3, 65536 }
  0x37   :  { %p6215_p10 = scmp.ne.s32.totalorder %s6571_s3, %s6214_s20  ;;  %p6218_p11 = scmp.lt.u32.totalorder %s6214_s20, %s6571_s3 }
  0x39   :  { %p6220_p12 = pnand %p6218_p11, %p6215_p10 }
  0x3b   :  { %6223 = shalt.err (!%p6220_p12)
}
  0x3c   :  { %s6224_s1 = scalar_lea.vmem %s46_s15, 65536  ;;  %p6229_p0 = scmp.lt.s32.totalorder %s46_s15, %s46_s15 }
  0x3d   :  { %p6225_p13 = scmp.ne.s32.totalorder %s46_s15, %s6224_s1  ;;  %p6230_p1 = scmp.lt.s32.totalorder %s6224_s1, %s6224_s1 }
  0x3f   :  { %p6231_p2 = por %p6230_p1, %p6229_p0 }
  0x41   :  { %p6232_p3 = pnand %p6231_p2, %p6225_p13 }
  0x43   :  { %6235 = shalt.err (!%p6232_p3)
}
  0x44   :  { %51 = dma.hbm_to_vmem [thread:$0]  %s6571_s3, 65536, %s46_s15, [#allocation6], %s6291_s4, %s6291_s4, %s6292_s27  }
  0x45   :  { %s6236_s29 = scalar_lea.hbm %s6573_s5, 8192 }
  0x46   :  { %p6237_p4 = scmp.ne.s32.totalorder %s6573_s5, %s6236_s29  ;;  %p6240_p5 = scmp.lt.u32.totalorder %s6236_s29, %s6573_s5 }
  0x48   :  { %p6242_p6 = pnand %p6240_p5, %p6237_p4 }
  0x4a   :  { %6245 = shalt.err (!%p6242_p6)
}
  0x4b   :  { %s6246_s11 = scalar_lea.vmem %s68_s17, 8192  ;;  %p6251_p8 = scmp.lt.s32.totalorder %s68_s17, %s68_s17 }
  0x4c   :  { %p6247_p7 = scmp.ne.s32.totalorder %s68_s17, %s6246_s11  ;;  %p6252_p9 = scmp.lt.s32.totalorder %s6246_s11, %s6246_s11 }
  0x4e   :  { %p6253_p10 = por %p6252_p9, %p6251_p8 }
  0x50   :  { %p6254_p11 = pnand %p6253_p10, %p6247_p7 }
  0x52   :  { %6257 = shalt.err (!%p6254_p11)
}
  0x53   :  { %s6295_s3 = smov 64   ;;  %s6296_s4 = smov 4  }
  0x54   :  { %73 = dma.hbm_to_vmem [thread:$0]  %s6573_s5, 8192, %s68_s17, [#allocation9], %s6295_s3, %s6295_s3, %s6296_s4  }
  0x55   :  { %s6297_s13 = smov [#allocation11]   ;;  %s6258_s18 = scalar_lea.hbm %s6574_s6, 16 }
  0x56   :  { %s80_s14 = sshll.u32 %s6297_s13, 4  ;;  %p6259_p12 = scmp.ne.s32.totalorder %s6574_s6, %s6258_s18  ;;  %s81_s14 = int_to_ptr.vmem [resolvable:$true] %s80_s14 }
  0x57   :  { %p6262_p13 = scmp.lt.u32.totalorder %s6258_s18, %s6574_s6 }
  0x59   :  { %p6264_p0 = pnand %p6262_p13, %p6259_p12 }
  0x5b   :  { %6267 = shalt.err (!%p6264_p0)
}
  0x5c   :  { %s6268_s2 = scalar_lea.vmem %s81_s14, 16  ;;  %s6272_s5 = scalar_lea.vmem %s81_s14, 32 }
  0x5d   :  { %p6269_p1 = scmp.ne.s32.totalorder %s81_s14, %s6268_s2  ;;  %p6273_p2 = scmp.lt.s32.totalorder %s81_s14, %s81_s14 }
  0x5e   :  { %p6274_p3 = scmp.lt.s32.totalorder %s6272_s5, %s6268_s2 }
  0x60   :  { %p6275_p4 = por %p6274_p3, %p6273_p2 }
  0x62   :  { %p6276_p5 = pnand %p6275_p4, %p6269_p1 }
  0x64   :  { %6279 = shalt.err (!%p6276_p5)
}
  0x65   :  { %83 = dma.hbm_to_vmem [thread:$0]  %s6574_s6, 16, %s81_s14, [#allocation12]  }
  0x66   :  { %6280 = dma.done.wait [#allocation4], 8192  }
  0x67   :  { %6281 = vsyncadd [#allocation4], 4294959104 }
  0x68   :  { %6282 = dma.done.wait [#allocation6], 65664  }
  0x69   :  { %6283 = vsyncadd [#allocation6], 4294901632 }
  0x6a   :  { %6284 = dma.done.wait [#allocation9], 8320  }
  0x6b   :  { %6285 = vsyncadd [#allocation9], 4294958976 }
  0x6c   :  { %6286 = dma.done.wait [#allocation12], 16  }
  0x6d   :  { %6287 = vsyncadd [#allocation12], 4294967280  ;;  %v6298_v0 = vmov 0   ;;  %v109_v1 = vld [vmem:[#allocation3] sm:$0xff]  ;;  %v110_v14 = vld [vmem:[#allocation3 + $0x8] sm:$0xff] }
  0x6e   :  { %573 = vmatprep.mubr.bf16.mxu0 %v6298_v0  ;;  %616 = vmatprep.mubr.bf16.mxu1 %v6298_v0  ;;  %v113_v2 = vld [vmem:[#allocation3 + $0x20] sm:$0xff]  ;;  %v114_v15 = vld [vmem:[#allocation3 + $0x28] sm:$0xff]  ;;  %v111_v58 = vld [vmem:[#allocation3 + $0x10] sm:$0xff] }
  0x6f   :  { %v117_v3 = vld [vmem:[#allocation3 + $0x40] sm:$0xff]  ;;  %v5280_v4 = vcombine.high %v109_v1, %v113_v2  ;;  %v5279_v5 = vcombine.low %v109_v1, %v113_v2  ;;  %v5282_v16 = vcombine.high %v110_v14, %v114_v15  ;;  %v5281_v17 = vcombine.low %v110_v14, %v114_v15  ;;  %v118_v18 = vld [vmem:[#allocation3 + $0x48] sm:$0xff]  ;;  %v115_v59 = vld [vmem:[#allocation3 + $0x30] sm:$0xff] }
  0x70   :  { %v121_v6 = vld [vmem:[#allocation3 + $0x60] sm:$0xff]  ;;  %v122_v19 = vld [vmem:[#allocation3 + $0x68] sm:$0xff]  ;;  %v5284_v1 = vcombine.high %v111_v58, %v115_v59 }
  0x71   :  { %v5288_v7 = vcombine.high %v117_v3, %v121_v6  ;;  %v125_v8 = vld [vmem:[#allocation3 + $0x80] sm:$0xff]  ;;  %541 = vmatprep.subr.bf16.mxu0 %v5280_v4  ;;  %v5287_v10 = vcombine.low %v117_v3, %v121_v6  ;;  %v5290_v21 = vcombine.high %v118_v18, %v122_v19  ;;  %v126_v22 = vld [vmem:[#allocation3 + $0x88] sm:$0xff]  ;;  %584 = vmatprep.subr.bf16.mxu1 %v5282_v16  ;;  %v119_v3 = vld [vmem:[#allocation3 + $0x50] sm:$0xff] }
  0x72   :  { %v129_v9 = vld [vmem:[#allocation3 + $0xa0] sm:$0xff]  ;;  %542 = vmatpush1.bf16.msra.mxu0 %v5279_v5  ;;  %v130_v23 = vld [vmem:[#allocation3 + $0xa8] sm:$0xff]  ;;  %585 = vmatpush1.bf16.msra.mxu1 %v5281_v17  ;;  %v5289_v27 = vcombine.low %v118_v18, %v122_v19  ;;  %v123_v4 = vld [vmem:[#allocation3 + $0x70] sm:$0xff] }
  0x73   :  { %543 = vmatprep.subr.bf16.mxu0 %v5288_v7  ;;  %v5296_v11 = vcombine.high %v125_v8, %v129_v9  ;;  %v133_v12 = vld [vmem:[#allocation3 + $0xc0] sm:$0xff]  ;;  %v5295_v20 = vcombine.low %v125_v8, %v129_v9  ;;  %586 = vmatprep.subr.bf16.mxu1 %v5290_v21  ;;  %v5298_v28 = vcombine.high %v126_v22, %v130_v23  ;;  %v134_v30 = vld [vmem:[#allocation3 + $0xc8] sm:$0xff]  ;;  %v112_v8 = vld [vmem:[#allocation3 + $0x18] sm:$0xff] }
  0x74   :  { %v137_v13 = vld [vmem:[#allocation3 + $0xe0] sm:$0xff]  ;;  %v138_v31 = vld [vmem:[#allocation3 + $0xe8] sm:$0xff]  ;;  %v5297_v35 = vcombine.low %v126_v22, %v130_v23  ;;  %v5283_v7 = vcombine.low %v111_v58, %v115_v59  ;;  %v116_v9 = vld [vmem:[#allocation3 + $0x38] sm:$0xff]  ;;  %v5291_v15 = vcombine.low %v119_v3, %v123_v4 }
  0x75   :  { %v5304_v24 = vcombine.high %v133_v12, %v137_v13  ;;  %v141_v25 = vld [vmem:[#allocation3 + $0x100] sm:$0xff]  ;;  %v5303_v29 = vcombine.low %v133_v12, %v137_v13  ;;  %v5306_v36 = vcombine.high %v134_v30, %v138_v31  ;;  %v142_v38 = vld [vmem:[#allocation3 + $0x108] sm:$0xff]  ;;  %v5305_v43 = vcombine.low %v134_v30, %v138_v31  ;;  %v127_v12 = vld [vmem:[#allocation3 + $0x90] sm:$0xff] }
  0x76   :  { %544 = vmatpush1.bf16.msra.mxu0 %v5287_v10  ;;  %v145_v26 = vld [vmem:[#allocation3 + $0x120] sm:$0xff]  ;;  %587 = vmatpush1.bf16.msra.mxu1 %v5289_v27  ;;  %v146_v39 = vld [vmem:[#allocation3 + $0x128] sm:$0xff]  ;;  %v5292_v10 = vcombine.high %v119_v3, %v123_v4  ;;  %v131_v13 = vld [vmem:[#allocation3 + $0xb0] sm:$0xff]  ;;  %v5286_v14 = vcombine.high %v112_v8, %v116_v9  ;;  %v5285_v21 = vcombine.low %v112_v8, %v116_v9 }
  0x77   :  { %545 = vmatprep.subr.bf16.mxu0 %v5296_v11  ;;  %v5312_v32 = vcombine.high %v141_v25, %v145_v26  ;;  %v149_v33 = vld [vmem:[#allocation3 + $0x140] sm:$0xff]  ;;  %588 = vmatprep.subr.bf16.mxu1 %v5298_v28  ;;  %v5311_v37 = vcombine.low %v141_v25, %v145_v26  ;;  %v5314_v44 = vcombine.high %v142_v38, %v146_v39  ;;  %v150_v46 = vld [vmem:[#allocation3 + $0x148] sm:$0xff]  ;;  %v120_v16 = vld [vmem:[#allocation3 + $0x58] sm:$0xff] }
  0x78   :  { %v153_v34 = vld [vmem:[#allocation3 + $0x160] sm:$0xff]  ;;  %v154_v47 = vld [vmem:[#allocation3 + $0x168] sm:$0xff]  ;;  %v5313_v51 = vcombine.low %v142_v38, %v146_v39  ;;  %v124_v17 = vld [vmem:[#allocation3 + $0x78] sm:$0xff]  ;;  %v5300_v18 = vcombine.high %v127_v12, %v131_v13  ;;  %v5299_v23 = vcombine.low %v127_v12, %v131_v13 }
  0x79   :  { %v5320_v40 = vcombine.high %v149_v33, %v153_v34  ;;  %v157_v41 = vld [vmem:[#allocation3 + $0x180] sm:$0xff]  ;;  %v5319_v45 = vcombine.low %v149_v33, %v153_v34  ;;  %v5322_v52 = vcombine.high %v150_v46, %v154_v47  ;;  %v158_v54 = vld [vmem:[#allocation3 + $0x188] sm:$0xff]  ;;  %v5321_v57 = vcombine.low %v150_v46, %v154_v47  ;;  %v135_v19 = vld [vmem:[#allocation3 + $0xd0] sm:$0xff] }
  0x7a   :  { %546 = vmatpush1.bf16.msra.mxu0 %v5295_v20  ;;  %v161_v42 = vld [vmem:[#allocation3 + $0x1a0] sm:$0xff]  ;;  %589 = vmatpush1.bf16.msra.mxu1 %v5297_v35  ;;  %v162_v55 = vld [vmem:[#allocation3 + $0x1a8] sm:$0xff]  ;;  %v139_v20 = vld [vmem:[#allocation3 + $0xf0] sm:$0xff]  ;;  %v5294_v22 = vcombine.high %v120_v16, %v124_v17 }
  0x7b   :  { %547 = vmatprep.subr.bf16.mxu0 %v5304_v24  ;;  %590 = vmatprep.subr.bf16.mxu1 %v5306_v36  ;;  %v5328_v48 = vcombine.high %v157_v41, %v161_v42  ;;  %v165_v49 = vld [vmem:[#allocation3 + $0x1c0] sm:$0xff]  ;;  %v5327_v53 = vcombine.low %v157_v41, %v161_v42  ;;  %v5330_v60 = vcombine.high %v158_v54, %v162_v55  ;;  %v166_v62 = vld [vmem:[#allocation3 + $0x1c8] sm:$0xff]  ;;  %v143_v24 = vld [vmem:[#allocation3 + $0x110] sm:$0xff] }
  0x7c   :  { %v169_v50 = vld [vmem:[#allocation3 + $0x1e0] sm:$0xff]  ;;  %v170_v63 = vld [vmem:[#allocation3 + $0x1e8] sm:$0xff]  ;;  %v5329_v2 = vcombine.low %v158_v54, %v162_v55  ;;  %v128_v25 = vld [vmem:[#allocation3 + $0x98] sm:$0xff]  ;;  %v5308_v27 = vcombine.high %v135_v19, %v139_v20  ;;  %v5307_v33 = vcombine.low %v135_v19, %v139_v20 }
  0x7d   :  { %v5336_v56 = vcombine.high %v165_v49, %v169_v50  ;;  %v5335_v61 = vcombine.low %v165_v49, %v169_v50  ;;  %v6416_v5 = vld [vmem:[%s6568_s0] sm:$0xff]   ;;  %v5338_v6 = vcombine.high %v166_v62, %v170_v63  ;;  %v5337_v11 = vcombine.low %v166_v62, %v170_v63  ;;  %v132_v26 = vld [vmem:[#allocation3 + $0xb8] sm:$0xff]  ;;  %v147_v28 = vld [vmem:[#allocation3 + $0x130] sm:$0xff] }
  0x7e   :  { %548 = vmatpush1.bf16.msra.mxu0 %v5303_v29  ;;  %591 = vmatpush1.bf16.msra.mxu1 %v5305_v43  ;;  %v5293_v29 = vcombine.low %v120_v16, %v124_v17  ;;  %v136_v30 = vld [vmem:[#allocation3 + $0xd8] sm:$0xff]  ;;  %v151_v34 = vld [vmem:[#allocation3 + $0x150] sm:$0xff]  ;;  %v5316_v36 = vcombine.high %v143_v24, %v147_v28  ;;  %v5315_v41 = vcombine.low %v143_v24, %v147_v28  ;;  %v766_v58 = vld [vmem:[#allocation7 + $0x20] sm:$0xff] }
  0x7f   :  { %549 = vmatprep.subr.bf16.mxu0 %v5312_v32  ;;  %592 = vmatprep.subr.bf16.mxu1 %v5314_v44  ;;  %v140_v31 = vld [vmem:[#allocation3 + $0xf8] sm:$0xff]  ;;  %v5302_v32 = vcombine.high %v128_v25, %v132_v26  ;;  %v155_v35 = vld [vmem:[#allocation3 + $0x170] sm:$0xff]  ;;  %v774_v3 = vld [vmem:[#allocation7 + $0x60] sm:$0xff] }
  0x80   :  { %v144_v38 = vld [vmem:[#allocation3 + $0x118] sm:$0xff]  ;;  %v159_v42 = vld [vmem:[#allocation3 + $0x190] sm:$0xff]  ;;  %v5309_v44 = vcombine.low %v136_v30, %v140_v31  ;;  %v782_v12 = vld [vmem:[#allocation7 + $0xa0] sm:$0xff] }
  0x81   :  { %v148_v39 = vld [vmem:[#allocation3 + $0x138] sm:$0xff]  ;;  %v163_v43 = vld [vmem:[#allocation3 + $0x1b0] sm:$0xff]  ;;  %v786_v19 = vld [vmem:[#allocation7 + $0xc0] sm:$0xff] }
  0x82   :  { %550 = vmatpush1.bf16.msra.mxu0 %v5311_v37  ;;  %593 = vmatpush1.bf16.msra.mxu1 %v5313_v51  ;;  %v5301_v37 = vcombine.low %v128_v25, %v132_v26  ;;  %v156_v46 = vld [vmem:[#allocation3 + $0x178] sm:$0xff]  ;;  %v5318_v47 = vcombine.high %v144_v38, %v148_v39  ;;  %v167_v49 = vld [vmem:[#allocation3 + $0x1d0] sm:$0xff]  ;;  %v5332_v51 = vcombine.high %v159_v42, %v163_v43  ;;  %v790_v20 = vld [vmem:[#allocation7 + $0xe0] sm:$0xff] }
  0x83   :  { %551 = vmatprep.subr.bf16.mxu0 %v5320_v40  ;;  %594 = vmatprep.subr.bf16.mxu1 %v5322_v52  ;;  %v5310_v40 = vcombine.high %v136_v30, %v140_v31  ;;  %v171_v50 = vld [vmem:[#allocation3 + $0x1f0] sm:$0xff]  ;;  %v5317_v52 = vcombine.low %v144_v38, %v148_v39  ;;  %v164_v54 = vld [vmem:[#allocation3 + $0x1b8] sm:$0xff]  ;;  %v798_v28 = vld [vmem:[#allocation7 + $0x120] sm:$0xff] }
  0x84   :  { %v5340_v59 = vcombine.high %v167_v49, %v171_v50  ;;  %v172_v62 = vld [vmem:[#allocation3 + $0x1f8] sm:$0xff]  ;;  %v767_v8 = vld [vmem:[#allocation7 + $0x28] sm:$0xff] }
  0x85   :  { %v775_v16 = vld [vmem:[#allocation7 + $0x68] sm:$0xff] }
  0x86   :  { %552 = vmatpush1.bf16.msra.mxu0 %v5319_v45  ;;  %595 = vmatpush1.bf16.msra.mxu1 %v5321_v57  ;;  %v152_v45 = vld [vmem:[#allocation3 + $0x158] sm:$0xff]  ;;  %v762_v57 = vld [vmem:[#allocation7] sm:$0xff]  ;;  %v783_v24 = vld [vmem:[#allocation7 + $0xa8] sm:$0xff] }
  0x87   :  { %553 = vmatprep.subr.bf16.mxu0 %v5328_v48  ;;  %596 = vmatprep.subr.bf16.mxu1 %v5330_v60  ;;  %v5323_v48 = vcombine.low %v151_v34, %v155_v35  ;;  %v5326_v55 = vcombine.high %v152_v45, %v156_v46  ;;  %v5325_v60 = vcombine.low %v152_v45, %v156_v46  ;;  %v787_v31 = vld [vmem:[#allocation7 + $0xc8] sm:$0xff] }
  0x88   :  { %v5345_v4 = vcombine.high %v762_v57, %v766_v58  ;;  %v795_v39 = vld [vmem:[#allocation7 + $0x108] sm:$0xff] }
  0x8a   :  { %554 = vmatpush1.bf16.msra.mxu0 %v5327_v53  ;;  %597 = vmatpush1.bf16.msra.mxu1 %v5329_v2  ;;  %v160_v53 = vld [vmem:[#allocation3 + $0x198] sm:$0xff]  ;;  %v770_v2 = vld [vmem:[#allocation7 + $0x40] sm:$0xff] }
  0x8b   :  { %555 = vmatprep.subr.bf16.mxu0 %v5336_v56  ;;  %598 = vmatprep.subr.bf16.mxu1 %v5338_v6  ;;  %v5331_v56 = vcombine.low %v159_v42, %v163_v43  ;;  %v5334_v63 = vcombine.high %v160_v53, %v164_v54  ;;  %v5333_v6 = vcombine.low %v160_v53, %v164_v54  ;;  %v810_v42 = vld [vmem:[#allocation7 + $0x180] sm:$0xff] }
  0x8c   :  { %v5353_v13 = vcombine.high %v770_v2, %v774_v3  ;;  %v814_v43 = vld [vmem:[#allocation7 + $0x1a0] sm:$0xff] }
  0x8d   :  { %v5392_v54 = vcombine.low %v810_v42, %v814_v43 }
  0x8e   :  { %556 = vmatpush1.bf16.msra.mxu0 %v5335_v61  ;;  %599 = vmatpush1.bf16.msra.mxu1 %v5337_v11  ;;  %v168_v61 = vld [vmem:[#allocation3 + $0x1d8] sm:$0xff]  ;;  %v778_v11 = vld [vmem:[#allocation7 + $0x80] sm:$0xff] }
  0x8f   :  { %627 = vmatprep.subr.bf16.mxu0 %v5284_v1  ;;  %670 = vmatprep.subr.bf16.mxu1 %v5286_v14  ;;  %v5339_v1 = vcombine.low %v167_v49, %v171_v50  ;;  %v5342_v9 = vcombine.high %v168_v61, %v172_v62  ;;  %v5341_v14 = vcombine.low %v168_v61, %v172_v62 }
  0x90   :  { %v5360_v26 = vcombine.low %v778_v11, %v782_v12  ;;  %v5393_v49 = vcombine.high %v810_v42, %v814_v43 }
  0x91   :  { %574 = vmatmul.mubr.bf16.vlgmr.msra.gmra.mrb[0].mxu0 %v6416_v5  ;;  %617 = vmatmul.mubr.bf16.vlgmr.msra.gmra.mrb[0].mxu1 %v6416_v5 }
  0x92   :  { %628 = vmatpush1.bf16.msra.mxu0 %v5283_v7  ;;  %659 = vmatprep.mubr.bf16.mxu0 %v6298_v0  ;;  %v763_v7 = vld [vmem:[#allocation7 + $0x8] sm:$0xff] }
  0x93   :  { %629 = vmatprep.subr.bf16.mxu0 %v5292_v10  ;;  %671 = vmatpush1.bf16.msra.mxu1 %v5285_v21  ;;  %v5344_v10 = vcombine.low %v762_v57, %v766_v58  ;;  %v5347_v17 = vcombine.high %v763_v7, %v767_v8  ;;  %v5361_v21 = vcombine.high %v778_v11, %v782_v12 }
  0x94   :  { %702 = vmatprep.mubr.bf16.mxu1 %v6298_v0  ;;  %672 = vmatprep.subr.bf16.mxu1 %v5294_v22  ;;  %v5324_v0 = vcombine.high %v151_v34, %v155_v35  ;;  %v5346_v22 = vcombine.low %v763_v7, %v767_v8  ;;  %v5368_v34 = vcombine.low %v786_v19, %v790_v20  ;;  %v802_v35 = vld [vmem:[#allocation7 + $0x140] sm:$0xff] }
  0x96   :  { %630 = vmatpush1.bf16.msra.mxu0 %v5291_v15  ;;  %v771_v15 = vld [vmem:[#allocation7 + $0x48] sm:$0xff] }
  0x97   :  { %631 = vmatprep.subr.bf16.mxu0 %v5300_v18  ;;  %673 = vmatpush1.bf16.msra.mxu1 %v5293_v29  ;;  %v5352_v18 = vcombine.low %v770_v2, %v774_v3  ;;  %v5355_v25 = vcombine.high %v771_v15, %v775_v16  ;;  %v5369_v29 = vcombine.high %v786_v19, %v790_v20 }
  0x98   :  { %674 = vmatprep.subr.bf16.mxu1 %v5302_v32  ;;  %v5354_v30 = vcombine.low %v771_v15, %v775_v16  ;;  %v791_v32 = vld [vmem:[#allocation7 + $0xe8] sm:$0xff] }
  0x9a   :  { %632 = vmatpush1.bf16.msra.mxu0 %v5299_v23  ;;  %v779_v23 = vld [vmem:[#allocation7 + $0x88] sm:$0xff] }
  0x9b   :  { %633 = vmatprep.subr.bf16.mxu0 %v5308_v27  ;;  %675 = vmatpush1.bf16.msra.mxu1 %v5301_v37  ;;  %v794_v27 = vld [vmem:[#allocation7 + $0x100] sm:$0xff]  ;;  %v5362_v38 = vcombine.low %v779_v23, %v783_v24 }
  0x9c   :  { %676 = vmatprep.subr.bf16.mxu1 %v5310_v40  ;;  %v5377_v37 = vcombine.high %v794_v27, %v798_v28  ;;  %v799_v40 = vld [vmem:[#allocation7 + $0x128] sm:$0xff] }
  0x9d   :  { %v5379_v45 = vcombine.high %v795_v39, %v799_v40  ;;  %v5378_v50 = vcombine.low %v795_v39, %v799_v40 }
  0x9e   :  { %634 = vmatpush1.bf16.msra.mxu0 %v5307_v33  ;;  %v5363_v33 = vcombine.high %v779_v23, %v783_v24 }
  0x9f   :  { %635 = vmatprep.subr.bf16.mxu0 %v5316_v36  ;;  %677 = vmatpush1.bf16.msra.mxu1 %v5309_v44  ;;  %v806_v36 = vld [vmem:[#allocation7 + $0x160] sm:$0xff]  ;;  %v5370_v44 = vcombine.low %v787_v31, %v791_v32 }
  0xa0   :  { %678 = vmatprep.subr.bf16.mxu1 %v5318_v47  ;;  %v5384_v46 = vcombine.low %v802_v35, %v806_v36  ;;  %v803_v47 = vld [vmem:[#allocation7 + $0x148] sm:$0xff] }
  0xa2   :  { %636 = vmatpush1.bf16.msra.mxu0 %v5315_v41  ;;  %v5376_v41 = vcombine.low %v794_v27, %v798_v28 }
  0xa3   :  { %637 = vmatprep.subr.bf16.mxu0 %v5324_v0  ;;  %679 = vmatpush1.bf16.msra.mxu1 %v5317_v52  ;;  %v5385_v0 = vcombine.high %v802_v35, %v806_v36  ;;  %v822_v52 = vld [vmem:[#allocation7 + $0x1e0] sm:$0xff] }
  0xa4   :  { %680 = vmatprep.subr.bf16.mxu1 %v5326_v55  ;;  %v811_v55 = vld [vmem:[#allocation7 + $0x188] sm:$0xff] }
  0xa6   :  { %638 = vmatpush1.bf16.msra.mxu0 %v5323_v48  ;;  %v807_v48 = vld [vmem:[#allocation7 + $0x168] sm:$0xff] }
  0xa7   :  { %639 = vmatprep.subr.bf16.mxu0 %v5332_v51  ;;  %681 = vmatpush1.bf16.msra.mxu1 %v5325_v60  ;;  %v818_v51 = vld [vmem:[#allocation7 + $0x1c0] sm:$0xff]  ;;  %v5387_v53 = vcombine.high %v803_v47, %v807_v48  ;;  %v5386_v58 = vcombine.low %v803_v47, %v807_v48 }
  0xa8   :  { %682 = vmatprep.subr.bf16.mxu1 %v5334_v63  ;;  %v5401_v57 = vcombine.high %v818_v51, %v822_v52  ;;  %v830_v60 = vld [vmem:[#allocation7 + $0x220] sm:$0xff]  ;;  %v5400_v62 = vcombine.low %v818_v51, %v822_v52  ;;  %v819_v63 = vld [vmem:[#allocation7 + $0x1c8] sm:$0xff] }
  0xa9   :  { %v874_v47 = vld [vmem:[#allocation7 + $0x380] sm:$0xff] }
  0xaa   :  { %640 = vmatpush1.bf16.msra.mxu0 %v5331_v56  ;;  %v815_v56 = vld [vmem:[#allocation7 + $0x1a8] sm:$0xff]  ;;  %v878_v48 = vld [vmem:[#allocation7 + $0x3a0] sm:$0xff] }
  0xab   :  { %641 = vmatprep.subr.bf16.mxu0 %v5340_v59  ;;  %683 = vmatpush1.bf16.msra.mxu1 %v5333_v6  ;;  %v826_v59 = vld [vmem:[#allocation7 + $0x200] sm:$0xff]  ;;  %v5395_v61 = vcombine.high %v811_v55, %v815_v56  ;;  %v5394_v3 = vcombine.low %v811_v55, %v815_v56  ;;  %v5456_v52 = vcombine.low %v874_v47, %v878_v48 }
  0xac   :  { %684 = vmatprep.subr.bf16.mxu1 %v5342_v9  ;;  %v5409_v2 = vcombine.high %v826_v59, %v830_v60  ;;  %v838_v6 = vld [vmem:[#allocation7 + $0x260] sm:$0xff]  ;;  %v5408_v8 = vcombine.low %v826_v59, %v830_v60  ;;  %v827_v9 = vld [vmem:[#allocation7 + $0x208] sm:$0xff] }
  0xad   :  { %v882_v55 = vld [vmem:[#allocation7 + $0x3c0] sm:$0xff] }
  0xae   :  { %642 = vmatpush1.bf16.msra.mxu0 %v5339_v1  ;;  %v823_v1 = vld [vmem:[#allocation7 + $0x1e8] sm:$0xff]  ;;  %v886_v56 = vld [vmem:[#allocation7 + $0x3e0] sm:$0xff] }
  0xaf   :  { %3876 = vmatprep.subr.bf16.mxu0 %v5345_v4  ;;  %685 = vmatpush1.bf16.msra.mxu1 %v5341_v14  ;;  %v834_v4 = vld [vmem:[#allocation7 + $0x240] sm:$0xff]  ;;  %v5403_v7 = vcombine.high %v819_v63, %v823_v1  ;;  %v5402_v12 = vcombine.low %v819_v63, %v823_v1  ;;  %v5464_v60 = vcombine.low %v882_v55, %v886_v56 }
  0xb0   :  { %4048 = vmatprep.subr.bf16.mxu1 %v5347_v17  ;;  %v5417_v11 = vcombine.high %v834_v4, %v838_v6  ;;  %v846_v14 = vld [vmem:[#allocation7 + $0x2a0] sm:$0xff]  ;;  %v5416_v16 = vcombine.low %v834_v4, %v838_v6  ;;  %v835_v17 = vld [vmem:[#allocation7 + $0x248] sm:$0xff] }
  0xb1   :  { %660 = vmatmul.mubr.bf16.vlgmr.msra.gmra.mrb[4].mxu0 %v6416_v5  ;;  %v6424_v63 = vld [vmem:[#allocation7 + $0x400] sm:$0xff]  ;;  %v6432_v6 = vld [vmem:[#allocation7 + $0x428] sm:$0xff] }
  0xb2   :  { %3877 = vmatpush1.bf16.msra.mxu0 %v5344_v10  ;;  %703 = vmatmul.mubr.bf16.vlgmr.msra.gmra.mrb[4].mxu1 %v6416_v5  ;;  %v5371_v5 = vcombine.high %v787_v31, %v791_v32  ;;  %v831_v10 = vld [vmem:[#allocation7 + $0x228] sm:$0xff]  ;;  %v6426_v1 = vld [vmem:[#allocation7 + $0x420] sm:$0xff] }
  0xb3   :  { %3878 = vmatprep.subr.bf16.mxu0 %v5353_v13  ;;  %4049 = vmatpush1.bf16.msra.mxu1 %v5346_v22  ;;  %v842_v13 = vld [vmem:[#allocation7 + $0x280] sm:$0xff]  ;;  %v5411_v15 = vcombine.high %v827_v9, %v831_v10  ;;  %v5410_v20 = vcombine.low %v827_v9, %v831_v10  ;;  %v5473_v4 = vcombine.high %v6424_v63, %v6426_v1 }
  0xb4   :  { %4050 = vmatprep.subr.bf16.mxu1 %v5355_v25  ;;  %v5425_v19 = vcombine.high %v842_v13, %v846_v14  ;;  %v854_v22 = vld [vmem:[#allocation7 + $0x2e0] sm:$0xff]  ;;  %v5424_v24 = vcombine.low %v842_v13, %v846_v14  ;;  %v843_v25 = vld [vmem:[#allocation7 + $0x288] sm:$0xff] }
  0xb6   :  { %3879 = vmatpush1.bf16.msra.mxu0 %v5352_v18  ;;  %v839_v18 = vld [vmem:[#allocation7 + $0x268] sm:$0xff] }
  0xb7   :  { %3880 = vmatprep.subr.bf16.mxu0 %v5361_v21  ;;  %4051 = vmatpush1.bf16.msra.mxu1 %v5354_v30  ;;  %v850_v21 = vld [vmem:[#allocation7 + $0x2c0] sm:$0xff]  ;;  %v5419_v23 = vcombine.high %v835_v17, %v839_v18  ;;  %v5418_v28 = vcombine.low %v835_v17, %v839_v18 }
  0xb8   :  { %4052 = vmatprep.subr.bf16.mxu1 %v5363_v33  ;;  %v5433_v27 = vcombine.high %v850_v21, %v854_v22  ;;  %v862_v30 = vld [vmem:[#allocation7 + $0x320] sm:$0xff]  ;;  %v5432_v32 = vcombine.low %v850_v21, %v854_v22  ;;  %v851_v33 = vld [vmem:[#allocation7 + $0x2c8] sm:$0xff] }
  0xba   :  { %3881 = vmatpush1.bf16.msra.mxu0 %v5360_v26  ;;  %v847_v26 = vld [vmem:[#allocation7 + $0x2a8] sm:$0xff] }
  0xbb   :  { %3882 = vmatprep.subr.bf16.mxu0 %v5369_v29  ;;  %4053 = vmatpush1.bf16.msra.mxu1 %v5362_v38  ;;  %v858_v29 = vld [vmem:[#allocation7 + $0x300] sm:$0xff]  ;;  %v5427_v31 = vcombine.high %v843_v25, %v847_v26  ;;  %v5426_v36 = vcombine.low %v843_v25, %v847_v26 }
  0xbc   :  { %4054 = vmatprep.subr.bf16.mxu1 %v5371_v5  ;;  %v5441_v35 = vcombine.high %v858_v29, %v862_v30  ;;  %v870_v38 = vld [vmem:[#allocation7 + $0x360] sm:$0xff]  ;;  %v5440_v40 = vcombine.low %v858_v29, %v862_v30  ;;  %v859_v5 = vld [vmem:[#allocation7 + $0x308] sm:$0xff] }
  0xbe   :  { %3883 = vmatpush1.bf16.msra.mxu0 %v5368_v34  ;;  %v855_v34 = vld [vmem:[#allocation7 + $0x2e8] sm:$0xff] }
  0xbf   :  { %3884 = vmatprep.subr.bf16.mxu0 %v5377_v37  ;;  %4055 = vmatpush1.bf16.msra.mxu1 %v5370_v44  ;;  %v866_v37 = vld [vmem:[#allocation7 + $0x340] sm:$0xff]  ;;  %v5435_v39 = vcombine.high %v851_v33, %v855_v34  ;;  %v5434_v43 = vcombine.low %v851_v33, %v855_v34 }
  0xc0   :  { %4056 = vmatprep.subr.bf16.mxu1 %v5379_v45  ;;  %v5449_v42 = vcombine.high %v866_v37, %v870_v38  ;;  %v5448_v44 = vcombine.low %v866_v37, %v870_v38  ;;  %v867_v45 = vld [vmem:[#allocation7 + $0x348] sm:$0xff]  ;;  %v898_v33 = vld [vmem:[#allocation7 + $0x440] sm:$0xff] }
  0xc1   :  { %v899_v37 = vld [vmem:[#allocation7 + $0x448] sm:$0xff] }
  0xc2   :  { %3885 = vmatpush1.bf16.msra.mxu0 %v5376_v41  ;;  %v863_v41 = vld [vmem:[#allocation7 + $0x328] sm:$0xff] }
  0xc3   :  { %3886 = vmatprep.subr.bf16.mxu0 %v5385_v0  ;;  %4057 = vmatpush1.bf16.msra.mxu1 %v5378_v50  ;;  %v5443_v0 = vcombine.high %v859_v5, %v863_v41  ;;  %v5457_v50 = vcombine.high %v874_v47, %v878_v48  ;;  %v903_v38 = vld [vmem:[#allocation7 + $0x468] sm:$0xff] }
  0xc4   :  { %4058 = vmatprep.subr.bf16.mxu1 %v5387_v53  ;;  %v875_v53 = vld [vmem:[#allocation7 + $0x388] sm:$0xff] }
  0xc6   :  { %3887 = vmatpush1.bf16.msra.mxu0 %v5384_v46  ;;  %v871_v46 = vld [vmem:[#allocation7 + $0x368] sm:$0xff] }
  0xc7   :  { %3888 = vmatprep.subr.bf16.mxu0 %v5393_v49  ;;  %4059 = vmatpush1.bf16.msra.mxu1 %v5386_v58  ;;  %v5442_v49 = vcombine.low %v859_v5, %v863_v41  ;;  %v5451_v51 = vcombine.high %v867_v45, %v871_v46  ;;  %v5465_v58 = vcombine.high %v882_v55, %v886_v56 }
  0xc8   :  { %4060 = vmatprep.subr.bf16.mxu1 %v5395_v61  ;;  %v883_v61 = vld [vmem:[#allocation7 + $0x3c8] sm:$0xff] }
  0xca   :  { %3889 = vmatpush1.bf16.msra.mxu0 %v5392_v54  ;;  %v879_v54 = vld [vmem:[#allocation7 + $0x3a8] sm:$0xff] }
  0xcb   :  { %3890 = vmatprep.subr.bf16.mxu0 %v5401_v57  ;;  %4061 = vmatpush1.bf16.msra.mxu1 %v5394_v3  ;;  %v5450_v57 = vcombine.low %v867_v45, %v871_v46  ;;  %v5459_v59 = vcombine.high %v875_v53, %v879_v54  ;;  %v5458_v3 = vcombine.low %v875_v53, %v879_v54  ;;  %v906_v46 = vld [vmem:[#allocation7 + $0x480] sm:$0xff] }
  0xcc   :  { %4062 = vmatprep.subr.bf16.mxu1 %v5403_v7  ;;  %v5483_v45 = vcombine.high %v899_v37, %v903_v38 }
  0xce   :  { %3891 = vmatpush1.bf16.msra.mxu0 %v5400_v62  ;;  %v887_v62 = vld [vmem:[#allocation7 + $0x3e8] sm:$0xff] }
  0xcf   :  { %3892 = vmatprep.subr.bf16.mxu0 %v5409_v2  ;;  %4063 = vmatpush1.bf16.msra.mxu1 %v5402_v12  ;;  %v6428_v2 = vld [vmem:[#allocation7 + $0x408] sm:$0xff]  ;;  %v5467_v7 = vcombine.high %v883_v61, %v887_v62  ;;  %v5466_v10 = vcombine.low %v883_v61, %v887_v62  ;;  %v175_v12 = vlaneseq  ;;  %v914_v61 = vld [vmem:[#allocation7 + $0x4c0] sm:$0xff] }
  0xd0   :  { %4064 = vmatprep.subr.bf16.mxu1 %v5411_v15  ;;  %v5474_v9 = vcombine.low %v6428_v2, %v6432_v6  ;;  %v6443_v15 = vld [vmem:[#allocation5] sm:$0xff] }
  0xd1   :  { %v6440_v13 = vshrl.u32 %v175_v12, 7  ;;  %v927_v12 = vld [vmem:[#allocation7 + $0x528] sm:$0xff] }
  0xd2   :  { %3893 = vmatpush1.bf16.msra.mxu0 %v5408_v8  ;;  %v5472_v8 = vcombine.low %v6424_v63, %v6426_v1  ;;  %v918_v63 = vld [vmem:[#allocation7 + $0x4e0] sm:$0xff]  ;;  %v915_v1 = vld [vmem:[#allocation7 + $0x4c8] sm:$0xff] }
  0xd3   :  { %3894 = vmatprep.subr.bf16.mxu0 %v5417_v11  ;;  %4065 = vmatpush1.bf16.msra.mxu1 %v5410_v20  ;;  %v5475_v11 = vcombine.high %v6428_v2, %v6432_v6  ;;  %v177_v14 = vsub.s32 0, %v6440_v13  ;;  %v189_v21 = vsub.s32 3, %v6440_v13  ;;  %v919_v2 = vld [vmem:[#allocation7 + $0x4e8] sm:$0xff] }
  0xd4   :  { %4066 = vmatprep.subr.bf16.mxu1 %v5419_v23 }
  0xd5   :  { %v178_v17 = vrot.slane %v6443_v15, %v177_v14  ;;  %v190_v30 = vrot.slane %v6443_v15, %v189_v21 }
  0xd6   :  { %3895 = vmatpush1.bf16.msra.mxu0 %v5416_v16  ;;  %v181_v16 = vsub.s32 1, %v6440_v13 }
  0xd7   :  { %3896 = vmatprep.subr.bf16.mxu0 %v5425_v19  ;;  %4067 = vmatpush1.bf16.msra.mxu1 %v5418_v28  ;;  %v185_v19 = vsub.s32 2, %v6440_v13 }
  0xd8   :  { %4068 = vmatprep.subr.bf16.mxu1 %v5427_v31  ;;  %v182_v18 = vrot.slane %v6443_v15, %v181_v16 }
  0xd9   :  { %v186_v28 = vrot.slane %v6443_v15, %v185_v19 }
  0xda   :  { %3897 = vmatpush1.bf16.msra.mxu0 %v5424_v24 }
  0xdb   :  { %3898 = vmatprep.subr.bf16.mxu0 %v5433_v27  ;;  %4069 = vmatpush1.bf16.msra.mxu1 %v5426_v36  ;;  %v902_v36 = vld [vmem:[#allocation7 + $0x460] sm:$0xff] }
  0xdc   :  { %4070 = vmatprep.subr.bf16.mxu1 %v5435_v39  ;;  %v5480_v56 = vcombine.low %v898_v33, %v902_v36 }
  0xde   :  { %3899 = vmatpush1.bf16.msra.mxu0 %v5432_v32 }
  0xdf   :  { %3900 = vmatprep.subr.bf16.mxu0 %v5441_v35  ;;  %4071 = vmatpush1.bf16.msra.mxu1 %v5434_v43 }
  0xe0   :  { %4072 = vmatprep.subr.bf16.mxu1 %v5443_v0 }
  0xe2   :  { %3901 = vmatpush1.bf16.msra.mxu0 %v5440_v40 }
  0xe3   :  { %3902 = vmatprep.subr.bf16.mxu0 %v5449_v42  ;;  %4073 = vmatpush1.bf16.msra.mxu1 %v5442_v49 }
  0xe4   :  { %4074 = vmatprep.subr.bf16.mxu1 %v5451_v51  ;;  %v907_v51 = vld [vmem:[#allocation7 + $0x488] sm:$0xff] }
  0xe6   :  { %3903 = vmatpush1.bf16.msra.mxu0 %v5448_v44  ;;  %v5481_v44 = vcombine.high %v898_v33, %v902_v36  ;;  %v942_v33 = vld [vmem:[#allocation7 + $0x5a0] sm:$0xff]  ;;  %v197_v36 = vsub.s32 5, %v6440_v13 }
  0xe7   :  { %3904 = vmatprep.subr.bf16.mxu0 %v5457_v50  ;;  %4075 = vmatpush1.bf16.msra.mxu1 %v5450_v57  ;;  %v910_v50 = vld [vmem:[#allocation7 + $0x4a0] sm:$0xff]  ;;  %v5482_v57 = vcombine.low %v899_v37, %v903_v38 }
  0xe8   :  { %4076 = vmatprep.subr.bf16.mxu1 %v5459_v59  ;;  %v5489_v59 = vcombine.high %v906_v46, %v910_v50 }
  0xea   :  { %3905 = vmatpush1.bf16.msra.mxu0 %v5456_v52  ;;  %v911_v52 = vld [vmem:[#allocation7 + $0x4a8] sm:$0xff] }
  0xeb   :  { %3906 = vmatprep.subr.bf16.mxu0 %v5465_v58  ;;  %4077 = vmatpush1.bf16.msra.mxu1 %v5458_v3  ;;  %v5490_v6 = vcombine.low %v907_v51, %v911_v52 }
  0xec   :  { %4078 = vmatprep.subr.bf16.mxu1 %v5467_v7  ;;  %v5497_v7 = vcombine.high %v914_v61, %v918_v63 }
  0xee   :  { %3907 = vmatpush1.bf16.msra.mxu0 %v5464_v60  ;;  %v5491_v60 = vcombine.high %v907_v51, %v911_v52  ;;  %v205_v51 = vsub.s32 7, %v6440_v13 }
  0xef   :  { %3919 = vmatprep.subr.bf16.mxu0 %v5473_v4  ;;  %4079 = vmatpush1.bf16.msra.mxu1 %v5466_v10  ;;  %v5488_v4 = vcombine.low %v906_v46, %v910_v50  ;;  %v926_v10 = vld [vmem:[#allocation7 + $0x520] sm:$0xff]  ;;  %v198_v46 = vrot.slane %v6443_v15, %v197_v36 }
  0xf0   :  { %4091 = vmatprep.subr.bf16.mxu1 %v5475_v11  ;;  %v923_v11 = vld [vmem:[#allocation7 + $0x508] sm:$0xff] }
 0x164   :  { %v575_v20 = vpop.f32.mrb[0].mxu0  ;;  %v618_v39 = vpop.f32.mrb[0].mxu1 }
 0x165   :  { %v576_v22 = vadd.f32 %v575_v20, %v178_v17  ;;  %v577_v23 = vpop.f32.mrb[1].mxu0  ;;  %v619_v5 = vadd.f32 %v618_v39, %v186_v28  ;;  %v620_v41 = vpop.f32.mrb[1].mxu1 }
 0x166   :  { %v578_v24 = vadd.f32 %v577_v23, %v182_v18  ;;  %v579_v25 = vpop.f32.mrb[2].mxu0  ;;  %v621_v43 = vadd.f32 %v620_v41, %v190_v30  ;;  %v622_v0 = vpop.f32.mrb[2].mxu1  ;;  %v930_v23 = vld [vmem:[#allocation7 + $0x540] sm:$0xff] }
 0x167   :  { %v580_v26 = vadd.f32 %v579_v25, %v178_v17  ;;  %v581_v27 = vpop.f32.mrb[3].mxu0  ;;  %v713_v31 = vmax.f32 %v576_v22, 0.0  ;;  %v715_v47 = vmax.f32 %v619_v5, 0.0  ;;  %v623_v48 = vadd.f32 %v622_v0, %v186_v28  ;;  %v624_v49 = vpop.f32.mrb[3].mxu1  ;;  %v931_v25 = vld [vmem:[#allocation7 + $0x548] sm:$0xff]  ;;  %v946_v41 = vld [vmem:[#allocation7 + $0x5c0] sm:$0xff] }
 0x168   :  { %v582_v29 = vadd.f32 %v581_v27, %v182_v18  ;;  %v714_v34 = vmax.f32 %v578_v24, 0.0  ;;  %v716_v53 = vmax.f32 %v621_v43, 0.0  ;;  %v625_v54 = vadd.f32 %v624_v49, %v190_v30  ;;  %v934_v24 = vld [vmem:[#allocation7 + $0x560] sm:$0xff] }
 0x169   :  { %v721_v32 = vmax.f32 %v580_v26, 0.0  ;;  %v723_v55 = vmax.f32 %v623_v48, 0.0  ;;  %v5496_v17 = vcombine.low %v914_v61, %v918_v63  ;;  %v5498_v18 = vcombine.low %v915_v1, %v919_v2  ;;  %v935_v26 = vld [vmem:[#allocation7 + $0x568] sm:$0xff]  ;;  %v950_v0 = vld [vmem:[#allocation7 + $0x5e0] sm:$0xff] }
 0x16a   :  { %v722_v35 = vmax.f32 %v582_v29, 0.0  ;;  %v724_v58 = vmax.f32 %v625_v54, 0.0  ;;  %v5507_v22 = vcombine.high %v923_v11, %v927_v12  ;;  %v5506_v28 = vcombine.low %v923_v11, %v927_v12  ;;  %v954_v54 = vld [vmem:[#allocation7 + $0x600] sm:$0xff] }
 0x16b   :  { %v6460_v40 = vpack.c.bf16 %v721_v32, %v713_v31  ;;  %v6468_v62 = vpack.c.bf16 %v723_v55, %v715_v47  ;;  %v5513_v29 = vcombine.high %v930_v23, %v934_v24  ;;  %v5515_v30 = vcombine.high %v931_v25, %v935_v26  ;;  %v938_v31 = vld [vmem:[#allocation7 + $0x580] sm:$0xff] }
 0x16c   :  { %v6462_v42 = vpack.c.bf16 %v722_v35, %v714_v34  ;;  %v6470_v3 = vpack.c.bf16 %v724_v58, %v716_v53  ;;  %v193_v32 = vsub.s32 4, %v6440_v13  ;;  %v939_v34 = vld [vmem:[#allocation7 + $0x588] sm:$0xff]  ;;  %v5512_v37 = vcombine.low %v930_v23, %v934_v24 }
 0x16d   :  { %v943_v35 = vld [vmem:[#allocation7 + $0x5a8] sm:$0xff]  ;;  %v5514_v38 = vcombine.low %v931_v25, %v935_v26  ;;  %v5521_v39 = vcombine.high %v938_v31, %v942_v33  ;;  %v201_v47 = vsub.s32 6, %v6440_v13  ;;  %v5520_v48 = vcombine.low %v938_v31, %v942_v33 }
 0x16e   :  { %3908 = vmatprep.mubr.bf16.mxu0 %v6462_v42  ;;  %4080 = vmatprep.mubr.bf16.mxu1 %v6462_v42  ;;  %v5523_v5 = vcombine.high %v939_v34, %v943_v35  ;;  %v194_v43 = vrot.slane %v6443_v15, %v193_v32  ;;  %v5522_v49 = vcombine.low %v939_v34, %v943_v35  ;;  %v955_v58 = vld [vmem:[#allocation7 + $0x608] sm:$0xff] }
 0x16f   :  { %3909 = vmatmul.mubr.bf16.vlgmr.msra.gmra.mrb[8].mxu0 %v6460_v40  ;;  %4081 = vmatmul.mubr.bf16.vlgmr.msra.gmra.mrb[8].mxu1 %v6460_v40  ;;  %v5529_v52 = vcombine.high %v946_v41, %v950_v0  ;;  %v5528_v63 = vcombine.low %v946_v41, %v950_v0  ;;  %v967_v23 = vld [vmem:[#allocation7 + $0x668] sm:$0xff]  ;;  %v974_v41 = vld [vmem:[#allocation7 + $0x6a0] sm:$0xff] }
 0x170   :  { %3920 = vmatpush1.bf16.msra.mxu0 %v5472_v8  ;;  %4092 = vmatpush1.bf16.msra.mxu1 %v5474_v9  ;;  %v5499_v8 = vcombine.high %v915_v1, %v919_v2  ;;  %v922_v9 = vld [vmem:[#allocation7 + $0x500] sm:$0xff]  ;;  %v975_v0 = vld [vmem:[#allocation7 + $0x6a8] sm:$0xff] }
 0x171   :  { %3921 = vmatprep.subr.bf16.mxu0 %v5481_v44  ;;  %4093 = vmatprep.subr.bf16.mxu1 %v5483_v45  ;;  %v5505_v20 = vcombine.high %v922_v9, %v926_v10  ;;  %v5504_v27 = vcombine.low %v922_v9, %v926_v10  ;;  %v947_v44 = vld [vmem:[#allocation7 + $0x5c8] sm:$0xff]  ;;  %v206_v10 = vrot.slane %v6443_v15, %v205_v51 }
 0x172   :  { %3951 = vmatprep.mubr.bf16.mxu0 %v6470_v3  ;;  %4123 = vmatprep.mubr.bf16.mxu1 %v6470_v3  ;;  %v951_v45 = vld [vmem:[#allocation7 + $0x5e8] sm:$0xff] }
 0x173   :  { %v5531_v53 = vcombine.high %v947_v44, %v951_v45 }
 0x174   :  { %3922 = vmatpush1.bf16.msra.mxu0 %v5480_v56  ;;  %4094 = vmatpush1.bf16.msra.mxu1 %v5482_v57  ;;  %v958_v57 = vld [vmem:[#allocation7 + $0x620] sm:$0xff] }
 0x175   :  { %3923 = vmatprep.subr.bf16.mxu0 %v5489_v59  ;;  %4095 = vmatprep.subr.bf16.mxu1 %v5491_v60  ;;  %v959_v59 = vld [vmem:[#allocation7 + $0x628] sm:$0xff]  ;;  %v5537_v11 = vcombine.high %v954_v54, %v958_v57  ;;  %v5536_v26 = vcombine.low %v954_v54, %v958_v57  ;;  %v978_v54 = vld [vmem:[#allocation7 + $0x6c0] sm:$0xff] }
 0x176   :  { %v5539_v12 = vcombine.high %v955_v58, %v959_v59  ;;  %v979_v57 = vld [vmem:[#allocation7 + $0x6c8] sm:$0xff] }
 0x178   :  { %3924 = vmatpush1.bf16.msra.mxu0 %v5488_v4  ;;  %4096 = vmatpush1.bf16.msra.mxu1 %v5490_v6  ;;  %v202_v6 = vrot.slane %v6443_v15, %v201_v47 }
 0x179   :  { %3925 = vmatprep.subr.bf16.mxu0 %v5497_v7  ;;  %4097 = vmatprep.subr.bf16.mxu1 %v5499_v8  ;;  %v5530_v7 = vcombine.low %v947_v44, %v951_v45 }
 0x17c   :  { %3926 = vmatpush1.bf16.msra.mxu0 %v5496_v17  ;;  %4098 = vmatpush1.bf16.msra.mxu1 %v5498_v18  ;;  %v962_v17 = vld [vmem:[#allocation7 + $0x640] sm:$0xff] }
 0x17d   :  { %3927 = vmatprep.subr.bf16.mxu0 %v5505_v20  ;;  %4099 = vmatprep.subr.bf16.mxu1 %v5507_v22  ;;  %v966_v20 = vld [vmem:[#allocation7 + $0x660] sm:$0xff]  ;;  %v963_v22 = vld [vmem:[#allocation7 + $0x648] sm:$0xff] }
 0x17e   :  { %v5545_v34 = vcombine.high %v962_v17, %v966_v20  ;;  %v5547_v35 = vcombine.high %v963_v22, %v967_v23 }
 0x180   :  { %3928 = vmatpush1.bf16.msra.mxu0 %v5504_v27  ;;  %4100 = vmatpush1.bf16.msra.mxu1 %v5506_v28 }
 0x181   :  { %3929 = vmatprep.subr.bf16.mxu0 %v5513_v29  ;;  %4101 = vmatprep.subr.bf16.mxu1 %v5515_v30  ;;  %v5538_v30 = vcombine.low %v955_v58, %v959_v59  ;;  %v983_v58 = vld [vmem:[#allocation7 + $0x6e8] sm:$0xff] }
 0x184   :  { %3930 = vmatpush1.bf16.msra.mxu0 %v5512_v37  ;;  %4102 = vmatpush1.bf16.msra.mxu1 %v5514_v38  ;;  %v661_v50 = vpop.f32.mrb[4].mxu0  ;;  %v970_v37 = vld [vmem:[#allocation7 + $0x680] sm:$0xff] }
 0x185   :  { %3931 = vmatprep.subr.bf16.mxu0 %v5521_v39  ;;  %4103 = vmatprep.subr.bf16.mxu1 %v5523_v5  ;;  %v662_v55 = vadd.f32 %v661_v50, %v194_v43  ;;  %v663_v56 = vpop.f32.mrb[5].mxu0  ;;  %v704_v25 = vpop.f32.mrb[4].mxu1 }
 0x186   :  { %v664_v60 = vadd.f32 %v663_v56, %v198_v46  ;;  %v665_v61 = vpop.f32.mrb[6].mxu0  ;;  %v705_v28 = vadd.f32 %v704_v25, %v202_v6  ;;  %v706_v29 = vpop.f32.mrb[5].mxu1  ;;  %v982_v56 = vld [vmem:[#allocation7 + $0x6e0] sm:$0xff] }
 0x187   :  { %v717_v1 = vmax.f32 %v662_v55, 0.0  ;;  %v666_v2 = vadd.f32 %v665_v61, %v194_v43  ;;  %v667_v4 = vpop.f32.mrb[7].mxu0  ;;  %v707_v31 = vadd.f32 %v706_v29, %v206_v10  ;;  %v708_v33 = vpop.f32.mrb[6].mxu1  ;;  %v971_v43 = vld [vmem:[#allocation7 + $0x688] sm:$0xff] }
 0x188   :  { %3932 = vmatpush1.bf16.msra.mxu0 %v5520_v48  ;;  %4104 = vmatpush1.bf16.msra.mxu1 %v5522_v49  ;;  %v718_v8 = vmax.f32 %v664_v60, 0.0  ;;  %v668_v9 = vadd.f32 %v667_v4, %v198_v46  ;;  %v719_v38 = vmax.f32 %v705_v28, 0.0  ;;  %v709_v39 = vadd.f32 %v708_v33, %v202_v6  ;;  %v710_v5 = vpop.f32.mrb[7].mxu1  ;;  %v990_v4 = vld [vmem:[#allocation7 + $0x720] sm:$0xff]  ;;  %v987_v6 = vld [vmem:[#allocation7 + $0x708] sm:$0xff] }
 0x189   :  { %3933 = vmatprep.subr.bf16.mxu0 %v5529_v52  ;;  %4105 = vmatprep.subr.bf16.mxu1 %v5531_v53  ;;  %v725_v18 = vmax.f32 %v666_v2, 0.0  ;;  %v720_v44 = vmax.f32 %v707_v31, 0.0  ;;  %v711_v45 = vadd.f32 %v710_v5, %v206_v10  ;;  %v5544_v48 = vcombine.low %v962_v17, %v966_v20  ;;  %v986_v2 = vld [vmem:[#allocation7 + $0x700] sm:$0xff]  ;;  %v999_v20 = vld [vmem:[#allocation7 + $0x768] sm:$0xff] }
 0x18a   :  { %v726_v24 = vmax.f32 %v668_v9, 0.0  ;;  %v727_v46 = vmax.f32 %v709_v39, 0.0  ;;  %v5546_v49 = vcombine.low %v963_v22, %v967_v23  ;;  %v5553_v52 = vcombine.high %v970_v37, %v974_v41  ;;  %v998_v17 = vld [vmem:[#allocation7 + $0x760] sm:$0xff]  ;;  %v1003_v29 = vld [vmem:[#allocation7 + $0x788] sm:$0xff] }
 0x18b   :  { %v6490_v27 = vpack.c.bf16 %v725_v18, %v717_v1  ;;  %v728_v50 = vmax.f32 %v711_v45, 0.0  ;;  %v5555_v53 = vcombine.high %v971_v43, %v975_v0  ;;  %v5552_v60 = vcombine.low %v970_v37, %v974_v41  ;;  %v995_v18 = vld [vmem:[#allocation7 + $0x748] sm:$0xff]  ;;  %v1006_v28 = vld [vmem:[#allocation7 + $0x7a0] sm:$0xff] }
 0x18c   :  { %3934 = vmatpush1.bf16.msra.mxu0 %v5528_v63  ;;  %4106 = vmatpush1.bf16.msra.mxu1 %v5530_v7  ;;  %v6492_v15 = vpack.c.bf16 %v726_v24, %v718_v8  ;;  %v6494_v55 = vpack.c.bf16 %v727_v46, %v719_v38  ;;  %v5554_v61 = vcombine.low %v971_v43, %v975_v0  ;;  %v991_v7 = vld [vmem:[#allocation7 + $0x728] sm:$0xff]  ;;  %v1010_v37 = vld [vmem:[#allocation7 + $0x7c0] sm:$0xff] }
 0x18d   :  { %3935 = vmatprep.subr.bf16.mxu0 %v5537_v11  ;;  %4107 = vmatprep.subr.bf16.mxu1 %v5539_v12  ;;  %v6496_v59 = vpack.c.bf16 %v728_v50, %v720_v44  ;;  %v5561_v63 = vcombine.high %v978_v54, %v982_v56  ;;  %v5563_v1 = vcombine.high %v979_v57, %v983_v58  ;;  %v994_v12 = vld [vmem:[#allocation7 + $0x740] sm:$0xff]  ;;  %v1011_v39 = vld [vmem:[#allocation7 + $0x7c8] sm:$0xff] }
 0x18e   :  { %v5560_v8 = vcombine.low %v978_v54, %v982_v56  ;;  %v5562_v9 = vcombine.low %v979_v57, %v983_v58  ;;  %v5569_v10 = vcombine.high %v986_v2, %v990_v4  ;;  %v5571_v11 = vcombine.high %v987_v6, %v991_v7  ;;  %v1014_v38 = vld [vmem:[#allocation7 + $0x7e0] sm:$0xff]  ;;  %v1015_v5 = vld [vmem:[#allocation7 + $0x7e8] sm:$0xff] }
 0x18f   :  { %v5568_v22 = vcombine.low %v986_v2, %v990_v4  ;;  %v5570_v23 = vcombine.low %v987_v6, %v991_v7  ;;  %v5577_v24 = vcombine.high %v994_v12, %v998_v17  ;;  %v5579_v25 = vcombine.high %v995_v18, %v999_v20  ;;  %v1018_v45 = vld [vmem:[#allocation7 + $0x800] sm:$0xff]  ;;  %v1027_v58 = vld [vmem:[#allocation7 + $0x848] sm:$0xff] }
 0x190   :  { %3936 = vmatpush1.bf16.msra.mxu0 %v5536_v26  ;;  %4108 = vmatpush1.bf16.msra.mxu1 %v5538_v30  ;;  %v1002_v26 = vld [vmem:[#allocation7 + $0x780] sm:$0xff]  ;;  %v1007_v30 = vld [vmem:[#allocation7 + $0x7a8] sm:$0xff]  ;;  %v5576_v31 = vcombine.low %v994_v12, %v998_v17  ;;  %v5578_v33 = vcombine.low %v995_v18, %v999_v20  ;;  %v5593_v0 = vcombine.high %v1010_v37, %v1014_v38 }
 0x191   :  { %3937 = vmatprep.subr.bf16.mxu0 %v5545_v34  ;;  %4109 = vmatprep.subr.bf16.mxu1 %v5547_v35  ;;  %v5585_v34 = vcombine.high %v1002_v26, %v1006_v28  ;;  %v5587_v35 = vcombine.high %v1003_v29, %v1007_v30  ;;  %v5584_v41 = vcombine.low %v1002_v26, %v1006_v28  ;;  %v1022_v46 = vld [vmem:[#allocation7 + $0x820] sm:$0xff]  ;;  %v1035_v7 = vld [vmem:[#allocation7 + $0x888] sm:$0xff] }
 0x192   :  { %v5586_v43 = vcombine.low %v1003_v29, %v1007_v30  ;;  %v5595_v44 = vcombine.high %v1011_v39, %v1015_v5  ;;  %v5592_v50 = vcombine.low %v1010_v37, %v1014_v38  ;;  %v1026_v56 = vld [vmem:[#allocation7 + $0x840] sm:$0xff]  ;;  %v1043_v20 = vld [vmem:[#allocation7 + $0x8c8] sm:$0xff] }
 0x193   :  { %v1030_v57 = vld [vmem:[#allocation7 + $0x860] sm:$0xff]  ;;  %v1051_v30 = vld [vmem:[#allocation7 + $0x908] sm:$0xff] }
 0x194   :  { %3938 = vmatpush1.bf16.msra.mxu0 %v5544_v48  ;;  %4110 = vmatpush1.bf16.msra.mxu1 %v5546_v49  ;;  %v1019_v48 = vld [vmem:[#allocation7 + $0x808] sm:$0xff]  ;;  %v1034_v4 = vld [vmem:[#allocation7 + $0x880] sm:$0xff] }
 0x195   :  { %3939 = vmatprep.subr.bf16.mxu0 %v5553_v52  ;;  %4111 = vmatprep.subr.bf16.mxu1 %v5555_v53  ;;  %v1023_v49 = vld [vmem:[#allocation7 + $0x828] sm:$0xff]  ;;  %v5594_v52 = vcombine.low %v1011_v39, %v1015_v5  ;;  %v5601_v53 = vcombine.high %v1018_v45, %v1022_v46  ;;  %v1038_v6 = vld [vmem:[#allocation7 + $0x8a0] sm:$0xff] }
 0x196   :  { %v5603_v54 = vcombine.high %v1019_v48, %v1023_v49  ;;  %v1042_v17 = vld [vmem:[#allocation7 + $0x8c0] sm:$0xff]  ;;  %v1059_v5 = vld [vmem:[#allocation7 + $0x948] sm:$0xff] }
 0x197   :  { %v1046_v18 = vld [vmem:[#allocation7 + $0x8e0] sm:$0xff] }
 0x198   :  { %3940 = vmatpush1.bf16.msra.mxu0 %v5552_v60  ;;  %4112 = vmatpush1.bf16.msra.mxu1 %v5554_v61  ;;  %v1031_v60 = vld [vmem:[#allocation7 + $0x868] sm:$0xff]  ;;  %v5600_v61 = vcombine.low %v1018_v45, %v1022_v46  ;;  %v1050_v28 = vld [vmem:[#allocation7 + $0x900] sm:$0xff] }
 0x199   :  { %3941 = vmatprep.subr.bf16.mxu0 %v5561_v63  ;;  %4113 = vmatprep.subr.bf16.mxu1 %v5563_v1  ;;  %v5602_v63 = vcombine.low %v1019_v48, %v1023_v49  ;;  %v5609_v1 = vcombine.high %v1026_v56, %v1030_v57  ;;  %v5611_v2 = vcombine.high %v1027_v58, %v1031_v60  ;;  %v1054_v29 = vld [vmem:[#allocation7 + $0x920] sm:$0xff]  ;;  %v1067_v49 = vld [vmem:[#allocation7 + $0x988] sm:$0xff] }
 0x19a   :  { %v1058_v38 = vld [vmem:[#allocation7 + $0x940] sm:$0xff] }
 0x19b   :  { %v1062_v39 = vld [vmem:[#allocation7 + $0x960] sm:$0xff] }
 0x19c   :  { %3942 = vmatpush1.bf16.msra.mxu0 %v5560_v8  ;;  %4114 = vmatpush1.bf16.msra.mxu1 %v5562_v9  ;;  %v1039_v8 = vld [vmem:[#allocation7 + $0x8a8] sm:$0xff]  ;;  %v5608_v9 = vcombine.low %v1026_v56, %v1030_v57  ;;  %v1066_v46 = vld [vmem:[#allocation7 + $0x980] sm:$0xff] }
 0x19d   :  { %3943 = vmatprep.subr.bf16.mxu0 %v5569_v10  ;;  %4115 = vmatprep.subr.bf16.mxu1 %v5571_v11  ;;  %v5610_v10 = vcombine.low %v1027_v58, %v1031_v60  ;;  %v5617_v11 = vcombine.high %v1034_v4, %v1038_v6  ;;  %v5619_v12 = vcombine.high %v1035_v7, %v1039_v8  ;;  %v1070_v48 = vld [vmem:[#allocation7 + $0x9a0] sm:$0xff]  ;;  %v1075_v60 = vld [vmem:[#allocation7 + $0x9c8] sm:$0xff] }
 0x19e   :  { %v1074_v57 = vld [vmem:[#allocation7 + $0x9c0] sm:$0xff] }
 0x19f   :  { %v1078_v58 = vld [vmem:[#allocation7 + $0x9e0] sm:$0xff] }
 0x1a0   :  { %3944 = vmatpush1.bf16.msra.mxu0 %v5568_v22  ;;  %4116 = vmatpush1.bf16.msra.mxu1 %v5570_v23  ;;  %v1047_v22 = vld [vmem:[#allocation7 + $0x8e8] sm:$0xff]  ;;  %v5616_v23 = vcombine.low %v1034_v4, %v1038_v6  ;;  %v1082_v6 = vld [vmem:[#allocation7 + $0xa00] sm:$0xff] }
 0x1a1   :  { %3945 = vmatprep.subr.bf16.mxu0 %v5577_v24  ;;  %4117 = vmatprep.subr.bf16.mxu1 %v5579_v25  ;;  %v5618_v24 = vcombine.low %v1035_v7, %v1039_v8  ;;  %v5625_v25 = vcombine.high %v1042_v17, %v1046_v18  ;;  %v5627_v26 = vcombine.high %v1043_v20, %v1047_v22  ;;  %v1086_v7 = vld [vmem:[#allocation7 + $0xa20] sm:$0xff]  ;;  %v1083_v8 = vld [vmem:[#allocation7 + $0xa08] sm:$0xff] }
 0x1a4   :  { %3946 = vmatpush1.bf16.msra.mxu0 %v5576_v31  ;;  %4118 = vmatpush1.bf16.msra.mxu1 %v5578_v33  ;;  %v1055_v31 = vld [vmem:[#allocation7 + $0x928] sm:$0xff]  ;;  %v5624_v33 = vcombine.low %v1042_v17, %v1046_v18  ;;  %v1090_v18 = vld [vmem:[#allocation7 + $0xa40] sm:$0xff] }
 0x1a5   :  { %3947 = vmatprep.subr.bf16.mxu0 %v5585_v34  ;;  %4119 = vmatprep.subr.bf16.mxu1 %v5587_v35  ;;  %v5626_v34 = vcombine.low %v1043_v20, %v1047_v22  ;;  %v5633_v35 = vcombine.high %v1050_v28, %v1054_v29  ;;  %v5635_v37 = vcombine.high %v1051_v30, %v1055_v31  ;;  %v1094_v20 = vld [vmem:[#allocation7 + $0xa60] sm:$0xff]  ;;  %v1091_v22 = vld [vmem:[#allocation7 + $0xa48] sm:$0xff] }
 0x1a8   :  { %3948 = vmatpush1.bf16.msra.mxu0 %v5584_v41  ;;  %4120 = vmatpush1.bf16.msra.mxu1 %v5586_v43  ;;  %v1063_v41 = vld [vmem:[#allocation7 + $0x968] sm:$0xff]  ;;  %v5632_v43 = vcombine.low %v1050_v28, %v1054_v29  ;;  %v1098_v29 = vld [vmem:[#allocation7 + $0xa80] sm:$0xff] }
 0x1a9   :  { %3949 = vmatprep.subr.bf16.mxu0 %v5593_v0  ;;  %4121 = vmatprep.subr.bf16.mxu1 %v5595_v44  ;;  %v5634_v0 = vcombine.low %v1051_v30, %v1055_v31  ;;  %v5641_v44 = vcombine.high %v1058_v38, %v1062_v39  ;;  %v5643_v45 = vcombine.high %v1059_v5, %v1063_v41  ;;  %v1102_v30 = vld [vmem:[#allocation7 + $0xaa0] sm:$0xff]  ;;  %v1099_v31 = vld [vmem:[#allocation7 + $0xa88] sm:$0xff] }
 0x1ac   :  { %3950 = vmatpush1.bf16.msra.mxu0 %v5592_v50  ;;  %4122 = vmatpush1.bf16.msra.mxu1 %v5594_v52  ;;  %v1071_v50 = vld [vmem:[#allocation7 + $0x9a8] sm:$0xff]  ;;  %v5640_v52 = vcombine.low %v1058_v38, %v1062_v39  ;;  %v1106_v39 = vld [vmem:[#allocation7 + $0xac0] sm:$0xff] }
 0x1ad   :  { %3962 = vmatprep.subr.bf16.mxu0 %v5601_v53  ;;  %4134 = vmatprep.subr.bf16.mxu1 %v5603_v54  ;;  %v5642_v53 = vcombine.low %v1059_v5, %v1063_v41  ;;  %v5649_v54 = vcombine.high %v1066_v46, %v1070_v48  ;;  %v5651_v56 = vcombine.high %v1067_v49, %v1071_v50  ;;  %v1110_v5 = vld [vmem:[#allocation7 + $0xae0] sm:$0xff]  ;;  %v1107_v41 = vld [vmem:[#allocation7 + $0xac8] sm:$0xff] }
 0x1af   :  { %3952 = vmatmul.mubr.bf16.vlgmr.msra.gmra.mrb[8].mxu0 %v6468_v62  ;;  %4124 = vmatmul.mubr.bf16.vlgmr.msra.gmra.mrb[8].mxu1 %v6468_v62 }
 0x1b0   :  { %3963 = vmatpush1.bf16.msra.mxu0 %v5600_v61  ;;  %4135 = vmatpush1.bf16.msra.mxu1 %v5602_v63  ;;  %v1079_v61 = vld [vmem:[#allocation7 + $0x9e8] sm:$0xff]  ;;  %v5648_v63 = vcombine.low %v1066_v46, %v1070_v48  ;;  %v1114_v48 = vld [vmem:[#allocation7 + $0xb00] sm:$0xff] }
 0x1b1   :  { %3964 = vmatprep.subr.bf16.mxu0 %v5609_v1  ;;  %4136 = vmatprep.subr.bf16.mxu1 %v5611_v2  ;;  %v5650_v1 = vcombine.low %v1067_v49, %v1071_v50  ;;  %v5657_v2 = vcombine.high %v1074_v57, %v1078_v58  ;;  %v5659_v4 = vcombine.high %v1075_v60, %v1079_v61  ;;  %v1118_v49 = vld [vmem:[#allocation7 + $0xb20] sm:$0xff]  ;;  %v1115_v50 = vld [vmem:[#allocation7 + $0xb08] sm:$0xff] }
 0x1b2   :  { %3994 = vmatprep.mubr.bf16.mxu0 %v6492_v15  ;;  %4166 = vmatprep.mubr.bf16.mxu1 %v6492_v15 }
 0x1b4   :  { %3965 = vmatpush1.bf16.msra.mxu0 %v5608_v9  ;;  %4137 = vmatpush1.bf16.msra.mxu1 %v5610_v10  ;;  %v1087_v9 = vld [vmem:[#allocation7 + $0xa28] sm:$0xff]  ;;  %v5656_v10 = vcombine.low %v1074_v57, %v1078_v58  ;;  %v1122_v58 = vld [vmem:[#allocation7 + $0xb40] sm:$0xff] }
 0x1b5   :  { %3966 = vmatprep.subr.bf16.mxu0 %v5617_v11  ;;  %4138 = vmatprep.subr.bf16.mxu1 %v5619_v12  ;;  %v5658_v11 = vcombine.low %v1075_v60, %v1079_v61  ;;  %v5665_v12 = vcombine.high %v1082_v6, %v1086_v7  ;;  %v5667_v17 = vcombine.high %v1083_v8, %v1087_v9  ;;  %v1126_v60 = vld [vmem:[#allocation7 + $0xb60] sm:$0xff]  ;;  %v1123_v61 = vld [vmem:[#allocation7 + $0xb48] sm:$0xff] }
 0x1b8   :  { %3967 = vmatpush1.bf16.msra.mxu0 %v5616_v23  ;;  %4139 = vmatpush1.bf16.msra.mxu1 %v5618_v24  ;;  %v1095_v23 = vld [vmem:[#allocation7 + $0xa68] sm:$0xff]  ;;  %v5664_v24 = vcombine.low %v1082_v6, %v1086_v7  ;;  %v1130_v7 = vld [vmem:[#allocation7 + $0xb80] sm:$0xff] }
 0x1b9   :  { %3968 = vmatprep.subr.bf16.mxu0 %v5625_v25  ;;  %4140 = vmatprep.subr.bf16.mxu1 %v5627_v26  ;;  %v5666_v25 = vcombine.low %v1083_v8, %v1087_v9  ;;  %v5673_v26 = vcombine.high %v1090_v18, %v1094_v20  ;;  %v5675_v28 = vcombine.high %v1091_v22, %v1095_v23  ;;  %v1134_v8 = vld [vmem:[#allocation7 + $0xba0] sm:$0xff]  ;;  %v1131_v9 = vld [vmem:[#allocation7 + $0xb88] sm:$0xff] }
 0x1bc   :  { %3969 = vmatpush1.bf16.msra.mxu0 %v5624_v33  ;;  %4141 = vmatpush1.bf16.msra.mxu1 %v5626_v34  ;;  %v1103_v33 = vld [vmem:[#allocation7 + $0xaa8] sm:$0xff]  ;;  %v5672_v34 = vcombine.low %v1090_v18, %v1094_v20  ;;  %v1138_v20 = vld [vmem:[#allocation7 + $0xbc0] sm:$0xff] }
 0x1bd   :  { %3970 = vmatprep.subr.bf16.mxu0 %v5633_v35  ;;  %4142 = vmatprep.subr.bf16.mxu1 %v5635_v37  ;;  %v5674_v35 = vcombine.low %v1091_v22, %v1095_v23  ;;  %v5681_v37 = vcombine.high %v1098_v29, %v1102_v30  ;;  %v5683_v38 = vcombine.high %v1099_v31, %v1103_v33  ;;  %v1142_v22 = vld [vmem:[#allocation7 + $0xbe0] sm:$0xff]  ;;  %v1139_v23 = vld [vmem:[#allocation7 + $0xbc8] sm:$0xff] }
 0x1c0   :  { %3971 = vmatpush1.bf16.msra.mxu0 %v5632_v43  ;;  %4143 = vmatpush1.bf16.msra.mxu1 %v5634_v0  ;;  %v1111_v43 = vld [vmem:[#allocation7 + $0xae8] sm:$0xff]  ;;  %v5680_v0 = vcombine.low %v1098_v29, %v1102_v30  ;;  %v1146_v30 = vld [vmem:[#allocation7 + $0xc00] sm:$0xff] }
 0x1c1   :  { %3972 = vmatprep.subr.bf16.mxu0 %v5641_v44  ;;  %4144 = vmatprep.subr.bf16.mxu1 %v5643_v45  ;;  %v5682_v44 = vcombine.low %v1099_v31, %v1103_v33  ;;  %v5689_v45 = vcombine.high %v1106_v39, %v1110_v5  ;;  %v5691_v46 = vcombine.high %v1107_v41, %v1111_v43  ;;  %v1150_v31 = vld [vmem:[#allocation7 + $0xc20] sm:$0xff]  ;;  %v1147_v33 = vld [vmem:[#allocation7 + $0xc08] sm:$0xff] }
 0x1c4   :  { %3973 = vmatpush1.bf16.msra.mxu0 %v5640_v52  ;;  %4145 = vmatpush1.bf16.msra.mxu1 %v5642_v53  ;;  %v1119_v52 = vld [vmem:[#allocation7 + $0xb28] sm:$0xff]  ;;  %v5688_v53 = vcombine.low %v1106_v39, %v1110_v5  ;;  %v1154_v5 = vld [vmem:[#allocation7 + $0xc40] sm:$0xff] }
 0x1c5   :  { %3974 = vmatprep.subr.bf16.mxu0 %v5649_v54  ;;  %4146 = vmatprep.subr.bf16.mxu1 %v5651_v56  ;;  %v5690_v54 = vcombine.low %v1107_v41, %v1111_v43  ;;  %v5697_v56 = vcombine.high %v1114_v48, %v1118_v49  ;;  %v5699_v57 = vcombine.high %v1115_v50, %v1119_v52  ;;  %v1158_v41 = vld [vmem:[#allocation7 + $0xc60] sm:$0xff]  ;;  %v1155_v43 = vld [vmem:[#allocation7 + $0xc48] sm:$0xff] }
 0x1c8   :  { %3975 = vmatpush1.bf16.msra.mxu0 %v5648_v63  ;;  %4147 = vmatpush1.bf16.msra.mxu1 %v5650_v1  ;;  %v1127_v63 = vld [vmem:[#allocation7 + $0xb68] sm:$0xff]  ;;  %v5696_v1 = vcombine.low %v1114_v48, %v1118_v49  ;;  %v1162_v49 = vld [vmem:[#allocation7 + $0xc80] sm:$0xff] }
 0x1c9   :  { %3976 = vmatprep.subr.bf16.mxu0 %v5657_v2  ;;  %4148 = vmatprep.subr.bf16.mxu1 %v5659_v4  ;;  %v5698_v2 = vcombine.low %v1115_v50, %v1119_v52  ;;  %v5705_v4 = vcombine.high %v1122_v58, %v1126_v60  ;;  %v5707_v6 = vcombine.high %v1123_v61, %v1127_v63  ;;  %v1166_v50 = vld [vmem:[#allocation7 + $0xca0] sm:$0xff]  ;;  %v1163_v52 = vld [vmem:[#allocation7 + $0xc88] sm:$0xff] }
 0x1cc   :  { %3977 = vmatpush1.bf16.msra.mxu0 %v5656_v10  ;;  %4149 = vmatpush1.bf16.msra.mxu1 %v5658_v11  ;;  %v1135_v10 = vld [vmem:[#allocation7 + $0xba8] sm:$0xff]  ;;  %v5704_v11 = vcombine.low %v1122_v58, %v1126_v60  ;;  %v1170_v60 = vld [vmem:[#allocation7 + $0xcc0] sm:$0xff] }
 0x1cd   :  { %3978 = vmatprep.subr.bf16.mxu0 %v5665_v12  ;;  %4150 = vmatprep.subr.bf16.mxu1 %v5667_v17  ;;  %v5706_v12 = vcombine.low %v1123_v61, %v1127_v63  ;;  %v5713_v17 = vcombine.high %v1130_v7, %v1134_v8  ;;  %v5715_v18 = vcombine.high %v1131_v9, %v1135_v10  ;;  %v1174_v61 = vld [vmem:[#allocation7 + $0xce0] sm:$0xff]  ;;  %v1171_v63 = vld [vmem:[#allocation7 + $0xcc8] sm:$0xff] }
 0x1d0   :  { %3979 = vmatpush1.bf16.msra.mxu0 %v5664_v24  ;;  %4151 = vmatpush1.bf16.msra.mxu1 %v5666_v25  ;;  %v1143_v24 = vld [vmem:[#allocation7 + $0xbe8] sm:$0xff]  ;;  %v5712_v25 = vcombine.low %v1130_v7, %v1134_v8  ;;  %v1178_v8 = vld [vmem:[#allocation7 + $0xd00] sm:$0xff] }
 0x1d1   :  { %3980 = vmatprep.subr.bf16.mxu0 %v5673_v26  ;;  %4152 = vmatprep.subr.bf16.mxu1 %v5675_v28  ;;  %v5714_v26 = vcombine.low %v1131_v9, %v1135_v10  ;;  %v5721_v28 = vcombine.high %v1138_v20, %v1142_v22  ;;  %v5723_v29 = vcombine.high %v1139_v23, %v1143_v24  ;;  %v1182_v9 = vld [vmem:[#allocation7 + $0xd20] sm:$0xff]  ;;  %v1179_v10 = vld [vmem:[#allocation7 + $0xd08] sm:$0xff] }
 0x1d4   :  { %3981 = vmatpush1.bf16.msra.mxu0 %v5672_v34  ;;  %4153 = vmatpush1.bf16.msra.mxu1 %v5674_v35  ;;  %v1151_v34 = vld [vmem:[#allocation7 + $0xc28] sm:$0xff]  ;;  %v5720_v35 = vcombine.low %v1138_v20, %v1142_v22  ;;  %v1186_v22 = vld [vmem:[#allocation7 + $0xd40] sm:$0xff] }
 0x1d5   :  { %3982 = vmatprep.subr.bf16.mxu0 %v5681_v37  ;;  %4154 = vmatprep.subr.bf16.mxu1 %v5683_v38  ;;  %v5722_v37 = vcombine.low %v1139_v23, %v1143_v24  ;;  %v5729_v38 = vcombine.high %v1146_v30, %v1150_v31  ;;  %v5731_v39 = vcombine.high %v1147_v33, %v1151_v34  ;;  %v1190_v23 = vld [vmem:[#allocation7 + $0xd60] sm:$0xff]  ;;  %v1187_v24 = vld [vmem:[#allocation7 + $0xd48] sm:$0xff] }
 0x1d8   :  { %3983 = vmatpush1.bf16.msra.mxu0 %v5680_v0  ;;  %4155 = vmatpush1.bf16.msra.mxu1 %v5682_v44  ;;  %v1159_v0 = vld [vmem:[#allocation7 + $0xc68] sm:$0xff]  ;;  %v5728_v44 = vcombine.low %v1146_v30, %v1150_v31  ;;  %v1194_v31 = vld [vmem:[#allocation7 + $0xd80] sm:$0xff] }
 0x1d9   :  { %3984 = vmatprep.subr.bf16.mxu0 %v5689_v45  ;;  %4156 = vmatprep.subr.bf16.mxu1 %v5691_v46  ;;  %v5730_v45 = vcombine.low %v1147_v33, %v1151_v34  ;;  %v5737_v46 = vcombine.high %v1154_v5, %v1158_v41  ;;  %v5739_v48 = vcombine.high %v1155_v43, %v1159_v0  ;;  %v1198_v33 = vld [vmem:[#allocation7 + $0xda0] sm:$0xff]  ;;  %v1195_v34 = vld [vmem:[#allocation7 + $0xd88] sm:$0xff] }
 0x1dc   :  { %3985 = vmatpush1.bf16.msra.mxu0 %v5688_v53  ;;  %4157 = vmatpush1.bf16.msra.mxu1 %v5690_v54  ;;  %v1167_v53 = vld [vmem:[#allocation7 + $0xca8] sm:$0xff]  ;;  %v5736_v54 = vcombine.low %v1154_v5, %v1158_v41  ;;  %v1202_v41 = vld [vmem:[#allocation7 + $0xdc0] sm:$0xff] }
 0x1dd   :  { %3986 = vmatprep.subr.bf16.mxu0 %v5697_v56  ;;  %4158 = vmatprep.subr.bf16.mxu1 %v5699_v57  ;;  %v5738_v56 = vcombine.low %v1155_v43, %v1159_v0  ;;  %v5745_v57 = vcombine.high %v1162_v49, %v1166_v50  ;;  %v5747_v58 = vcombine.high %v1163_v52, %v1167_v53  ;;  %v1206_v43 = vld [vmem:[#allocation7 + $0xde0] sm:$0xff]  ;;  %v1203_v0 = vld [vmem:[#allocation7 + $0xdc8] sm:$0xff] }
 0x1e0   :  { %3987 = vmatpush1.bf16.msra.mxu0 %v5696_v1  ;;  %4159 = vmatpush1.bf16.msra.mxu1 %v5698_v2  ;;  %v1175_v1 = vld [vmem:[#allocation7 + $0xce8] sm:$0xff]  ;;  %v5744_v2 = vcombine.low %v1162_v49, %v1166_v50  ;;  %v1210_v50 = vld [vmem:[#allocation7 + $0xe00] sm:$0xff] }
 0x1e1   :  { %3988 = vmatprep.subr.bf16.mxu0 %v5705_v4  ;;  %4160 = vmatprep.subr.bf16.mxu1 %v5707_v6  ;;  %v5746_v4 = vcombine.low %v1163_v52, %v1167_v53  ;;  %v5753_v6 = vcombine.high %v1170_v60, %v1174_v61  ;;  %v5755_v7 = vcombine.high %v1171_v63, %v1175_v1  ;;  %v1214_v52 = vld [vmem:[#allocation7 + $0xe20] sm:$0xff]  ;;  %v1211_v53 = vld [vmem:[#allocation7 + $0xe08] sm:$0xff] }
 0x1e4   :  { %3989 = vmatpush1.bf16.msra.mxu0 %v5704_v11  ;;  %4161 = vmatpush1.bf16.msra.mxu1 %v5706_v12  ;;  %v1183_v11 = vld [vmem:[#allocation7 + $0xd28] sm:$0xff]  ;;  %v5752_v12 = vcombine.low %v1170_v60, %v1174_v61  ;;  %v1218_v61 = vld [vmem:[#allocation7 + $0xe40] sm:$0xff] }
 0x1e5   :  { %3990 = vmatprep.subr.bf16.mxu0 %v5713_v17  ;;  %4162 = vmatprep.subr.bf16.mxu1 %v5715_v18  ;;  %v5754_v17 = vcombine.low %v1171_v63, %v1175_v1  ;;  %v5761_v18 = vcombine.high %v1178_v8, %v1182_v9  ;;  %v5763_v20 = vcombine.high %v1179_v10, %v1183_v11  ;;  %v1222_v63 = vld [vmem:[#allocation7 + $0xe60] sm:$0xff]  ;;  %v1219_v1 = vld [vmem:[#allocation7 + $0xe48] sm:$0xff] }
 0x1e8   :  { %3991 = vmatpush1.bf16.msra.mxu0 %v5712_v25  ;;  %4163 = vmatpush1.bf16.msra.mxu1 %v5714_v26  ;;  %v1191_v25 = vld [vmem:[#allocation7 + $0xd68] sm:$0xff]  ;;  %v5760_v26 = vcombine.low %v1178_v8, %v1182_v9  ;;  %v1226_v9 = vld [vmem:[#allocation7 + $0xe80] sm:$0xff] }
 0x1e9   :  { %3992 = vmatprep.subr.bf16.mxu0 %v5721_v28  ;;  %4164 = vmatprep.subr.bf16.mxu1 %v5723_v29  ;;  %v5762_v28 = vcombine.low %v1179_v10, %v1183_v11  ;;  %v5769_v29 = vcombine.high %v1186_v22, %v1190_v23  ;;  %v5771_v30 = vcombine.high %v1187_v24, %v1191_v25  ;;  %v1230_v10 = vld [vmem:[#allocation7 + $0xea0] sm:$0xff]  ;;  %v1227_v11 = vld [vmem:[#allocation7 + $0xe88] sm:$0xff] }
 0x1ec   :  { %3993 = vmatpush1.bf16.msra.mxu0 %v5720_v35  ;;  %4165 = vmatpush1.bf16.msra.mxu1 %v5722_v37  ;;  %v1199_v35 = vld [vmem:[#allocation7 + $0xda8] sm:$0xff]  ;;  %v5768_v37 = vcombine.low %v1186_v22, %v1190_v23  ;;  %v1234_v23 = vld [vmem:[#allocation7 + $0xec0] sm:$0xff] }
 0x1ed   :  { %4005 = vmatprep.subr.bf16.mxu0 %v5729_v38  ;;  %4177 = vmatprep.subr.bf16.mxu1 %v5731_v39  ;;  %v5770_v38 = vcombine.low %v1187_v24, %v1191_v25  ;;  %v5777_v39 = vcombine.high %v1194_v31, %v1198_v33  ;;  %v5779_v5 = vcombine.high %v1195_v34, %v1199_v35  ;;  %v1238_v24 = vld [vmem:[#allocation7 + $0xee0] sm:$0xff]  ;;  %v1235_v25 = vld [vmem:[#allocation7 + $0xec8] sm:$0xff] }
 0x1ef   :  { %3995 = vmatmul.mubr.bf16.vlgmr.msra.gmra.mrb[8].mxu0 %v6490_v27  ;;  %4167 = vmatmul.mubr.bf16.vlgmr.msra.gmra.mrb[8].mxu1 %v6490_v27 }
 0x1f0   :  { %4006 = vmatpush1.bf16.msra.mxu0 %v5728_v44  ;;  %4178 = vmatpush1.bf16.msra.mxu1 %v5730_v45  ;;  %v1207_v44 = vld [vmem:[#allocation7 + $0xde8] sm:$0xff]  ;;  %v5776_v45 = vcombine.low %v1194_v31, %v1198_v33  ;;  %v1242_v33 = vld [vmem:[#allocation7 + $0xf00] sm:$0xff] }
 0x1f1   :  { %4007 = vmatprep.subr.bf16.mxu0 %v5737_v46  ;;  %4179 = vmatprep.subr.bf16.mxu1 %v5739_v48  ;;  %v5778_v46 = vcombine.low %v1195_v34, %v1199_v35  ;;  %v5785_v48 = vcombine.high %v1202_v41, %v1206_v43  ;;  %v5787_v49 = vcombine.high %v1203_v0, %v1207_v44  ;;  %v1246_v34 = vld [vmem:[#allocation7 + $0xf20] sm:$0xff]  ;;  %v1243_v35 = vld [vmem:[#allocation7 + $0xf08] sm:$0xff] }
 0x1f2   :  { %4037 = vmatprep.mubr.bf16.mxu0 %v6496_v59  ;;  %4209 = vmatprep.mubr.bf16.mxu1 %v6496_v59 }
 0x1f4   :  { %4008 = vmatpush1.bf16.msra.mxu0 %v5736_v54  ;;  %4180 = vmatpush1.bf16.msra.mxu1 %v5738_v56  ;;  %v1215_v54 = vld [vmem:[#allocation7 + $0xe28] sm:$0xff]  ;;  %v5784_v56 = vcombine.low %v1202_v41, %v1206_v43  ;;  %v1250_v43 = vld [vmem:[#allocation7 + $0xf40] sm:$0xff] }
 0x1f5   :  { %4009 = vmatprep.subr.bf16.mxu0 %v5745_v57  ;;  %4181 = vmatprep.subr.bf16.mxu1 %v5747_v58  ;;  %v5786_v57 = vcombine.low %v1203_v0, %v1207_v44  ;;  %v5793_v58 = vcombine.high %v1210_v50, %v1214_v52  ;;  %v5795_v60 = vcombine.high %v1211_v53, %v1215_v54  ;;  %v1254_v0 = vld [vmem:[#allocation7 + $0xf60] sm:$0xff]  ;;  %v1251_v44 = vld [vmem:[#allocation7 + $0xf48] sm:$0xff] }
 0x1f8   :  { %4010 = vmatpush1.bf16.msra.mxu0 %v5744_v2  ;;  %4182 = vmatpush1.bf16.msra.mxu1 %v5746_v4  ;;  %v1223_v2 = vld [vmem:[#allocation7 + $0xe68] sm:$0xff]  ;;  %v5792_v4 = vcombine.low %v1210_v50, %v1214_v52  ;;  %v1258_v52 = vld [vmem:[#allocation7 + $0xf80] sm:$0xff] }
 0x1f9   :  { %4011 = vmatprep.subr.bf16.mxu0 %v5753_v6  ;;  %4183 = vmatprep.subr.bf16.mxu1 %v5755_v7  ;;  %v5794_v6 = vcombine.low %v1211_v53, %v1215_v54  ;;  %v5801_v7 = vcombine.high %v1218_v61, %v1222_v63  ;;  %v5803_v8 = vcombine.high %v1219_v1, %v1223_v2  ;;  %v1262_v53 = vld [vmem:[#allocation7 + $0xfa0] sm:$0xff]  ;;  %v1259_v54 = vld [vmem:[#allocation7 + $0xf88] sm:$0xff] }
 0x1fc   :  { %4012 = vmatpush1.bf16.msra.mxu0 %v5752_v12  ;;  %4184 = vmatpush1.bf16.msra.mxu1 %v5754_v17  ;;  %v1231_v12 = vld [vmem:[#allocation7 + $0xea8] sm:$0xff]  ;;  %v5800_v17 = vcombine.low %v1218_v61, %v1222_v63  ;;  %v1266_v63 = vld [vmem:[#allocation7 + $0xfc0] sm:$0xff] }
 0x1fd   :  { %4013 = vmatprep.subr.bf16.mxu0 %v5761_v18  ;;  %4185 = vmatprep.subr.bf16.mxu1 %v5763_v20  ;;  %v5802_v18 = vcombine.low %v1219_v1, %v1223_v2  ;;  %v5809_v20 = vcombine.high %v1226_v9, %v1230_v10  ;;  %v5811_v22 = vcombine.high %v1227_v11, %v1231_v12  ;;  %v1270_v1 = vld [vmem:[#allocation7 + $0xfe0] sm:$0xff]  ;;  %v1267_v2 = vld [vmem:[#allocation7 + $0xfc8] sm:$0xff] }
 0x200   :  { %4014 = vmatpush1.bf16.msra.mxu0 %v5760_v26  ;;  %4186 = vmatpush1.bf16.msra.mxu1 %v5762_v28  ;;  %v1239_v26 = vld [vmem:[#allocation7 + $0xee8] sm:$0xff]  ;;  %v5808_v28 = vcombine.low %v1226_v9, %v1230_v10  ;;  %v764_v10 = vld [vmem:[#allocation7 + $0x10] sm:$0xff] }
 0x201   :  { %4015 = vmatprep.subr.bf16.mxu0 %v5769_v29  ;;  %4187 = vmatprep.subr.bf16.mxu1 %v5771_v30  ;;  %v5810_v29 = vcombine.low %v1227_v11, %v1231_v12  ;;  %v5817_v30 = vcombine.high %v1234_v23, %v1238_v24  ;;  %v5819_v31 = vcombine.high %v1235_v25, %v1239_v26  ;;  %v768_v11 = vld [vmem:[#allocation7 + $0x30] sm:$0xff]  ;;  %v765_v12 = vld [vmem:[#allocation7 + $0x18] sm:$0xff] }
 0x204   :  { %4016 = vmatpush1.bf16.msra.mxu0 %v5768_v37  ;;  %4188 = vmatpush1.bf16.msra.mxu1 %v5770_v38  ;;  %v1247_v37 = vld [vmem:[#allocation7 + $0xf28] sm:$0xff]  ;;  %v5816_v38 = vcombine.low %v1234_v23, %v1238_v24  ;;  %v772_v24 = vld [vmem:[#allocation7 + $0x50] sm:$0xff] }
 0x205   :  { %4017 = vmatprep.subr.bf16.mxu0 %v5777_v39  ;;  %4189 = vmatprep.subr.bf16.mxu1 %v5779_v5  ;;  %v5818_v39 = vcombine.low %v1235_v25, %v1239_v26  ;;  %v5825_v5 = vcombine.high %v1242_v33, %v1246_v34  ;;  %v5827_v41 = vcombine.high %v1243_v35, %v1247_v37  ;;  %v776_v25 = vld [vmem:[#allocation7 + $0x70] sm:$0xff]  ;;  %v773_v26 = vld [vmem:[#allocation7 + $0x58] sm:$0xff] }
 0x208   :  { %4018 = vmatpush1.bf16.msra.mxu0 %v5776_v45  ;;  %4190 = vmatpush1.bf16.msra.mxu1 %v5778_v46  ;;  %v1255_v45 = vld [vmem:[#allocation7 + $0xf68] sm:$0xff]  ;;  %v5824_v46 = vcombine.low %v1242_v33, %v1246_v34  ;;  %v780_v34 = vld [vmem:[#allocation7 + $0x90] sm:$0xff] }
 0x209   :  { %4019 = vmatprep.subr.bf16.mxu0 %v5785_v48  ;;  %4191 = vmatprep.subr.bf16.mxu1 %v5787_v49  ;;  %v5826_v48 = vcombine.low %v1243_v35, %v1247_v37  ;;  %v5833_v49 = vcombine.high %v1250_v43, %v1254_v0  ;;  %v5835_v50 = vcombine.high %v1251_v44, %v1255_v45  ;;  %v784_v35 = vld [vmem:[#allocation7 + $0xb0] sm:$0xff]  ;;  %v781_v37 = vld [vmem:[#allocation7 + $0x98] sm:$0xff] }
 0x20c   :  { %4020 = vmatpush1.bf16.msra.mxu0 %v5784_v56  ;;  %4192 = vmatpush1.bf16.msra.mxu1 %v5786_v57  ;;  %v1263_v56 = vld [vmem:[#allocation7 + $0xfa8] sm:$0xff]  ;;  %v5832_v57 = vcombine.low %v1250_v43, %v1254_v0  ;;  %v788_v0 = vld [vmem:[#allocation7 + $0xd0] sm:$0xff] }
 0x20d   :  { %4021 = vmatprep.subr.bf16.mxu0 %v5793_v58  ;;  %4193 = vmatprep.subr.bf16.mxu1 %v5795_v60  ;;  %v5834_v58 = vcombine.low %v1251_v44, %v1255_v45  ;;  %v5841_v60 = vcombine.high %v1258_v52, %v1262_v53  ;;  %v5843_v61 = vcombine.high %v1259_v54, %v1263_v56  ;;  %v792_v44 = vld [vmem:[#allocation7 + $0xf0] sm:$0xff]  ;;  %v789_v45 = vld [vmem:[#allocation7 + $0xd8] sm:$0xff] }
 0x210   :  { %4022 = vmatpush1.bf16.msra.mxu0 %v5792_v4  ;;  %4194 = vmatpush1.bf16.msra.mxu1 %v5794_v6  ;;  %v1271_v4 = vld [vmem:[#allocation7 + $0xfe8] sm:$0xff]  ;;  %v5840_v6 = vcombine.low %v1258_v52, %v1262_v53  ;;  %v796_v53 = vld [vmem:[#allocation7 + $0x110] sm:$0xff] }
 0x211   :  { %4023 = vmatprep.subr.bf16.mxu0 %v5801_v7  ;;  %4195 = vmatprep.subr.bf16.mxu1 %v5803_v8  ;;  %v5842_v7 = vcombine.low %v1259_v54, %v1263_v56  ;;  %v5849_v8 = vcombine.high %v1266_v63, %v1270_v1  ;;  %v5851_v9 = vcombine.high %v1267_v2, %v1271_v4  ;;  %v800_v54 = vld [vmem:[#allocation7 + $0x130] sm:$0xff]  ;;  %v801_v56 = vld [vmem:[#allocation7 + $0x138] sm:$0xff] }
 0x214   :  { %4024 = vmatpush1.bf16.msra.mxu0 %v5800_v17  ;;  %4196 = vmatpush1.bf16.msra.mxu1 %v5802_v18  ;;  %v769_v17 = vld [vmem:[#allocation7 + $0x38] sm:$0xff]  ;;  %v5848_v18 = vcombine.low %v1266_v63, %v1270_v1  ;;  %v804_v63 = vld [vmem:[#allocation7 + $0x150] sm:$0xff] }
 0x215   :  { %4025 = vmatprep.subr.bf16.mxu0 %v5809_v20  ;;  %4197 = vmatprep.subr.bf16.mxu1 %v5811_v22  ;;  %v5850_v20 = vcombine.low %v1267_v2, %v1271_v4  ;;  %v5349_v22 = vcombine.high %v764_v10, %v768_v11  ;;  %v5351_v23 = vcombine.high %v765_v12, %v769_v17  ;;  %v808_v1 = vld [vmem:[#allocation7 + $0x170] sm:$0xff]  ;;  %v805_v2 = vld [vmem:[#allocation7 + $0x158] sm:$0xff] }
 0x216   :  { %v809_v4 = vld [vmem:[#allocation7 + $0x178] sm:$0xff] }
 0x218   :  { %4026 = vmatpush1.bf16.msra.mxu0 %v5808_v28  ;;  %4198 = vmatpush1.bf16.msra.mxu1 %v5810_v29  ;;  %v777_v28 = vld [vmem:[#allocation7 + $0x78] sm:$0xff]  ;;  %v5348_v29 = vcombine.low %v764_v10, %v768_v11  ;;  %v812_v10 = vld [vmem:[#allocation7 + $0x190] sm:$0xff] }
 0x219   :  { %4027 = vmatprep.subr.bf16.mxu0 %v5817_v30  ;;  %4199 = vmatprep.subr.bf16.mxu1 %v5819_v31  ;;  %v5350_v30 = vcombine.low %v765_v12, %v769_v17  ;;  %v5357_v31 = vcombine.high %v772_v24, %v776_v25  ;;  %v5359_v33 = vcombine.high %v773_v26, %v777_v28  ;;  %v816_v11 = vld [vmem:[#allocation7 + $0x1b0] sm:$0xff]  ;;  %v813_v12 = vld [vmem:[#allocation7 + $0x198] sm:$0xff] }
 0x21a   :  { %v817_v17 = vld [vmem:[#allocation7 + $0x1b8] sm:$0xff] }
 0x21c   :  { %4028 = vmatpush1.bf16.msra.mxu0 %v5816_v38  ;;  %4200 = vmatpush1.bf16.msra.mxu1 %v5818_v39  ;;  %v785_v38 = vld [vmem:[#allocation7 + $0xb8] sm:$0xff]  ;;  %v5356_v39 = vcombine.low %v772_v24, %v776_v25  ;;  %v820_v24 = vld [vmem:[#allocation7 + $0x1d0] sm:$0xff] }
 0x21d   :  { %4029 = vmatprep.subr.bf16.mxu0 %v5825_v5  ;;  %4201 = vmatprep.subr.bf16.mxu1 %v5827_v41  ;;  %v5358_v5 = vcombine.low %v773_v26, %v777_v28  ;;  %v5365_v41 = vcombine.high %v780_v34, %v784_v35  ;;  %v5367_v43 = vcombine.high %v781_v37, %v785_v38  ;;  %v824_v25 = vld [vmem:[#allocation7 + $0x1f0] sm:$0xff]  ;;  %v821_v26 = vld [vmem:[#allocation7 + $0x1d8] sm:$0xff] }
 0x21e   :  { %v825_v28 = vld [vmem:[#allocation7 + $0x1f8] sm:$0xff] }
 0x220   :  { %4030 = vmatpush1.bf16.msra.mxu0 %v5824_v46  ;;  %4202 = vmatpush1.bf16.msra.mxu1 %v5826_v48  ;;  %v793_v46 = vld [vmem:[#allocation7 + $0xf8] sm:$0xff]  ;;  %v5364_v48 = vcombine.low %v780_v34, %v784_v35  ;;  %v828_v34 = vld [vmem:[#allocation7 + $0x210] sm:$0xff] }
 0x221   :  { %4031 = vmatprep.subr.bf16.mxu0 %v5833_v49  ;;  %4203 = vmatprep.subr.bf16.mxu1 %v5835_v50  ;;  %v5366_v49 = vcombine.low %v781_v37, %v785_v38  ;;  %v5373_v50 = vcombine.high %v788_v0, %v792_v44  ;;  %v5375_v52 = vcombine.high %v789_v45, %v793_v46  ;;  %v832_v35 = vld [vmem:[#allocation7 + $0x230] sm:$0xff]  ;;  %v829_v37 = vld [vmem:[#allocation7 + $0x218] sm:$0xff] }
 0x222   :  { %v833_v38 = vld [vmem:[#allocation7 + $0x238] sm:$0xff] }
 0x224   :  { %4032 = vmatpush1.bf16.msra.mxu0 %v5832_v57  ;;  %4204 = vmatpush1.bf16.msra.mxu1 %v5834_v58  ;;  %v5372_v57 = vcombine.low %v788_v0, %v792_v44  ;;  %v5374_v58 = vcombine.low %v789_v45, %v793_v46  ;;  %v836_v0 = vld [vmem:[#allocation7 + $0x250] sm:$0xff]  ;;  %v837_v45 = vld [vmem:[#allocation7 + $0x258] sm:$0xff] }
 0x225   :  { %4033 = vmatprep.subr.bf16.mxu0 %v5841_v60  ;;  %4205 = vmatprep.subr.bf16.mxu1 %v5843_v61  ;;  %v5381_v60 = vcombine.high %v796_v53, %v800_v54  ;;  %v840_v44 = vld [vmem:[#allocation7 + $0x270] sm:$0xff]  ;;  %v841_v46 = vld [vmem:[#allocation7 + $0x278] sm:$0xff] }
 0x228   :  { %4034 = vmatpush1.bf16.msra.mxu0 %v5840_v6  ;;  %4206 = vmatpush1.bf16.msra.mxu1 %v5842_v7  ;;  %v5380_v6 = vcombine.low %v796_v53, %v800_v54  ;;  %v844_v53 = vld [vmem:[#allocation7 + $0x290] sm:$0xff] }
 0x229   :  { %4035 = vmatprep.subr.bf16.mxu0 %v5849_v8  ;;  %4207 = vmatprep.subr.bf16.mxu1 %v5851_v9  ;;  %v5389_v8 = vcombine.high %v804_v63, %v808_v1  ;;  %v5391_v9 = vcombine.high %v805_v2, %v809_v4  ;;  %v848_v54 = vld [vmem:[#allocation7 + $0x2b0] sm:$0xff] }
 0x22c   :  { %4036 = vmatpush1.bf16.msra.mxu0 %v5848_v18  ;;  %4208 = vmatpush1.bf16.msra.mxu1 %v5850_v20  ;;  %v5388_v18 = vcombine.low %v804_v63, %v808_v1  ;;  %v5390_v20 = vcombine.low %v805_v2, %v809_v4  ;;  %v852_v63 = vld [vmem:[#allocation7 + $0x2d0] sm:$0xff]  ;;  %v853_v2 = vld [vmem:[#allocation7 + $0x2d8] sm:$0xff] }
 0x22d   :  { %4220 = vmatprep.subr.bf16.mxu0 %v5349_v22  ;;  %4392 = vmatprep.subr.bf16.mxu1 %v5351_v23  ;;  %v5397_v22 = vcombine.high %v812_v10, %v816_v11  ;;  %v5399_v23 = vcombine.high %v813_v12, %v817_v17  ;;  %v856_v1 = vld [vmem:[#allocation7 + $0x2f0] sm:$0xff]  ;;  %v857_v4 = vld [vmem:[#allocation7 + $0x2f8] sm:$0xff] }
 0x22f   :  { %4038 = vmatmul.mubr.bf16.vlgmr.msra.gmra.mrb[8].mxu0 %v6494_v55  ;;  %4210 = vmatmul.mubr.bf16.vlgmr.msra.gmra.mrb[8].mxu1 %v6494_v55 }
 0x230   :  { %4221 = vmatpush1.bf16.msra.mxu0 %v5348_v29  ;;  %4252 = vmatprep.mubr.bf16.mxu0 %v6462_v42  ;;  %v5396_v29 = vcombine.low %v812_v10, %v816_v11  ;;  %v860_v10 = vld [vmem:[#allocation7 + $0x310] sm:$0xff] }
 0x231   :  { %4393 = vmatpush1.bf16.msra.mxu1 %v5350_v30  ;;  %4424 = vmatprep.mubr.bf16.mxu1 %v6462_v42  ;;  %v797_v42 = vld [vmem:[#allocation7 + $0x118] sm:$0xff]  ;;  %v5398_v30 = vcombine.low %v813_v12, %v817_v17  ;;  %v864_v11 = vld [vmem:[#allocation7 + $0x330] sm:$0xff] }
 0x232   :  { %4222 = vmatprep.subr.bf16.mxu0 %v5357_v31  ;;  %4394 = vmatprep.subr.bf16.mxu1 %v5359_v33  ;;  %v5383_v61 = vcombine.high %v797_v42, %v801_v56  ;;  %v5382_v7 = vcombine.low %v797_v42, %v801_v56  ;;  %v5405_v31 = vcombine.high %v820_v24, %v824_v25  ;;  %v845_v42 = vld [vmem:[#allocation7 + $0x298] sm:$0xff] }
 0x233   :  { %v5407_v33 = vcombine.high %v821_v26, %v825_v28  ;;  %v849_v56 = vld [vmem:[#allocation7 + $0x2b8] sm:$0xff] }
 0x234   :  { %4223 = vmatpush1.bf16.msra.mxu0 %v5356_v39  ;;  %v5404_v39 = vcombine.low %v820_v24, %v824_v25  ;;  %v861_v12 = vld [vmem:[#allocation7 + $0x318] sm:$0xff]  ;;  %v868_v24 = vld [vmem:[#allocation7 + $0x350] sm:$0xff] }
 0x235   :  { %4395 = vmatpush1.bf16.msra.mxu1 %v5358_v5  ;;  %4224 = vmatprep.subr.bf16.mxu0 %v5365_v41  ;;  %v5406_v5 = vcombine.low %v821_v26, %v825_v28  ;;  %v5413_v41 = vcombine.high %v828_v34, %v832_v35  ;;  %v865_v17 = vld [vmem:[#allocation7 + $0x338] sm:$0xff]  ;;  %v872_v25 = vld [vmem:[#allocation7 + $0x370] sm:$0xff] }
 0x236   :  { %4396 = vmatprep.subr.bf16.mxu1 %v5367_v43  ;;  %v5415_v43 = vcombine.high %v829_v37, %v833_v38  ;;  %v869_v26 = vld [vmem:[#allocation7 + $0x358] sm:$0xff] }
 0x237   :  { %v873_v28 = vld [vmem:[#allocation7 + $0x378] sm:$0xff] }
 0x238   :  { %4225 = vmatpush1.bf16.msra.mxu0 %v5364_v48  ;;  %v5412_v48 = vcombine.low %v828_v34, %v832_v35  ;;  %v876_v34 = vld [vmem:[#allocation7 + $0x390] sm:$0xff] }
 0x239   :  { %4397 = vmatpush1.bf16.msra.mxu1 %v5366_v49  ;;  %4226 = vmatprep.subr.bf16.mxu0 %v5373_v50  ;;  %v5414_v49 = vcombine.low %v829_v37, %v833_v38  ;;  %v5421_v50 = vcombine.high %v836_v0, %v840_v44  ;;  %v880_v35 = vld [vmem:[#allocation7 + $0x3b0] sm:$0xff]  ;;  %v877_v37 = vld [vmem:[#allocation7 + $0x398] sm:$0xff] }
 0x23a   :  { %4398 = vmatprep.subr.bf16.mxu1 %v5375_v52  ;;  %v5423_v52 = vcombine.high %v837_v45, %v841_v46  ;;  %v881_v38 = vld [vmem:[#allocation7 + $0x3b8] sm:$0xff] }
 0x23c   :  { %4227 = vmatpush1.bf16.msra.mxu0 %v5372_v57  ;;  %v5420_v57 = vcombine.low %v836_v0, %v840_v44  ;;  %v884_v0 = vld [vmem:[#allocation7 + $0x3d0] sm:$0xff] }
 0x23d   :  { %4399 = vmatpush1.bf16.msra.mxu1 %v5374_v58  ;;  %4228 = vmatprep.subr.bf16.mxu0 %v5381_v60  ;;  %v5422_v58 = vcombine.low %v837_v45, %v841_v46  ;;  %v5429_v60 = vcombine.high %v844_v53, %v848_v54  ;;  %v888_v44 = vld [vmem:[#allocation7 + $0x3f0] sm:$0xff]  ;;  %v885_v45 = vld [vmem:[#allocation7 + $0x3d8] sm:$0xff] }
 0x23e   :  { %4400 = vmatprep.subr.bf16.mxu1 %v5383_v61  ;;  %v5431_v61 = vcombine.high %v845_v42, %v849_v56  ;;  %v889_v46 = vld [vmem:[#allocation7 + $0x3f8] sm:$0xff] }
 0x240   :  { %4229 = vmatpush1.bf16.msra.mxu0 %v5380_v6  ;;  %v5428_v6 = vcombine.low %v844_v53, %v848_v54  ;;  %v892_v53 = vld [vmem:[#allocation7 + $0x410] sm:$0xff] }
 0x241   :  { %4401 = vmatpush1.bf16.msra.mxu1 %v5382_v7  ;;  %4230 = vmatprep.subr.bf16.mxu0 %v5389_v8  ;;  %v5430_v7 = vcombine.low %v845_v42, %v849_v56  ;;  %v5437_v8 = vcombine.high %v852_v63, %v856_v1  ;;  %v896_v54 = vld [vmem:[#allocation7 + $0x430] sm:$0xff]  ;;  %v893_v42 = vld [vmem:[#allocation7 + $0x418] sm:$0xff] }
 0x242   :  { %4402 = vmatprep.subr.bf16.mxu1 %v5391_v9  ;;  %v5439_v9 = vcombine.high %v853_v2, %v857_v4  ;;  %v897_v56 = vld [vmem:[#allocation7 + $0x438] sm:$0xff] }
 0x244   :  { %4231 = vmatpush1.bf16.msra.mxu0 %v5388_v18  ;;  %v5436_v18 = vcombine.low %v852_v63, %v856_v1  ;;  %v900_v63 = vld [vmem:[#allocation7 + $0x450] sm:$0xff] }
 0x245   :  { %4403 = vmatpush1.bf16.msra.mxu1 %v5390_v20  ;;  %4232 = vmatprep.subr.bf16.mxu0 %v5397_v22  ;;  %v5438_v20 = vcombine.low %v853_v2, %v857_v4  ;;  %v5445_v22 = vcombine.high %v860_v10, %v864_v11  ;;  %v904_v1 = vld [vmem:[#allocation7 + $0x470] sm:$0xff]  ;;  %v5476_v2 = vcombine.low %v892_v53, %v896_v54  ;;  %v901_v4 = vld [vmem:[#allocation7 + $0x458] sm:$0xff] }
 0x246   :  { %4404 = vmatprep.subr.bf16.mxu1 %v5399_v23  ;;  %v5447_v23 = vcombine.high %v861_v12, %v865_v17 }
 0x248   :  { %4233 = vmatpush1.bf16.msra.mxu0 %v5396_v29  ;;  %v5444_v29 = vcombine.low %v860_v10, %v864_v11  ;;  %v912_v10 = vld [vmem:[#allocation7 + $0x4b0] sm:$0xff] }
 0x249   :  { %4405 = vmatpush1.bf16.msra.mxu1 %v5398_v30  ;;  %4234 = vmatprep.subr.bf16.mxu0 %v5405_v31  ;;  %v5446_v30 = vcombine.low %v861_v12, %v865_v17  ;;  %v5453_v31 = vcombine.high %v868_v24, %v872_v25  ;;  %v909_v12 = vld [vmem:[#allocation7 + $0x498] sm:$0xff] }
 0x24a   :  { %4406 = vmatprep.subr.bf16.mxu1 %v5407_v33  ;;  %v5455_v33 = vcombine.high %v869_v26, %v873_v28  ;;  %v913_v17 = vld [vmem:[#allocation7 + $0x4b8] sm:$0xff] }
 0x24c   :  { %4235 = vmatpush1.bf16.msra.mxu0 %v5404_v39  ;;  %v5452_v39 = vcombine.low %v868_v24, %v872_v25  ;;  %v916_v24 = vld [vmem:[#allocation7 + $0x4d0] sm:$0xff] }
 0x24d   :  { %4407 = vmatpush1.bf16.msra.mxu1 %v5406_v5  ;;  %4236 = vmatprep.subr.bf16.mxu0 %v5413_v41  ;;  %v5454_v5 = vcombine.low %v869_v26, %v873_v28  ;;  %v5461_v41 = vcombine.high %v876_v34, %v880_v35  ;;  %v920_v25 = vld [vmem:[#allocation7 + $0x4f0] sm:$0xff]  ;;  %v917_v26 = vld [vmem:[#allocation7 + $0x4d8] sm:$0xff] }
 0x24e   :  { %4408 = vmatprep.subr.bf16.mxu1 %v5415_v43  ;;  %v5463_v43 = vcombine.high %v877_v37, %v881_v38  ;;  %v921_v28 = vld [vmem:[#allocation7 + $0x4f8] sm:$0xff] }
 0x250   :  { %4237 = vmatpush1.bf16.msra.mxu0 %v5412_v48  ;;  %v5460_v48 = vcombine.low %v876_v34, %v880_v35  ;;  %v928_v34 = vld [vmem:[#allocation7 + $0x530] sm:$0xff]  ;;  %v925_v35 = vld [vmem:[#allocation7 + $0x518] sm:$0xff] }
 0x251   :  { %4409 = vmatpush1.bf16.msra.mxu1 %v5414_v49  ;;  %4238 = vmatprep.subr.bf16.mxu0 %v5421_v50  ;;  %v5462_v49 = vcombine.low %v877_v37, %v881_v38  ;;  %v5469_v50 = vcombine.high %v884_v0, %v888_v44  ;;  %v929_v37 = vld [vmem:[#allocation7 + $0x538] sm:$0xff]  ;;  %v5502_v38 = vcombine.low %v917_v26, %v921_v28 }
 0x252   :  { %4410 = vmatprep.subr.bf16.mxu1 %v5423_v52  ;;  %v5471_v52 = vcombine.high %v885_v45, %v889_v46 }
 0x254   :  { %4239 = vmatpush1.bf16.msra.mxu0 %v5420_v57  ;;  %v5468_v57 = vcombine.low %v884_v0, %v888_v44  ;;  %v933_v0 = vld [vmem:[#allocation7 + $0x558] sm:$0xff] }
 0x255   :  { %4411 = vmatpush1.bf16.msra.mxu1 %v5422_v58  ;;  %4240 = vmatprep.subr.bf16.mxu0 %v5429_v60  ;;  %v5470_v58 = vcombine.low %v885_v45, %v889_v46  ;;  %v5477_v60 = vcombine.high %v892_v53, %v896_v54  ;;  %v937_v44 = vld [vmem:[#allocation7 + $0x578] sm:$0xff]  ;;  %v5510_v46 = vcombine.low %v925_v35, %v929_v37 }
 0x256   :  { %4412 = vmatprep.subr.bf16.mxu1 %v5431_v61  ;;  %v5479_v61 = vcombine.high %v893_v42, %v897_v56  ;;  %v941_v53 = vld [vmem:[#allocation7 + $0x598] sm:$0xff] }
 0x257   :  { %v945_v54 = vld [vmem:[#allocation7 + $0x5b8] sm:$0xff] }
 0x258   :  { %4241 = vmatpush1.bf16.msra.mxu0 %v5428_v6  ;;  %v905_v6 = vld [vmem:[#allocation7 + $0x478] sm:$0xff] }
 0x259   :  { %4413 = vmatpush1.bf16.msra.mxu1 %v5430_v7  ;;  %4242 = vmatprep.subr.bf16.mxu0 %v5437_v8  ;;  %v5478_v7 = vcombine.low %v893_v42, %v897_v56  ;;  %v5485_v8 = vcombine.high %v900_v63, %v904_v1  ;;  %v5487_v11 = vcombine.high %v901_v4, %v905_v6 }
 0x25a   :  { %4414 = vmatprep.subr.bf16.mxu1 %v5439_v9  ;;  %v908_v9 = vld [vmem:[#allocation7 + $0x490] sm:$0xff]  ;;  %v5518_v56 = vcombine.low %v933_v0, %v937_v44 }
 0x25c   :  { %4243 = vmatpush1.bf16.msra.mxu0 %v5436_v18  ;;  %v5484_v18 = vcombine.low %v900_v63, %v904_v1  ;;  %v949_v63 = vld [vmem:[#allocation7 + $0x5d8] sm:$0xff] }
 0x25d   :  { %4415 = vmatpush1.bf16.msra.mxu1 %v5438_v20  ;;  %4244 = vmatprep.subr.bf16.mxu0 %v5445_v22  ;;  %v5486_v20 = vcombine.low %v901_v4, %v905_v6  ;;  %v5493_v22 = vcombine.high %v908_v9, %v912_v10  ;;  %v953_v1 = vld [vmem:[#allocation7 + $0x5f8] sm:$0xff]  ;;  %v5526_v4 = vcombine.low %v941_v53, %v945_v54 }
 0x25e   :  { %4416 = vmatprep.subr.bf16.mxu1 %v5447_v23  ;;  %v5495_v23 = vcombine.high %v909_v12, %v913_v17 }
 0x260   :  { %4245 = vmatpush1.bf16.msra.mxu0 %v5444_v29  ;;  %v5492_v29 = vcombine.low %v908_v9, %v912_v10  ;;  %v960_v9 = vld [vmem:[#allocation7 + $0x630] sm:$0xff]  ;;  %v957_v10 = vld [vmem:[#allocation7 + $0x618] sm:$0xff] }
 0x261   :  { %4417 = vmatpush1.bf16.msra.mxu1 %v5446_v30  ;;  %4246 = vmatprep.subr.bf16.mxu0 %v5453_v31  ;;  %v5501_v30 = vcombine.high %v916_v24, %v920_v25  ;;  %v5503_v31 = vcombine.high %v917_v26, %v921_v28 }
 0x262   :  { %4418 = vmatprep.subr.bf16.mxu1 %v5455_v33  ;;  %v924_v33 = vld [vmem:[#allocation7 + $0x510] sm:$0xff] }
 0x263   :  { %v5508_v45 = vcombine.low %v924_v33, %v928_v34 }
 0x264   :  { %4247 = vmatpush1.bf16.msra.mxu0 %v5452_v39  ;;  %v5509_v39 = vcombine.high %v924_v33, %v928_v34  ;;  %v973_v33 = vld [vmem:[#allocation7 + $0x698] sm:$0xff] }
 0x265   :  { %4419 = vmatpush1.bf16.msra.mxu1 %v5454_v5  ;;  %4248 = vmatprep.subr.bf16.mxu0 %v5461_v41  ;;  %v5511_v5 = vcombine.high %v925_v35, %v929_v37  ;;  %v932_v41 = vld [vmem:[#allocation7 + $0x550] sm:$0xff]  ;;  %v977_v34 = vld [vmem:[#allocation7 + $0x6b8] sm:$0xff] }
 0x266   :  { %4420 = vmatprep.subr.bf16.mxu1 %v5463_v43  ;;  %v936_v43 = vld [vmem:[#allocation7 + $0x570] sm:$0xff] }
 0x267   :  { %v5516_v42 = vcombine.low %v932_v41, %v936_v43 }
 0x268   :  { %4249 = vmatpush1.bf16.msra.mxu0 %v5460_v48  ;;  %v5517_v48 = vcombine.high %v932_v41, %v936_v43  ;;  %v981_v41 = vld [vmem:[#allocation7 + $0x6d8] sm:$0xff] }
 0x269   :  { %4421 = vmatpush1.bf16.msra.mxu1 %v5462_v49  ;;  %4250 = vmatprep.subr.bf16.mxu0 %v5469_v50  ;;  %v5519_v49 = vcombine.high %v933_v0, %v937_v44  ;;  %v940_v50 = vld [vmem:[#allocation7 + $0x590] sm:$0xff]  ;;  %v985_v43 = vld [vmem:[#allocation7 + $0x6f8] sm:$0xff]  ;;  %v5558_v44 = vcombine.low %v973_v33, %v977_v34 }
 0x26a   :  { %4422 = vmatprep.subr.bf16.mxu1 %v5471_v52  ;;  %v944_v52 = vld [vmem:[#allocation7 + $0x5b0] sm:$0xff] }
 0x26c   :  { %4251 = vmatpush1.bf16.msra.mxu0 %v5468_v57  ;;  %v5525_v57 = vcombine.high %v940_v50, %v944_v52 }
 0x26d   :  { %4423 = vmatpush1.bf16.msra.mxu1 %v5470_v58  ;;  %4263 = vmatprep.subr.bf16.mxu0 %v5477_v60  ;;  %v5527_v58 = vcombine.high %v941_v53, %v945_v54  ;;  %v948_v60 = vld [vmem:[#allocation7 + $0x5d0] sm:$0xff]  ;;  %v5566_v54 = vcombine.low %v981_v41, %v985_v43 }
 0x26e   :  { %4435 = vmatprep.subr.bf16.mxu1 %v5479_v61  ;;  %v952_v61 = vld [vmem:[#allocation7 + $0x5f0] sm:$0xff] }
 0x26f   :  { %4253 = vmatmul.mubr.bf16.vlgmr.msra.gmra.mrb[12].mxu0 %v6460_v40  ;;  %v5533_v6 = vcombine.high %v948_v60, %v952_v61 }
 0x270   :  { %4425 = vmatmul.mubr.bf16.vlgmr.msra.gmra.mrb[12].mxu1 %v6460_v40  ;;  %4264 = vmatpush1.bf16.msra.mxu0 %v5476_v2  ;;  %v5494_v40 = vcombine.low %v909_v12, %v913_v17  ;;  %v5524_v2 = vcombine.low %v940_v50, %v944_v52  ;;  %v5532_v12 = vcombine.low %v948_v60, %v952_v61  ;;  %v989_v50 = vld [vmem:[#allocation7 + $0x718] sm:$0xff] }
 0x271   :  { %4295 = vmatprep.mubr.bf16.mxu0 %v6470_v3  ;;  %4436 = vmatpush1.bf16.msra.mxu1 %v5478_v7  ;;  %v5535_v7 = vcombine.high %v949_v63, %v953_v1  ;;  %v5534_v17 = vcombine.low %v949_v63, %v953_v1  ;;  %v993_v52 = vld [vmem:[#allocation7 + $0x738] sm:$0xff] }
 0x272   :  { %4467 = vmatprep.mubr.bf16.mxu1 %v6470_v3  ;;  %4265 = vmatprep.subr.bf16.mxu0 %v5485_v8  ;;  %v5500_v3 = vcombine.low %v916_v24, %v920_v25  ;;  %v956_v8 = vld [vmem:[#allocation7 + $0x610] sm:$0xff]  ;;  %v965_v24 = vld [vmem:[#allocation7 + $0x658] sm:$0xff]  ;;  %v5574_v1 = vcombine.low %v989_v50, %v993_v52 }
 0x273   :  { %4437 = vmatprep.subr.bf16.mxu1 %v5487_v11  ;;  %v961_v11 = vld [vmem:[#allocation7 + $0x638] sm:$0xff]  ;;  %v5540_v26 = vcombine.low %v956_v8, %v960_v9 }
 0x274   :  { %4266 = vmatpush1.bf16.msra.mxu0 %v5484_v18  ;;  %v5541_v18 = vcombine.high %v956_v8, %v960_v9  ;;  %v969_v25 = vld [vmem:[#allocation7 + $0x678] sm:$0xff]  ;;  %v5542_v28 = vcombine.low %v957_v10, %v961_v11 }
 0x275   :  { %4438 = vmatpush1.bf16.msra.mxu1 %v5486_v20  ;;  %4267 = vmatprep.subr.bf16.mxu0 %v5493_v22  ;;  %v5543_v20 = vcombine.high %v957_v10, %v961_v11  ;;  %v964_v22 = vld [vmem:[#allocation7 + $0x650] sm:$0xff]  ;;  %v5550_v37 = vcombine.low %v965_v24, %v969_v25  ;;  %v997_v60 = vld [vmem:[#allocation7 + $0x758] sm:$0xff] }
 0x276   :  { %4439 = vmatprep.subr.bf16.mxu1 %v5495_v23  ;;  %v968_v23 = vld [vmem:[#allocation7 + $0x670] sm:$0xff]  ;;  %v1001_v61 = vld [vmem:[#allocation7 + $0x778] sm:$0xff] }
 0x277   :  { %v5548_v35 = vcombine.low %v964_v22, %v968_v23  ;;  %v1005_v8 = vld [vmem:[#allocation7 + $0x798] sm:$0xff]  ;;  %v5582_v11 = vcombine.low %v997_v60, %v1001_v61 }
 0x278   :  { %4268 = vmatpush1.bf16.msra.mxu0 %v5492_v29  ;;  %v5549_v29 = vcombine.high %v964_v22, %v968_v23  ;;  %v1009_v9 = vld [vmem:[#allocation7 + $0x7b8] sm:$0xff] }
 0x279   :  { %4440 = vmatpush1.bf16.msra.mxu1 %v5494_v40  ;;  %4269 = vmatprep.subr.bf16.mxu0 %v5501_v30  ;;  %v5551_v40 = vcombine.high %v965_v24, %v969_v25  ;;  %v972_v30 = vld [vmem:[#allocation7 + $0x690] sm:$0xff]  ;;  %v1013_v22 = vld [vmem:[#allocation7 + $0x7d8] sm:$0xff]  ;;  %v5590_v25 = vcombine.low %v1005_v8, %v1009_v9 }
 0x27a   :  { %4441 = vmatprep.subr.bf16.mxu1 %v5503_v31  ;;  %v976_v31 = vld [vmem:[#allocation7 + $0x6b0] sm:$0xff]  ;;  %v1017_v23 = vld [vmem:[#allocation7 + $0x7f8] sm:$0xff] }
 0x27b   :  { %v5556_v0 = vcombine.low %v972_v30, %v976_v31 }
 0x27c   :  { %4270 = vmatpush1.bf16.msra.mxu0 %v5500_v3  ;;  %v5557_v3 = vcombine.high %v972_v30, %v976_v31  ;;  %v1021_v30 = vld [vmem:[#allocation7 + $0x818] sm:$0xff] }
 0x27d   :  { %4442 = vmatpush1.bf16.msra.mxu1 %v5502_v38  ;;  %4271 = vmatprep.subr.bf16.mxu0 %v5509_v39  ;;  %v5559_v38 = vcombine.high %v973_v33, %v977_v34  ;;  %v980_v39 = vld [vmem:[#allocation7 + $0x6d0] sm:$0xff]  ;;  %v1025_v31 = vld [vmem:[#allocation7 + $0x838] sm:$0xff]  ;;  %v5598_v34 = vcombine.low %v1013_v22, %v1017_v23 }
 0x27e   :  { %4443 = vmatprep.subr.bf16.mxu1 %v5511_v5  ;;  %v984_v5 = vld [vmem:[#allocation7 + $0x6f0] sm:$0xff] }
 0x27f   :  { %v5564_v53 = vcombine.low %v980_v39, %v984_v5 }
 0x280   :  { %4272 = vmatpush1.bf16.msra.mxu0 %v5508_v45  ;;  %v5565_v45 = vcombine.high %v980_v39, %v984_v5  ;;  %v1029_v5 = vld [vmem:[#allocation7 + $0x858] sm:$0xff] }
 0x281   :  { %4444 = vmatpush1.bf16.msra.mxu1 %v5510_v46  ;;  %4273 = vmatprep.subr.bf16.mxu0 %v5517_v48  ;;  %v5567_v46 = vcombine.high %v981_v41, %v985_v43  ;;  %v988_v48 = vld [vmem:[#allocation7 + $0x710] sm:$0xff]  ;;  %v1033_v41 = vld [vmem:[#allocation7 + $0x878] sm:$0xff]  ;;  %v5606_v43 = vcombine.low %v1021_v30, %v1025_v31 }
 0x282   :  { %4445 = vmatprep.subr.bf16.mxu1 %v5519_v49  ;;  %v992_v49 = vld [vmem:[#allocation7 + $0x730] sm:$0xff] }
 0x283   :  { %v5572_v63 = vcombine.low %v988_v48, %v992_v49 }
 0x284   :  { %4274 = vmatpush1.bf16.msra.mxu0 %v5516_v42  ;;  %v5573_v42 = vcombine.high %v988_v48, %v992_v49  ;;  %v1037_v48 = vld [vmem:[#allocation7 + $0x898] sm:$0xff] }
 0x285   :  { %4446 = vmatpush1.bf16.msra.mxu1 %v5518_v56  ;;  %4275 = vmatprep.subr.bf16.mxu0 %v5525_v57  ;;  %v5575_v56 = vcombine.high %v989_v50, %v993_v52  ;;  %v996_v57 = vld [vmem:[#allocation7 + $0x750] sm:$0xff]  ;;  %v1041_v49 = vld [vmem:[#allocation7 + $0x8b8] sm:$0xff]  ;;  %v5614_v52 = vcombine.low %v1029_v5, %v1033_v41 }
 0x286   :  { %4447 = vmatprep.subr.bf16.mxu1 %v5527_v58  ;;  %v1000_v58 = vld [vmem:[#allocation7 + $0x770] sm:$0xff] }
 0x287   :  { %v5580_v10 = vcombine.low %v996_v57, %v1000_v58 }
 0x288   :  { %4276 = vmatpush1.bf16.msra.mxu0 %v5524_v2  ;;  %v5581_v2 = vcombine.high %v996_v57, %v1000_v58  ;;  %v1045_v57 = vld [vmem:[#allocation7 + $0x8d8] sm:$0xff] }
 0x289   :  { %4448 = vmatpush1.bf16.msra.mxu1 %v5526_v4  ;;  %4277 = vmatprep.subr.bf16.mxu0 %v5533_v6  ;;  %v5583_v4 = vcombine.high %v997_v60, %v1001_v61  ;;  %v1004_v6 = vld [vmem:[#allocation7 + $0x790] sm:$0xff]  ;;  %v1049_v58 = vld [vmem:[#allocation7 + $0x8f8] sm:$0xff] }
 0x28a   :  { %4449 = vmatprep.subr.bf16.mxu1 %v5535_v7  ;;  %v1008_v7 = vld [vmem:[#allocation7 + $0x7b0] sm:$0xff] }
 0x28b   :  { %v5588_v24 = vcombine.low %v1004_v6, %v1008_v7 }
 0x28c   :  { %4278 = vmatpush1.bf16.msra.mxu0 %v5532_v12  ;;  %v5589_v12 = vcombine.high %v1004_v6, %v1008_v7  ;;  %v1057_v6 = vld [vmem:[#allocation7 + $0x938] sm:$0xff]  ;;  %v5630_v7 = vcombine.low %v1045_v57, %v1049_v58 }
 0x28d   :  { %4450 = vmatpush1.bf16.msra.mxu1 %v5534_v17  ;;  %4279 = vmatprep.subr.bf16.mxu0 %v5541_v18  ;;  %v5591_v17 = vcombine.high %v1005_v8, %v1009_v9  ;;  %v1012_v18 = vld [vmem:[#allocation7 + $0x7d0] sm:$0xff] }
 0x28e   :  { %4451 = vmatprep.subr.bf16.mxu1 %v5543_v20  ;;  %v1016_v20 = vld [vmem:[#allocation7 + $0x7f0] sm:$0xff] }
 0x28f   :  { %v5596_v33 = vcombine.low %v1012_v18, %v1016_v20 }
 0x290   :  { %4280 = vmatpush1.bf16.msra.mxu0 %v5540_v26  ;;  %v5597_v26 = vcombine.high %v1012_v18, %v1016_v20 }
 0x291   :  { %4452 = vmatpush1.bf16.msra.mxu1 %v5542_v28  ;;  %4281 = vmatprep.subr.bf16.mxu0 %v5549_v29  ;;  %v5599_v28 = vcombine.high %v1013_v22, %v1017_v23  ;;  %v1020_v29 = vld [vmem:[#allocation7 + $0x810] sm:$0xff] }
 0x292   :  { %4453 = vmatprep.subr.bf16.mxu1 %v5551_v40  ;;  %v1024_v40 = vld [vmem:[#allocation7 + $0x830] sm:$0xff] }
 0x293   :  { %v5604_v39 = vcombine.low %v1020_v29, %v1024_v40 }
 0x294   :  { %4282 = vmatpush1.bf16.msra.mxu0 %v5548_v35  ;;  %v5605_v35 = vcombine.high %v1020_v29, %v1024_v40 }
 0x295   :  { %4454 = vmatpush1.bf16.msra.mxu1 %v5550_v37  ;;  %4283 = vmatprep.subr.bf16.mxu0 %v5557_v3  ;;  %v5607_v37 = vcombine.high %v1021_v30, %v1025_v31  ;;  %v1028_v3 = vld [vmem:[#allocation7 + $0x850] sm:$0xff] }
 0x296   :  { %4455 = vmatprep.subr.bf16.mxu1 %v5559_v38  ;;  %v1032_v38 = vld [vmem:[#allocation7 + $0x870] sm:$0xff] }
 0x297   :  { %v5612_v50 = vcombine.low %v1028_v3, %v1032_v38 }
 0x298   :  { %4284 = vmatpush1.bf16.msra.mxu0 %v5556_v0  ;;  %v5613_v0 = vcombine.high %v1028_v3, %v1032_v38 }
 0x299   :  { %4456 = vmatpush1.bf16.msra.mxu1 %v5558_v44  ;;  %4285 = vmatprep.subr.bf16.mxu0 %v5565_v45  ;;  %v1036_v44 = vld [vmem:[#allocation7 + $0x890] sm:$0xff] }
 0x29a   :  { %4457 = vmatprep.subr.bf16.mxu1 %v5567_v46  ;;  %v1040_v45 = vld [vmem:[#allocation7 + $0x8b0] sm:$0xff]  ;;  %v5615_v46 = vcombine.high %v1029_v5, %v1033_v41 }
 0x29b   :  { %v5620_v60 = vcombine.low %v1036_v44, %v1040_v45  ;;  %v1084_v41 = vld [vmem:[#allocation7 + $0xa10] sm:$0xff] }
 0x29c   :  { %4286 = vmatpush1.bf16.msra.mxu0 %v5564_v53  ;;  %v5621_v53 = vcombine.high %v1036_v44, %v1040_v45  ;;  %v1089_v44 = vld [vmem:[#allocation7 + $0xa38] sm:$0xff] }
 0x29d   :  { %4458 = vmatpush1.bf16.msra.mxu1 %v5566_v54  ;;  %4287 = vmatprep.subr.bf16.mxu0 %v5573_v42  ;;  %v5623_v54 = vcombine.high %v1037_v48, %v1041_v49  ;;  %v1044_v42 = vld [vmem:[#allocation7 + $0x8d0] sm:$0xff] }
 0x29e   :  { %4459 = vmatprep.subr.bf16.mxu1 %v5575_v56  ;;  %v1048_v56 = vld [vmem:[#allocation7 + $0x8f0] sm:$0xff] }
 0x29f   :  { %v5629_v61 = vcombine.high %v1044_v42, %v1048_v56 }
 0x2a0   :  { %4288 = vmatpush1.bf16.msra.mxu0 %v5572_v63  ;;  %v5631_v63 = vcombine.high %v1045_v57, %v1049_v58 }
 0x2a1   :  { %4460 = vmatpush1.bf16.msra.mxu1 %v5574_v1  ;;  %4289 = vmatprep.subr.bf16.mxu0 %v5581_v2  ;;  %v1052_v1 = vld [vmem:[#allocation7 + $0x910] sm:$0xff] }
 0x2a2   :  { %4461 = vmatprep.subr.bf16.mxu1 %v5583_v4  ;;  %v1056_v2 = vld [vmem:[#allocation7 + $0x930] sm:$0xff]  ;;  %v1053_v4 = vld [vmem:[#allocation7 + $0x918] sm:$0xff] }
 0x2a3   :  { %v5637_v8 = vcombine.high %v1052_v1, %v1056_v2  ;;  %v5639_v9 = vcombine.high %v1053_v4, %v1057_v6  ;;  %v5636_v18 = vcombine.low %v1052_v1, %v1056_v2  ;;  %v5638_v20 = vcombine.low %v1053_v4, %v1057_v6 }
 0x2a4   :  { %4290 = vmatpush1.bf16.msra.mxu0 %v5580_v10  ;;  %v1060_v10 = vld [vmem:[#allocation7 + $0x950] sm:$0xff] }
 0x2a5   :  { %4462 = vmatpush1.bf16.msra.mxu1 %v5582_v11  ;;  %4291 = vmatprep.subr.bf16.mxu0 %v5589_v12  ;;  %v1064_v11 = vld [vmem:[#allocation7 + $0x970] sm:$0xff]  ;;  %v1061_v12 = vld [vmem:[#allocation7 + $0x958] sm:$0xff] }
 0x2a6   :  { %4463 = vmatprep.subr.bf16.mxu1 %v5591_v17  ;;  %v1065_v17 = vld [vmem:[#allocation7 + $0x978] sm:$0xff]  ;;  %v5645_v22 = vcombine.high %v1060_v10, %v1064_v11  ;;  %v5644_v29 = vcombine.low %v1060_v10, %v1064_v11 }
 0x2a7   :  { %v5647_v23 = vcombine.high %v1061_v12, %v1065_v17  ;;  %v5646_v40 = vcombine.low %v1061_v12, %v1065_v17 }
 0x2a8   :  { %4292 = vmatpush1.bf16.msra.mxu0 %v5588_v24  ;;  %v1068_v24 = vld [vmem:[#allocation7 + $0x990] sm:$0xff] }
 0x2a9   :  { %4464 = vmatpush1.bf16.msra.mxu1 %v5590_v25  ;;  %4293 = vmatprep.subr.bf16.mxu0 %v5597_v26  ;;  %v1072_v25 = vld [vmem:[#allocation7 + $0x9b0] sm:$0xff]  ;;  %v1069_v26 = vld [vmem:[#allocation7 + $0x998] sm:$0xff] }
 0x2aa   :  { %4465 = vmatprep.subr.bf16.mxu1 %v5599_v28  ;;  %v1073_v28 = vld [vmem:[#allocation7 + $0x9b8] sm:$0xff]  ;;  %v5653_v30 = vcombine.high %v1068_v24, %v1072_v25  ;;  %v5652_v3 = vcombine.low %v1068_v24, %v1072_v25 }
 0x2ab   :  { %v5655_v31 = vcombine.high %v1069_v26, %v1073_v28  ;;  %v5654_v38 = vcombine.low %v1069_v26, %v1073_v28 }
 0x2ac   :  { %4294 = vmatpush1.bf16.msra.mxu0 %v5596_v33  ;;  %v1076_v33 = vld [vmem:[#allocation7 + $0x9d0] sm:$0xff] }
 0x2ad   :  { %4466 = vmatpush1.bf16.msra.mxu1 %v5598_v34  ;;  %4306 = vmatprep.subr.bf16.mxu0 %v5605_v35  ;;  %v1080_v34 = vld [vmem:[#allocation7 + $0x9f0] sm:$0xff]  ;;  %v1077_v35 = vld [vmem:[#allocation7 + $0x9d8] sm:$0xff] }
 0x2ae   :  { %4478 = vmatprep.subr.bf16.mxu1 %v5607_v37  ;;  %v1081_v37 = vld [vmem:[#allocation7 + $0x9f8] sm:$0xff]  ;;  %v5660_v45 = vcombine.low %v1076_v33, %v1080_v34 }
 0x2af   :  { %4296 = vmatmul.mubr.bf16.vlgmr.msra.gmra.mrb[12].mxu0 %v6468_v62  ;;  %v5663_v5 = vcombine.high %v1077_v35, %v1081_v37 }
 0x2b0   :  { %4468 = vmatmul.mubr.bf16.vlgmr.msra.gmra.mrb[12].mxu1 %v6468_v62  ;;  %4307 = vmatpush1.bf16.msra.mxu0 %v5604_v39  ;;  %v5622_v62 = vcombine.low %v1037_v48, %v1041_v49  ;;  %v5661_v39 = vcombine.high %v1076_v33, %v1080_v34 }
 0x2b1   :  { %4338 = vmatprep.mubr.bf16.mxu0 %v6492_v15  ;;  %4479 = vmatpush1.bf16.msra.mxu1 %v5606_v43  ;;  %v1088_v43 = vld [vmem:[#allocation7 + $0xa30] sm:$0xff] }
 0x2b2   :  { %4510 = vmatprep.mubr.bf16.mxu1 %v6492_v15  ;;  %4308 = vmatprep.subr.bf16.mxu0 %v5613_v0  ;;  %v5628_v15 = vcombine.low %v1044_v42, %v1048_v56  ;;  %v1085_v0 = vld [vmem:[#allocation7 + $0xa18] sm:$0xff]  ;;  %v5669_v48 = vcombine.high %v1084_v41, %v1088_v43  ;;  %v5668_v42 = vcombine.low %v1084_v41, %v1088_v43 }
 0x2b3   :  { %4480 = vmatprep.subr.bf16.mxu1 %v5615_v46  ;;  %v5662_v46 = vcombine.low %v1077_v35, %v1081_v37  ;;  %v5671_v49 = vcombine.high %v1085_v0, %v1089_v44  ;;  %v5670_v56 = vcombine.low %v1085_v0, %v1089_v44 }
 0x2b4   :  { %4309 = vmatpush1.bf16.msra.mxu0 %v5612_v50  ;;  %v1092_v50 = vld [vmem:[#allocation7 + $0xa50] sm:$0xff] }
 0x2b5   :  { %4481 = vmatpush1.bf16.msra.mxu1 %v5614_v52  ;;  %4310 = vmatprep.subr.bf16.mxu0 %v5621_v53  ;;  %v1096_v52 = vld [vmem:[#allocation7 + $0xa70] sm:$0xff]  ;;  %v1093_v53 = vld [vmem:[#allocation7 + $0xa58] sm:$0xff] }
 0x2b6   :  { %4482 = vmatprep.subr.bf16.mxu1 %v5623_v54  ;;  %v1097_v54 = vld [vmem:[#allocation7 + $0xa78] sm:$0xff]  ;;  %v5677_v57 = vcombine.high %v1092_v50, %v1096_v52  ;;  %v5676_v1 = vcombine.low %v1092_v50, %v1096_v52 }
 0x2b7   :  { %v5679_v58 = vcombine.high %v1093_v53, %v1097_v54  ;;  %v5678_v2 = vcombine.low %v1093_v53, %v1097_v54 }
 0x2b8   :  { %4311 = vmatpush1.bf16.msra.mxu0 %v5620_v60  ;;  %v1100_v60 = vld [vmem:[#allocation7 + $0xa90] sm:$0xff] }
 0x2b9   :  { %4483 = vmatpush1.bf16.msra.mxu1 %v5622_v62  ;;  %4312 = vmatprep.subr.bf16.mxu0 %v5629_v61  ;;  %v1104_v62 = vld [vmem:[#allocation7 + $0xab0] sm:$0xff]  ;;  %v1101_v61 = vld [vmem:[#allocation7 + $0xa98] sm:$0xff] }
 0x2ba   :  { %4484 = vmatprep.subr.bf16.mxu1 %v5631_v63  ;;  %v1105_v63 = vld [vmem:[#allocation7 + $0xab8] sm:$0xff]  ;;  %v5685_v4 = vcombine.high %v1100_v60, %v1104_v62  ;;  %v5684_v10 = vcombine.low %v1100_v60, %v1104_v62 }
 0x2bb   :  { %v5687_v6 = vcombine.high %v1101_v61, %v1105_v63  ;;  %v5686_v11 = vcombine.low %v1101_v61, %v1105_v63 }
 0x2bc   :  { %4313 = vmatpush1.bf16.msra.mxu0 %v5628_v15  ;;  %v1108_v15 = vld [vmem:[#allocation7 + $0xad0] sm:$0xff] }
 0x2bd   :  { %4485 = vmatpush1.bf16.msra.mxu1 %v5630_v7  ;;  %4314 = vmatprep.subr.bf16.mxu0 %v5637_v8  ;;  %v1112_v7 = vld [vmem:[#allocation7 + $0xaf0] sm:$0xff]  ;;  %v1109_v8 = vld [vmem:[#allocation7 + $0xad8] sm:$0xff] }
 0x2be   :  { %4486 = vmatprep.subr.bf16.mxu1 %v5639_v9  ;;  %v1113_v9 = vld [vmem:[#allocation7 + $0xaf8] sm:$0xff]  ;;  %v5693_v12 = vcombine.high %v1108_v15, %v1112_v7  ;;  %v5692_v24 = vcombine.low %v1108_v15, %v1112_v7 }
 0x2bf   :  { %v5695_v17 = vcombine.high %v1109_v8, %v1113_v9  ;;  %v5694_v25 = vcombine.low %v1109_v8, %v1113_v9  ;;  %v1161_v15 = vld [vmem:[#allocation7 + $0xc78] sm:$0xff]  ;;  %v1164_v9 = vld [vmem:[#allocation7 + $0xc90] sm:$0xff] }
 0x2c0   :  { %4315 = vmatpush1.bf16.msra.mxu0 %v5636_v18  ;;  %v1116_v18 = vld [vmem:[#allocation7 + $0xb10] sm:$0xff] }
 0x2c1   :  { %4487 = vmatpush1.bf16.msra.mxu1 %v5638_v20  ;;  %4316 = vmatprep.subr.bf16.mxu0 %v5645_v22  ;;  %v1120_v20 = vld [vmem:[#allocation7 + $0xb30] sm:$0xff]  ;;  %v1117_v22 = vld [vmem:[#allocation7 + $0xb18] sm:$0xff] }
 0x2c2   :  { %4488 = vmatprep.subr.bf16.mxu1 %v5647_v23  ;;  %v1121_v23 = vld [vmem:[#allocation7 + $0xb38] sm:$0xff]  ;;  %v5701_v26 = vcombine.high %v1116_v18, %v1120_v20  ;;  %v5700_v33 = vcombine.low %v1116_v18, %v1120_v20 }
 0x2c3   :  { %v5703_v28 = vcombine.high %v1117_v22, %v1121_v23  ;;  %v5702_v34 = vcombine.low %v1117_v22, %v1121_v23 }
 0x2c4   :  { %4317 = vmatpush1.bf16.msra.mxu0 %v5644_v29  ;;  %v1124_v29 = vld [vmem:[#allocation7 + $0xb50] sm:$0xff] }
 0x2c5   :  { %4489 = vmatpush1.bf16.msra.mxu1 %v5646_v40  ;;  %4318 = vmatprep.subr.bf16.mxu0 %v5653_v30  ;;  %v1128_v40 = vld [vmem:[#allocation7 + $0xb70] sm:$0xff]  ;;  %v1125_v30 = vld [vmem:[#allocation7 + $0xb58] sm:$0xff] }
 0x2c6   :  { %4490 = vmatprep.subr.bf16.mxu1 %v5655_v31  ;;  %v1129_v31 = vld [vmem:[#allocation7 + $0xb78] sm:$0xff]  ;;  %v5709_v35 = vcombine.high %v1124_v29, %v1128_v40  ;;  %v5708_v41 = vcombine.low %v1124_v29, %v1128_v40 }
 0x2c7   :  { %v5711_v37 = vcombine.high %v1125_v30, %v1129_v31  ;;  %v5710_v43 = vcombine.low %v1125_v30, %v1129_v31  ;;  %v1180_v31 = vld [vmem:[#allocation7 + $0xd10] sm:$0xff] }
 0x2c8   :  { %4319 = vmatpush1.bf16.msra.mxu0 %v5652_v3  ;;  %v1132_v3 = vld [vmem:[#allocation7 + $0xb90] sm:$0xff] }
 0x2c9   :  { %4491 = vmatpush1.bf16.msra.mxu1 %v5654_v38  ;;  %4320 = vmatprep.subr.bf16.mxu0 %v5661_v39  ;;  %v1136_v38 = vld [vmem:[#allocation7 + $0xbb0] sm:$0xff]  ;;  %v1133_v39 = vld [vmem:[#allocation7 + $0xb98] sm:$0xff] }
 0x2ca   :  { %4492 = vmatprep.subr.bf16.mxu1 %v5663_v5  ;;  %v1137_v5 = vld [vmem:[#allocation7 + $0xbb8] sm:$0xff]  ;;  %v5717_v0 = vcombine.high %v1132_v3, %v1136_v38  ;;  %v5716_v50 = vcombine.low %v1132_v3, %v1136_v38 }
 0x2cb   :  { %v5719_v44 = vcombine.high %v1133_v39, %v1137_v5  ;;  %v5718_v52 = vcombine.low %v1133_v39, %v1137_v5  ;;  %v1188_v39 = vld [vmem:[#allocation7 + $0xd50] sm:$0xff] }
 0x2cc   :  { %4321 = vmatpush1.bf16.msra.mxu0 %v5660_v45  ;;  %v1140_v45 = vld [vmem:[#allocation7 + $0xbd0] sm:$0xff] }
 0x2cd   :  { %4493 = vmatpush1.bf16.msra.mxu1 %v5662_v46  ;;  %4322 = vmatprep.subr.bf16.mxu0 %v5669_v48  ;;  %v1144_v46 = vld [vmem:[#allocation7 + $0xbf0] sm:$0xff]  ;;  %v1141_v48 = vld [vmem:[#allocation7 + $0xbd8] sm:$0xff] }
 0x2ce   :  { %4494 = vmatprep.subr.bf16.mxu1 %v5671_v49  ;;  %v1145_v49 = vld [vmem:[#allocation7 + $0xbf8] sm:$0xff]  ;;  %v5725_v53 = vcombine.high %v1140_v45, %v1144_v46  ;;  %v5724_v60 = vcombine.low %v1140_v45, %v1144_v46  ;;  %v1192_v5 = vld [vmem:[#allocation7 + $0xd70] sm:$0xff] }
 0x2cf   :  { %v5727_v54 = vcombine.high %v1141_v48, %v1145_v49  ;;  %v5726_v62 = vcombine.low %v1141_v48, %v1145_v49  ;;  %v5773_v46 = vcombine.high %v1188_v39, %v1192_v5  ;;  %v1196_v49 = vld [vmem:[#allocation7 + $0xd90] sm:$0xff] }
 0x2d0   :  { %4323 = vmatpush1.bf16.msra.mxu0 %v5668_v42  ;;  %v1148_v42 = vld [vmem:[#allocation7 + $0xc10] sm:$0xff] }
 0x2d1   :  { %4495 = vmatpush1.bf16.msra.mxu1 %v5670_v56  ;;  %4324 = vmatprep.subr.bf16.mxu0 %v5677_v57  ;;  %v1152_v56 = vld [vmem:[#allocation7 + $0xc30] sm:$0xff]  ;;  %v1149_v57 = vld [vmem:[#allocation7 + $0xc18] sm:$0xff] }
 0x2d2   :  { %4496 = vmatprep.subr.bf16.mxu1 %v5679_v58  ;;  %v1153_v58 = vld [vmem:[#allocation7 + $0xc38] sm:$0xff]  ;;  %v5733_v61 = vcombine.high %v1148_v42, %v1152_v56 }
 0x2d3   :  { %v5735_v63 = vcombine.high %v1149_v57, %v1153_v58  ;;  %v5734_v7 = vcombine.low %v1149_v57, %v1153_v58  ;;  %v5772_v58 = vcombine.low %v1188_v39, %v1192_v5 }
 0x2d4   :  { %4325 = vmatpush1.bf16.msra.mxu0 %v5676_v1  ;;  %v1156_v1 = vld [vmem:[#allocation7 + $0xc50] sm:$0xff] }
 0x2d5   :  { %4497 = vmatpush1.bf16.msra.mxu1 %v5678_v2  ;;  %4326 = vmatprep.subr.bf16.mxu0 %v5685_v4  ;;  %v1160_v2 = vld [vmem:[#allocation7 + $0xc70] sm:$0xff]  ;;  %v5732_v4 = vcombine.low %v1148_v42, %v1152_v56  ;;  %v1201_v42 = vld [vmem:[#allocation7 + $0xdb8] sm:$0xff] }
 0x2d6   :  { %4498 = vmatprep.subr.bf16.mxu1 %v5687_v6  ;;  %v1157_v6 = vld [vmem:[#allocation7 + $0xc58] sm:$0xff]  ;;  %v5741_v8 = vcombine.high %v1156_v1, %v1160_v2  ;;  %v5740_v18 = vcombine.low %v1156_v1, %v1160_v2 }
 0x2d7   :  { %v5742_v20 = vcombine.low %v1157_v6, %v1161_v15 }
 0x2d8   :  { %4327 = vmatpush1.bf16.msra.mxu0 %v5684_v10  ;;  %v1168_v10 = vld [vmem:[#allocation7 + $0xcb0] sm:$0xff] }
 0x2d9   :  { %4499 = vmatpush1.bf16.msra.mxu1 %v5686_v11  ;;  %4328 = vmatprep.subr.bf16.mxu0 %v5693_v12  ;;  %v5743_v11 = vcombine.high %v1157_v6, %v1161_v15  ;;  %v1165_v12 = vld [vmem:[#allocation7 + $0xc98] sm:$0xff]  ;;  %v5749_v22 = vcombine.high %v1164_v9, %v1168_v10  ;;  %v5748_v29 = vcombine.low %v1164_v9, %v1168_v10 }
 0x2da   :  { %4500 = vmatprep.subr.bf16.mxu1 %v5695_v17  ;;  %v1169_v17 = vld [vmem:[#allocation7 + $0xcb8] sm:$0xff] }
 0x2db   :  { %v5751_v23 = vcombine.high %v1165_v12, %v1169_v17 }
 0x2dc   :  { %4329 = vmatpush1.bf16.msra.mxu0 %v5692_v24  ;;  %v1172_v24 = vld [vmem:[#allocation7 + $0xcd0] sm:$0xff] }
 0x2dd   :  { %4501 = vmatpush1.bf16.msra.mxu1 %v5694_v25  ;;  %4330 = vmatprep.subr.bf16.mxu0 %v5701_v26  ;;  %v1176_v25 = vld [vmem:[#allocation7 + $0xcf0] sm:$0xff]  ;;  %v1173_v26 = vld [vmem:[#allocation7 + $0xcd8] sm:$0xff] }
 0x2de   :  { %4502 = vmatprep.subr.bf16.mxu1 %v5703_v28  ;;  %v1177_v28 = vld [vmem:[#allocation7 + $0xcf8] sm:$0xff]  ;;  %v5757_v40 = vcombine.high %v1172_v24, %v1176_v25 }
 0x2df   :  { %v5759_v30 = vcombine.high %v1173_v26, %v1177_v28 }
 0x2e0   :  { %4331 = vmatpush1.bf16.msra.mxu0 %v5700_v33  ;;  %v1184_v33 = vld [vmem:[#allocation7 + $0xd30] sm:$0xff] }
 0x2e1   :  { %4503 = vmatpush1.bf16.msra.mxu1 %v5702_v34  ;;  %4332 = vmatprep.subr.bf16.mxu0 %v5709_v35  ;;  %v1181_v34 = vld [vmem:[#allocation7 + $0xd18] sm:$0xff]  ;;  %v5765_v3 = vcombine.high %v1180_v31, %v1184_v33 }
 0x2e2   :  { %4504 = vmatprep.subr.bf16.mxu1 %v5711_v37  ;;  %v1185_v35 = vld [vmem:[#allocation7 + $0xd38] sm:$0xff]  ;;  %v5758_v37 = vcombine.low %v1173_v26, %v1177_v28 }
 0x2e3   :  { %v5767_v38 = vcombine.high %v1181_v34, %v1185_v35  ;;  %v5766_v45 = vcombine.low %v1181_v34, %v1185_v35  ;;  %v1213_v35 = vld [vmem:[#allocation7 + $0xe18] sm:$0xff] }
 0x2e4   :  { %4333 = vmatpush1.bf16.msra.mxu0 %v5708_v41  ;;  %v1189_v41 = vld [vmem:[#allocation7 + $0xd58] sm:$0xff] }
 0x2e5   :  { %4505 = vmatpush1.bf16.msra.mxu1 %v5710_v43  ;;  %4334 = vmatprep.subr.bf16.mxu0 %v5717_v0  ;;  %v1193_v43 = vld [vmem:[#allocation7 + $0xd78] sm:$0xff]  ;;  %v5764_v0 = vcombine.low %v1180_v31, %v1184_v33 }
 0x2e6   :  { %4506 = vmatprep.subr.bf16.mxu1 %v5719_v44  ;;  %v6522_v44 = vld [vmem:[#allocation8] sm:$0xff]  ;;  %v5775_v48 = vcombine.high %v1189_v41, %v1193_v43 }
 0x2e7   :  { %v1283_v56 = vrot.slane %v6522_v44, %v181_v16  ;;  %v1291_v57 = vrot.slane %v6522_v44, %v189_v21 }
 0x2e8   :  { %4335 = vmatpush1.bf16.msra.mxu0 %v5716_v50  ;;  %v1200_v50 = vld [vmem:[#allocation7 + $0xdb0] sm:$0xff] }
 0x2e9   :  { %4507 = vmatpush1.bf16.msra.mxu1 %v5718_v52  ;;  %4336 = vmatprep.subr.bf16.mxu0 %v5725_v53  ;;  %v1279_v52 = vrot.slane %v6522_v44, %v177_v14  ;;  %v1287_v53 = vrot.slane %v6522_v44, %v185_v19  ;;  %v5781_v14 = vcombine.high %v1196_v49, %v1200_v50 }
 0x2ea   :  { %4508 = vmatprep.subr.bf16.mxu1 %v5727_v54  ;;  %v1197_v54 = vld [vmem:[#allocation7 + $0xd98] sm:$0xff]  ;;  %v5780_v16 = vcombine.low %v1196_v49, %v1200_v50  ;;  %v1224_v49 = vld [vmem:[#allocation7 + $0xe70] sm:$0xff] }
 0x2eb   :  { %v5783_v1 = vcombine.high %v1197_v54, %v1201_v42  ;;  %v1221_v50 = vld [vmem:[#allocation7 + $0xe58] sm:$0xff] }
 0x2ec   :  { %4337 = vmatpush1.bf16.msra.mxu0 %v5724_v60  ;;  %v5774_v60 = vcombine.low %v1189_v41, %v1193_v43 }
 0x2ed   :  { %4509 = vmatpush1.bf16.msra.mxu1 %v5726_v62  ;;  %4349 = vmatprep.subr.bf16.mxu0 %v5733_v61  ;;  %v1204_v62 = vld [vmem:[#allocation7 + $0xdd0] sm:$0xff] }
 0x2ee   :  { %4521 = vmatprep.subr.bf16.mxu1 %v5735_v63  ;;  %v1208_v61 = vld [vmem:[#allocation7 + $0xdf0] sm:$0xff] }
 0x2ef   :  { %4339 = vmatmul.mubr.bf16.vlgmr.msra.gmra.mrb[12].mxu0 %v6490_v27 }
 0x2f0   :  { %4511 = vmatmul.mubr.bf16.vlgmr.msra.gmra.mrb[12].mxu1 %v6490_v27  ;;  %4350 = vmatpush1.bf16.msra.mxu0 %v5732_v4  ;;  %v5750_v27 = vcombine.low %v1165_v12, %v1169_v17  ;;  %v5782_v12 = vcombine.low %v1197_v54, %v1201_v42  ;;  %v5788_v17 = vcombine.low %v1204_v62, %v1208_v61 }
 0x2f1   :  { %4381 = vmatprep.mubr.bf16.mxu0 %v6496_v59  ;;  %4522 = vmatpush1.bf16.msra.mxu1 %v5734_v7  ;;  %v1205_v7 = vld [vmem:[#allocation7 + $0xdd8] sm:$0xff] }
 0x2f2   :  { %4553 = vmatprep.mubr.bf16.mxu1 %v6496_v59  ;;  %4351 = vmatprep.subr.bf16.mxu0 %v5741_v8  ;;  %v5756_v59 = vcombine.low %v1172_v24, %v1176_v25  ;;  %v1209_v8 = vld [vmem:[#allocation7 + $0xdf8] sm:$0xff]  ;;  %v5789_v24 = vcombine.high %v1204_v62, %v1208_v61 }
 0x2f3   :  { %4523 = vmatprep.subr.bf16.mxu1 %v5743_v11  ;;  %v5790_v28 = vcombine.low %v1205_v7, %v1209_v8 }
 0x2f4   :  { %4352 = vmatpush1.bf16.msra.mxu0 %v5740_v18 }
 0x2f5   :  { %4524 = vmatpush1.bf16.msra.mxu1 %v5742_v20  ;;  %4353 = vmatprep.subr.bf16.mxu0 %v5749_v22 }
 0x2f6   :  { %4525 = vmatprep.subr.bf16.mxu1 %v5751_v23 }
 0x2f8   :  { %4354 = vmatpush1.bf16.msra.mxu0 %v5748_v29  ;;  %v5791_v29 = vcombine.high %v1205_v7, %v1209_v8 }
 0x2f9   :  { %4526 = vmatpush1.bf16.msra.mxu1 %v5750_v27  ;;  %4355 = vmatprep.subr.bf16.mxu0 %v5757_v40  ;;  %v1212_v27 = vld [vmem:[#allocation7 + $0xe10] sm:$0xff] }
 0x2fa   :  { %4527 = vmatprep.subr.bf16.mxu1 %v5759_v30  ;;  %v1216_v40 = vld [vmem:[#allocation7 + $0xe30] sm:$0xff] }
 0x2fb   :  { %v5797_v43 = vcombine.high %v1212_v27, %v1216_v40 }
 0x2fc   :  { %4356 = vmatpush1.bf16.msra.mxu0 %v5756_v59  ;;  %v1217_v59 = vld [vmem:[#allocation7 + $0xe38] sm:$0xff] }
 0x2fd   :  { %4528 = vmatpush1.bf16.msra.mxu1 %v5758_v37  ;;  %4357 = vmatprep.subr.bf16.mxu0 %v5765_v3  ;;  %v5798_v54 = vcombine.low %v1213_v35, %v1217_v59 }
 0x2fe   :  { %4529 = vmatprep.subr.bf16.mxu1 %v5767_v38 }
 0x300   :  { %4358 = vmatpush1.bf16.msra.mxu0 %v5764_v0 }
 0x301   :  { %4530 = vmatpush1.bf16.msra.mxu1 %v5766_v45  ;;  %4359 = vmatprep.subr.bf16.mxu0 %v5773_v46  ;;  %v5799_v46 = vcombine.high %v1213_v35, %v1217_v59 }
 0x302   :  { %v4039_v63 = vpop.f32.mrb[8].mxu0  ;;  %v4211_v19 = vpop.f32.mrb[8].mxu1  ;;  %4531 = vmatprep.subr.bf16.mxu1 %v5775_v48  ;;  %v1220_v48 = vld [vmem:[#allocation7 + $0xe50] sm:$0xff] }
 0x303   :  { %v6008_v2 = vadd.f32 %v4039_v63, %v1279_v52  ;;  %v6012_v4 = vadd.f32 %v4211_v19, %v1287_v53  ;;  %v4041_v6 = vpop.f32.mrb[9].mxu0  ;;  %v4213_v15 = vpop.f32.mrb[9].mxu1  ;;  %v5805_v42 = vcombine.high %v1220_v48, %v1224_v49  ;;  %v5804_v62 = vcombine.low %v1220_v48, %v1224_v49 }
 0x304   :  { %v6009_v9 = vadd.f32 %v4041_v6, %v1283_v56  ;;  %v6013_v21 = vadd.f32 %v4213_v15, %v1291_v57  ;;  %v4043_v10 = vpop.f32.mrb[10].mxu0  ;;  %v4215_v11 = vpop.f32.mrb[10].mxu1  ;;  %4360 = vmatpush1.bf16.msra.mxu0 %v5772_v58  ;;  %v1232_v58 = vld [vmem:[#allocation7 + $0xeb0] sm:$0xff]  ;;  %v1241_v6 = vld [vmem:[#allocation7 + $0xef8] sm:$0xff] }
 0x305   :  { %v6010_v18 = vadd.f32 %v4043_v10, %v1279_v52  ;;  %v6014_v20 = vadd.f32 %v4215_v11, %v1287_v53  ;;  %4532 = vmatpush1.bf16.msra.mxu1 %v5774_v60  ;;  %v4045_v22 = vpop.f32.mrb[11].mxu0  ;;  %v4217_v23 = vpop.f32.mrb[11].mxu1  ;;  %4361 = vmatprep.subr.bf16.mxu0 %v5781_v14  ;;  %v4564_v30 = vmax.f32 %v6008_v2, 0.0  ;;  %v4566_v31 = vmax.f32 %v6012_v4, 0.0  ;;  %v1225_v52 = vld [vmem:[#allocation7 + $0xe78] sm:$0xff]  ;;  %v1240_v2 = vld [vmem:[#allocation7 + $0xef0] sm:$0xff] }
 0x306   :  { %v6011_v25 = vadd.f32 %v4045_v22, %v1283_v56  ;;  %v6015_v26 = vadd.f32 %v4217_v23, %v1291_v57  ;;  %4533 = vmatprep.subr.bf16.mxu1 %v5783_v1  ;;  %v4565_v37 = vmax.f32 %v6009_v9, 0.0  ;;  %v4567_v3 = vmax.f32 %v6013_v21, 0.0  ;;  %v1228_v57 = vld [vmem:[#allocation7 + $0xe90] sm:$0xff]  ;;  %v1229_v60 = vld [vmem:[#allocation7 + $0xe98] sm:$0xff] }
 0x307   :  { %v4572_v33 = vmax.f32 %v6010_v18, 0.0  ;;  %v4574_v34 = vmax.f32 %v6014_v20, 0.0  ;;  %v5796_v53 = vcombine.low %v1212_v27, %v1216_v40  ;;  %v5807_v56 = vcombine.high %v1221_v50, %v1225_v52  ;;  %v1233_v14 = vld [vmem:[#allocation7 + $0xeb8] sm:$0xff]  ;;  %v1236_v1 = vld [vmem:[#allocation7 + $0xed0] sm:$0xff] }
 0x308   :  { %v4573_v38 = vmax.f32 %v6011_v25, 0.0  ;;  %v4575_v39 = vmax.f32 %v6015_v26, 0.0  ;;  %4362 = vmatpush1.bf16.msra.mxu0 %v5780_v16  ;;  %v5806_v61 = vcombine.low %v1221_v50, %v1225_v52  ;;  %v5813_v63 = vcombine.high %v1228_v57, %v1232_v58  ;;  %v1237_v4 = vld [vmem:[#allocation7 + $0xed8] sm:$0xff]  ;;  %v1244_v9 = vld [vmem:[#allocation7 + $0xf10] sm:$0xff] }
 0x309   :  { %v6536_v5 = vpack.c.bf16 %v4572_v33, %v4564_v30  ;;  %v6538_v41 = vpack.c.bf16 %v4574_v34, %v4566_v31  ;;  %4534 = vmatpush1.bf16.msra.mxu1 %v5782_v12  ;;  %4363 = vmatprep.subr.bf16.mxu0 %v5789_v24  ;;  %v5815_v19 = vcombine.high %v1229_v60, %v1233_v14  ;;  %v1248_v21 = vld [vmem:[#allocation7 + $0xf30] sm:$0xff]  ;;  %v1245_v10 = vld [vmem:[#allocation7 + $0xf18] sm:$0xff] }
 0x30a   :  { %v6540_v0 = vpack.c.bf16 %v4573_v38, %v4565_v37  ;;  %v6542_v45 = vpack.c.bf16 %v4575_v39, %v4567_v3  ;;  %4535 = vmatprep.subr.bf16.mxu1 %v5791_v29  ;;  %v5812_v15 = vcombine.low %v1228_v57, %v1232_v58  ;;  %v5814_v16 = vcombine.low %v1229_v60, %v1233_v14  ;;  %v1249_v11 = vld [vmem:[#allocation7 + $0xf38] sm:$0xff]  ;;  %v1252_v22 = vld [vmem:[#allocation7 + $0xf50] sm:$0xff]  ;;  %v6087_v57 = vld [vmem:[#allocation10 + $0x80] sm:$0xff]  }
 0x30b   :  { %v5821_v7 = vcombine.high %v1236_v1, %v1240_v2  ;;  %v5823_v8 = vcombine.high %v1237_v4, %v1241_v6  ;;  %v5820_v12 = vcombine.low %v1236_v1, %v1240_v2  ;;  %v5829_v18 = vcombine.high %v1244_v9, %v1248_v21  ;;  %v1256_v23 = vld [vmem:[#allocation7 + $0xf70] sm:$0xff]  ;;  %v1253_v24 = vld [vmem:[#allocation7 + $0xf58] sm:$0xff]  ;;  %v6096_v2 = vld [vmem:[#allocation10 + $0x58] sm:$0xff]  }
 0x30c   :  { %4364 = vmatpush1.bf16.msra.mxu0 %v5788_v17  ;;  %v5822_v17 = vcombine.low %v1237_v4, %v1241_v6  ;;  %v5831_v20 = vcombine.high %v1245_v10, %v1249_v11  ;;  %v1257_v25 = vld [vmem:[#allocation7 + $0xf78] sm:$0xff]  ;;  %v5828_v26 = vcombine.low %v1244_v9, %v1248_v21  ;;  %v5837_v29 = vcombine.high %v1252_v22, %v1256_v23  ;;  %v1260_v40 = vld [vmem:[#allocation7 + $0xf90] sm:$0xff]  ;;  %v6098_v4 = vld [vmem:[#allocation10 + $0x18] sm:$0xff]  }
 0x30d   :  { %4536 = vmatpush1.bf16.msra.mxu1 %v5790_v28  ;;  %4365 = vmatprep.subr.bf16.mxu0 %v5797_v43  ;;  %v5830_v28 = vcombine.low %v1245_v10, %v1249_v11  ;;  %v5839_v27 = vcombine.high %v1253_v24, %v1257_v25  ;;  %v1264_v30 = vld [vmem:[#allocation7 + $0xfb0] sm:$0xff]  ;;  %v1261_v31 = vld [vmem:[#allocation7 + $0xf98] sm:$0xff]  ;;  %v5836_v34 = vcombine.low %v1252_v22, %v1256_v23  ;;  %v6100_v6 = vld [vmem:[#allocation10 + $0x60] sm:$0xff]  }
 0x30e   :  { %4537 = vmatprep.subr.bf16.mxu1 %v5799_v46  ;;  %v1265_v33 = vld [vmem:[#allocation7 + $0xfb8] sm:$0xff]  ;;  %v5838_v35 = vcombine.low %v1253_v24, %v1257_v25  ;;  %v5845_v59 = vcombine.high %v1260_v40, %v1264_v30  ;;  %v1268_v3 = vld [vmem:[#allocation7 + $0xfd0] sm:$0xff]  ;;  %v5844_v46 = vcombine.low %v1260_v40, %v1264_v30  ;;  %v6114_v22 = vld [vmem:[#allocation10 + $0x38] sm:$0xff]  }
 0x30f   :  { %v5847_v37 = vcombine.high %v1261_v31, %v1265_v33  ;;  %v1272_v38 = vld [vmem:[#allocation7 + $0xff0] sm:$0xff]  ;;  %v1269_v39 = vld [vmem:[#allocation7 + $0xfd8] sm:$0xff]  ;;  %v5846_v48 = vcombine.low %v1261_v31, %v1265_v33  ;;  %v6115_v23 = vld [vmem:[#allocation10 + $0xb8] sm:$0xff]  }
 0x310   :  { %4366 = vmatpush1.bf16.msra.mxu0 %v5796_v53  ;;  %v1273_v43 = vld [vmem:[#allocation7 + $0xff8] sm:$0xff]  ;;  %v5853_v49 = vcombine.high %v1268_v3, %v1272_v38  ;;  %v5852_v52 = vcombine.low %v1268_v3, %v1272_v38  ;;  %v6088_v58 = vld [vmem:[#allocation10 + $0x48] sm:$0xff]   ;;  %v6116_v24 = vld [vmem:[#allocation10 + $0x140] sm:$0xff]  }
 0x311   :  { %4538 = vmatpush1.bf16.msra.mxu1 %v5798_v54  ;;  %4367 = vmatprep.subr.bf16.mxu0 %v5805_v42  ;;  %v5855_v50 = vcombine.high %v1269_v39, %v1273_v43  ;;  %v5854_v53 = vcombine.low %v1269_v39, %v1273_v43  ;;  %v6084_v54 = vld [vmem:[#allocation10 + $0x40] sm:$0xff]   ;;  %v6089_v60 = vld [vmem:[#allocation10 + $0xc8] sm:$0xff]   ;;  %v6095_v1 = vld [vmem:[#allocation10 + $0x90] sm:$0xff]  }
 0x312   :  { %4539 = vmatprep.subr.bf16.mxu1 %v5807_v56  ;;  %v6085_v42 = vld [vmem:[#allocation10 + $0xc0] sm:$0xff]   ;;  %v6090_v14 = vld [vmem:[#allocation10 + $0x8] sm:$0xff]   ;;  %v6108_v10 = vld [vmem:[#allocation10 + $0x70] sm:$0xff]  }
 0x313   :  { %v6086_v56 = vld [vmem:[#allocation10] sm:$0xff]   ;;  %v6106_v9 = vld [vmem:[#allocation10 + $0x28] sm:$0xff]   ;;  %v6109_v11 = vld [vmem:[#allocation10 + $0xf0] sm:$0xff]  }
 0x314   :  { %4368 = vmatpush1.bf16.msra.mxu0 %v5804_v62  ;;  %v6091_v62 = vld [vmem:[#allocation10 + $0x88] sm:$0xff]   ;;  %v6117_v25 = vld [vmem:[#allocation10 + $0x1c0] sm:$0xff]   ;;  %v6124_v31 = vld [vmem:[#allocation10 + $0x150] sm:$0xff]  }
 0x315   :  { %4540 = vmatpush1.bf16.msra.mxu1 %v5806_v61  ;;  %4369 = vmatprep.subr.bf16.mxu0 %v5813_v63  ;;  %v6092_v61 = vld [vmem:[#allocation10 + $0x50] sm:$0xff]   ;;  %v6107_v21 = vld [vmem:[#allocation10 + $0xa8] sm:$0xff]   ;;  %v6132_v3 = vld [vmem:[#allocation10 + $0x160] sm:$0xff]  }
 0x316   :  { %4541 = vmatprep.subr.bf16.mxu1 %v5815_v19  ;;  %v6093_v63 = vld [vmem:[#allocation10 + $0xd0] sm:$0xff]   ;;  %v6122_v40 = vld [vmem:[#allocation10 + $0x108] sm:$0xff]   ;;  %v6133_v38 = vld [vmem:[#allocation10 + $0x1e0] sm:$0xff]  }
 0x317   :  { %v6094_v19 = vld [vmem:[#allocation10 + $0x10] sm:$0xff]   ;;  %v6123_v30 = vld [vmem:[#allocation10 + $0x188] sm:$0xff]   ;;  %v6134_v39 = vld [vmem:[#allocation10 + $0x120] sm:$0xff]  }
 0x318   :  { %4370 = vmatpush1.bf16.msra.mxu0 %v5812_v15  ;;  %v6101_v15 = vld [vmem:[#allocation10 + $0xe0] sm:$0xff]   ;;  %v6125_v33 = vld [vmem:[#allocation10 + $0x1d0] sm:$0xff]  }
 0x319   :  { %4542 = vmatpush1.bf16.msra.mxu1 %v5814_v16  ;;  %4371 = vmatprep.subr.bf16.mxu0 %v5821_v7  ;;  %v6103_v16 = vld [vmem:[#allocation10 + $0xa0] sm:$0xff]   ;;  %v6104_v7 = vld [vmem:[#allocation10 + $0x68] sm:$0xff]  }
 0x31a   :  { %4543 = vmatprep.subr.bf16.mxu1 %v5823_v8  ;;  %v6105_v8 = vld [vmem:[#allocation10 + $0xe8] sm:$0xff]   ;;  %v6135_v43 = vld [vmem:[#allocation10 + $0x1a0] sm:$0xff]  }
 0x31c   :  { %4372 = vmatpush1.bf16.msra.mxu0 %v5820_v12  ;;  %v6110_v12 = vld [vmem:[#allocation10 + $0x30] sm:$0xff]  }
 0x31d   :  { %4544 = vmatpush1.bf16.msra.mxu1 %v5822_v17  ;;  %4373 = vmatprep.subr.bf16.mxu0 %v5829_v18  ;;  %v6111_v17 = vld [vmem:[#allocation10 + $0xb0] sm:$0xff]   ;;  %v6112_v18 = vld [vmem:[#allocation10 + $0x78] sm:$0xff]  }
 0x31e   :  { %4545 = vmatprep.subr.bf16.mxu1 %v5831_v20  ;;  %v6113_v20 = vld [vmem:[#allocation10 + $0xf8] sm:$0xff]  }
 0x320   :  { %4374 = vmatpush1.bf16.msra.mxu0 %v5828_v26  ;;  %v6118_v26 = vld [vmem:[#allocation10 + $0x100] sm:$0xff]  }
 0x321   :  { %4546 = vmatpush1.bf16.msra.mxu1 %v5830_v28  ;;  %4375 = vmatprep.subr.bf16.mxu0 %v5837_v29  ;;  %v6119_v28 = vld [vmem:[#allocation10 + $0x180] sm:$0xff]   ;;  %v6120_v29 = vld [vmem:[#allocation10 + $0x148] sm:$0xff]  }
 0x322   :  { %4547 = vmatprep.subr.bf16.mxu1 %v5839_v27  ;;  %v6121_v27 = vld [vmem:[#allocation10 + $0x1c8] sm:$0xff]  }
 0x324   :  { %4376 = vmatpush1.bf16.msra.mxu0 %v5836_v34  ;;  %v6126_v34 = vld [vmem:[#allocation10 + $0x110] sm:$0xff]  }
 0x325   :  { %4548 = vmatpush1.bf16.msra.mxu1 %v5838_v35  ;;  %4377 = vmatprep.subr.bf16.mxu0 %v5845_v59  ;;  %v6127_v35 = vld [vmem:[#allocation10 + $0x190] sm:$0xff]   ;;  %v6128_v59 = vld [vmem:[#allocation10 + $0x158] sm:$0xff]  }
 0x326   :  { %4549 = vmatprep.subr.bf16.mxu1 %v5847_v37  ;;  %v6129_v37 = vld [vmem:[#allocation10 + $0x1d8] sm:$0xff]  }
 0x328   :  { %4378 = vmatpush1.bf16.msra.mxu0 %v5844_v46  ;;  %v6136_v46 = vld [vmem:[#allocation10 + $0x168] sm:$0xff]  }
 0x329   :  { %4550 = vmatpush1.bf16.msra.mxu1 %v5846_v48  ;;  %4379 = vmatprep.subr.bf16.mxu0 %v5853_v49  ;;  %v6137_v48 = vld [vmem:[#allocation10 + $0x1e8] sm:$0xff]  }
 0x32a   :  { %4551 = vmatprep.subr.bf16.mxu1 %v5855_v50  ;;  %v6138_v49 = vld [vmem:[#allocation10 + $0x128] sm:$0xff]  }
 0x32b   :  { %v6139_v50 = vld [vmem:[#allocation10 + $0x1a8] sm:$0xff]  }
 0x32c   :  { %4380 = vmatpush1.bf16.msra.mxu0 %v5852_v52  ;;  %v6140_v52 = vld [vmem:[#allocation10 + $0x170] sm:$0xff]  }
 0x32d   :  { %4552 = vmatpush1.bf16.msra.mxu1 %v5854_v53  ;;  %5920 = vmatprep.subr.bf16.mxu0 %v6084_v54  ;;  %v6141_v53 = vld [vmem:[#allocation10 + $0x1f0] sm:$0xff]  }
 0x32e   :  { %5942 = vmatprep.subr.bf16.mxu1 %v6085_v42  ;;  %v6142_v54 = vld [vmem:[#allocation10 + $0x130] sm:$0xff]  }
 0x32f   :  { %4382 = vmatmul.mubr.bf16.vlgmr.msra.gmra.mrb[12].mxu0 %v6494_v55  ;;  %v6143_v42 = vld [vmem:[#allocation10 + $0x1b0] sm:$0xff]  }
 0x330   :  { %4554 = vmatmul.mubr.bf16.vlgmr.msra.gmra.mrb[12].mxu1 %v6494_v55  ;;  %5921 = vmatpush3.bf16.msra.mxu0 %v6086_v56  ;;  %v6097_v55 = vld [vmem:[#allocation10 + $0xd8] sm:$0xff]  }
 0x331   :  { %5134 = vmatprep.mubr.bf16.mxu0 %v6540_v0  ;;  %5943 = vmatpush3.bf16.msra.mxu1 %v6087_v57  ;;  %v6099_v0 = vld [vmem:[#allocation10 + $0x98] sm:$0xff]  }
 0x332   :  { %5175 = vmatprep.mubr.bf16.mxu1 %v6542_v45  ;;  %5922 = vmatprep.subr.bf16.mxu0 %v6088_v58  ;;  %v6102_v45 = vld [vmem:[#allocation10 + $0x20] sm:$0xff]   ;;  %v6144_v56 = vld [vmem:[#allocation10 + $0x178] sm:$0xff]  }
 0x333   :  { %5944 = vmatprep.subr.bf16.mxu1 %v6089_v60  ;;  %v6145_v57 = vld [vmem:[#allocation10 + $0x1f8] sm:$0xff]  }
 0x334   :  { %5923 = vmatpush3.bf16.msra.mxu0 %v6090_v14  ;;  %v6146_v58 = vld [vmem:[#allocation10 + $0x138] sm:$0xff]   ;;  %v1295_v14 = vrot.slane %v6522_v44, %v193_v32 }
 0x335   :  { %5945 = vmatpush3.bf16.msra.mxu1 %v6091_v62  ;;  %5924 = vmatprep.subr.bf16.mxu0 %v6092_v61  ;;  %v6147_v60 = vld [vmem:[#allocation10 + $0x1b8] sm:$0xff]   ;;  %v1303_v62 = vrot.slane %v6522_v44, %v201_v47  ;;  %v1299_v61 = vrot.slane %v6522_v44, %v197_v36 }
 0x336   :  { %5946 = vmatprep.subr.bf16.mxu1 %v6093_v63  ;;  %v1307_v63 = vrot.slane %v6522_v44, %v205_v51 }
 0x338   :  { %5925 = vmatpush3.bf16.msra.mxu0 %v6094_v19 }
 0x339   :  { %5947 = vmatpush3.bf16.msra.mxu1 %v6095_v1  ;;  %5926 = vmatprep.subr.bf16.mxu0 %v6096_v2 }
 0x33a   :  { %5948 = vmatprep.subr.bf16.mxu1 %v6097_v55 }
 0x33c   :  { %5927 = vmatpush3.bf16.msra.mxu0 %v6098_v4 }
 0x33d   :  { %5949 = vmatpush3.bf16.msra.mxu1 %v6099_v0  ;;  %5928 = vmatprep.subr.bf16.mxu0 %v6100_v6 }
 0x33e   :  { %5950 = vmatprep.subr.bf16.mxu1 %v6101_v15 }
 0x340   :  { %5929 = vmatpush3.bf16.msra.mxu0 %v6102_v45 }
 0x341   :  { %5951 = vmatpush3.bf16.msra.mxu1 %v6103_v16  ;;  %5930 = vmatprep.subr.bf16.mxu0 %v6104_v7 }
 0x342   :  { %5952 = vmatprep.subr.bf16.mxu1 %v6105_v8 }
 0x344   :  { %5931 = vmatpush3.bf16.msra.mxu0 %v6106_v9 }
 0x345   :  { %5953 = vmatpush3.bf16.msra.mxu1 %v6107_v21  ;;  %5932 = vmatprep.subr.bf16.mxu0 %v6108_v10 }
 0x346   :  { %5954 = vmatprep.subr.bf16.mxu1 %v6109_v11 }
 0x348   :  { %5933 = vmatpush3.bf16.msra.mxu0 %v6110_v12 }
 0x349   :  { %5955 = vmatpush3.bf16.msra.mxu1 %v6111_v17  ;;  %5934 = vmatprep.subr.bf16.mxu0 %v6112_v18 }
 0x34a   :  { %5956 = vmatprep.subr.bf16.mxu1 %v6113_v20 }
 0x34c   :  { %5935 = vmatpush3.bf16.msra.mxu0 %v6114_v22 }
 0x34d   :  { %5957 = vmatpush3.bf16.msra.mxu1 %v6115_v23  ;;  %5964 = vmatprep.subr.bf16.mxu0 %v6116_v24 }
 0x34e   :  { %5986 = vmatprep.subr.bf16.mxu1 %v6117_v25 }
 0x34f   :  { %5135 = vmatmul.mubr.bf16.vlgmr.msra.gmra.mrb[16].mxu0 %v6536_v5  ;;  %v6130_v5 = vld [vmem:[#allocation10 + $0x118] sm:$0xff]  }
 0x350   :  { %5176 = vmatmul.mubr.bf16.vlgmr.msra.gmra.mrb[16].mxu1 %v6538_v41  ;;  %5965 = vmatpush3.bf16.msra.mxu0 %v6118_v26  ;;  %v6131_v41 = vld [vmem:[#allocation10 + $0x198] sm:$0xff]  }
 0x351   :  { %5987 = vmatpush3.bf16.msra.mxu1 %v6119_v28  ;;  %5966 = vmatprep.subr.bf16.mxu0 %v6120_v29 }
 0x352   :  { %5988 = vmatprep.subr.bf16.mxu1 %v6121_v27 }
 0x354   :  { %5967 = vmatpush3.bf16.msra.mxu0 %v6122_v40 }
 0x355   :  { %5989 = vmatpush3.bf16.msra.mxu1 %v6123_v30  ;;  %5968 = vmatprep.subr.bf16.mxu0 %v6124_v31 }
 0x356   :  { %5990 = vmatprep.subr.bf16.mxu1 %v6125_v33 }
 0x358   :  { %5969 = vmatpush3.bf16.msra.mxu0 %v6126_v34 }
 0x359   :  { %5991 = vmatpush3.bf16.msra.mxu1 %v6127_v35  ;;  %5970 = vmatprep.subr.bf16.mxu0 %v6128_v59 }
 0x35a   :  { %5992 = vmatprep.subr.bf16.mxu1 %v6129_v37 }
 0x35c   :  { %5971 = vmatpush3.bf16.msra.mxu0 %v6130_v5 }
 0x35d   :  { %5993 = vmatpush3.bf16.msra.mxu1 %v6131_v41  ;;  %5972 = vmatprep.subr.bf16.mxu0 %v6132_v3 }
 0x35e   :  { %5994 = vmatprep.subr.bf16.mxu1 %v6133_v38 }
 0x360   :  { %5973 = vmatpush3.bf16.msra.mxu0 %v6134_v39 }
 0x361   :  { %5995 = vmatpush3.bf16.msra.mxu1 %v6135_v43  ;;  %5974 = vmatprep.subr.bf16.mxu0 %v6136_v46 }
 0x362   :  { %5996 = vmatprep.subr.bf16.mxu1 %v6137_v48 }
 0x364   :  { %5975 = vmatpush3.bf16.msra.mxu0 %v6138_v49 }
 0x365   :  { %5997 = vmatpush3.bf16.msra.mxu1 %v6139_v50  ;;  %5976 = vmatprep.subr.bf16.mxu0 %v6140_v52 }
 0x366   :  { %5998 = vmatprep.subr.bf16.mxu1 %v6141_v53 }
 0x368   :  { %5977 = vmatpush3.bf16.msra.mxu0 %v6142_v54  ;;  %v5343_v54 = vld [vmem:[#allocation11] ss:$0 sm:$0xff] }
 0x369   :  { %5999 = vmatpush3.bf16.msra.mxu1 %v6143_v42  ;;  %5978 = vmatprep.subr.bf16.mxu0 %v6144_v56 }
 0x36a   :  { %6000 = vmatprep.subr.bf16.mxu1 %v6145_v57 }
 0x36c   :  { %5979 = vmatpush3.bf16.msra.mxu0 %v6146_v58 }
 0x36d   :  { %6001 = vmatpush3.bf16.msra.mxu1 %v6147_v60 }
 0x402   :  { %v4383_v19 = vpop.f32.mrb[12].mxu0 }
 0x403   :  { %v6016_v1 = vadd.f32 %v4383_v19, %v1295_v14  ;;  %v4555_v2 = vpop.f32.mrb[12].mxu1  ;;  %v4385_v55 = vpop.f32.mrb[13].mxu0 }
 0x404   :  { %v6020_v4 = vadd.f32 %v4555_v2, %v1303_v62  ;;  %v6017_v0 = vadd.f32 %v4385_v55, %v1299_v61  ;;  %v4557_v6 = vpop.f32.mrb[13].mxu1  ;;  %v4387_v32 = vpop.f32.mrb[14].mxu0 }
 0x405   :  { %v6021_v15 = vadd.f32 %v4557_v6, %v1307_v63  ;;  %v6018_v45 = vadd.f32 %v4387_v32, %v1295_v14  ;;  %v4559_v16 = vpop.f32.mrb[14].mxu1  ;;  %v4389_v47 = vpop.f32.mrb[15].mxu0  ;;  %v4568_v36 = vmax.f32 %v6016_v1, 0.0 }
 0x406   :  { %v6022_v7 = vadd.f32 %v4559_v16, %v1303_v62  ;;  %v6019_v8 = vadd.f32 %v4389_v47, %v1299_v61  ;;  %v4561_v9 = vpop.f32.mrb[15].mxu1  ;;  %v4570_v10 = vmax.f32 %v6020_v4, 0.0  ;;  %v4569_v51 = vmax.f32 %v6017_v0, 0.0 }
 0x407   :  { %v4576_v21 = vmax.f32 %v6018_v45, 0.0  ;;  %v6023_v13 = vadd.f32 %v4561_v9, %v1307_v63  ;;  %v4571_v12 = vmax.f32 %v6021_v15, 0.0 }
 0x408   :  { %v4578_v44 = vmax.f32 %v6022_v7, 0.0  ;;  %v4577_v11 = vmax.f32 %v6019_v8, 0.0 }
 0x409   :  { %v4584_v17 = vpack.c.bf16 %v4576_v21, %v4568_v36  ;;  %v4579_v18 = vmax.f32 %v6023_v13, 0.0 }
 0x40a   :  { %v4586_v20 = vpack.c.bf16 %v4578_v44, %v4570_v10  ;;  %v4585_v22 = vpack.c.bf16 %v4577_v11, %v4569_v51 }
 0x40b   :  { %v4587_v23 = vpack.c.bf16 %v4579_v18, %v4571_v12 }
 0x40c   :  { %5216 = vmatprep.mubr.bf16.mxu0 %v4585_v22 }
 0x40d   :  { %5257 = vmatprep.mubr.bf16.mxu1 %v4587_v23  ;;  %5217 = vmatmul.mubr.bf16.vlgmr.msra.gmra.mrb[20].mxu0 %v4584_v17 }
 0x40e   :  { %5258 = vmatmul.mubr.bf16.vlgmr.msra.gmra.mrb[20].mxu1 %v4586_v20 }
 0x422   :  { %v5936_v24 = vpop.f32.mrb[16].mxu0 }
 0x423   :  { %v5958_v25 = vpop.f32.mrb[16].mxu1  ;;  %v5937_v26 = vpop.f32.mrb[17].mxu0 }
 0x424   :  { %v5938_v28 = vadd.f32 %v5937_v26, %v5936_v24  ;;  %v5959_v29 = vpop.f32.mrb[17].mxu1  ;;  %v5939_v27 = vpop.f32.mrb[18].mxu0 }
 0x425   :  { %v5960_v40 = vadd.f32 %v5959_v29, %v5958_v25  ;;  %v5961_v30 = vpop.f32.mrb[18].mxu1  ;;  %v5940_v31 = vpop.f32.mrb[19].mxu0 }
 0x426   :  { %v5941_v33 = vadd.f32 %v5940_v31, %v5939_v27  ;;  %v5962_v34 = vpop.f32.mrb[19].mxu1 }
 0x427   :  { %v5178_v35 = vadd.f32 %v5960_v40, %v5938_v28  ;;  %v5963_v59 = vadd.f32 %v5962_v34, %v5961_v30 }
 0x429   :  { %v5181_v37 = vadd.f32 %v5963_v59, %v5941_v33 }
 0x4e0   :  { %v5980_v5 = vpop.f32.mrb[20].mxu0 }
 0x4e1   :  { %v6002_v41 = vpop.f32.mrb[20].mxu1  ;;  %v5981_v3 = vpop.f32.mrb[21].mxu0 }
 0x4e2   :  { %v5982_v38 = vadd.f32 %v5981_v3, %v5980_v5  ;;  %v6003_v39 = vpop.f32.mrb[21].mxu1  ;;  %v5983_v43 = vpop.f32.mrb[22].mxu0 }
 0x4e3   :  { %v6004_v46 = vadd.f32 %v6003_v39, %v6002_v41  ;;  %v6005_v48 = vpop.f32.mrb[22].mxu1  ;;  %v5984_v49 = vpop.f32.mrb[23].mxu0 }
 0x4e4   :  { %v5219_v50 = vadd.f32 %v5982_v38, %v5178_v35  ;;  %v5985_v52 = vadd.f32 %v5984_v49, %v5983_v43  ;;  %v6006_v53 = vpop.f32.mrb[23].mxu1 }
 0x4e5   :  { %v6007_v42 = vadd.f32 %v6006_v53, %v6005_v48 }
 0x4e6   :  { %v5260_v56 = vadd.f32 %v6004_v46, %v5219_v50  ;;  %v5222_v57 = vadd.f32 %v5985_v52, %v5181_v37 }
 0x4e8   :  { %v5266_v58 = vadd.f32 %v5343_v54, %v5260_v56  ;;  %v5263_v60 = vadd.f32 %v6007_v42, %v5222_v57 }
 0x4ea   :  { %5268 = vst [vmem:[%s6575_s7] sm:$0xff] %v5266_v58  ;;  %v5267_v14 = vadd.f32 %v5343_v54, %v5263_v60 }
 0x4ec   :  { %5269 = vst [vmem:[%s6575_s7 + $0x8] sm:$0xff] %v5267_v14 }
 0x4ed   :  { %5274 = vsyncpa [#allocation4], 1 }
 0x4ee   :  { %5275 = vsyncpa [#allocation6], 1 }
 0x4ef   :  { %5276 = vsyncpa [#allocation9], 1 }
 0x4f0   :  { %5277 = vsyncpa [#allocation12], 1 }

</bundles_post_ra>
